<compile_context>
chip_gen: v6e
topology: v6e:2x2x1
jax: 0.10.0
libtpu: 0.0.40
codegen_flags: <defaults>
</compile_context>

<pallas_src>
import functools
import math

import jax
import jax.numpy as jnp
from jax.experimental import pallas as pl
from jax.experimental.pallas import tpu as pltpu


def _shift_seq(x, d, L):
    """out[:, l, :] = x[:, l + d, :] for 0 <= l + d < L else 0 (static d, register-resident)."""
    if d == 0:
        return x
    pad = jnp.zeros((x.shape[0], abs(d), x.shape[2]), x.dtype)
    if d > 0:
        return jnp.concatenate([x[:, d:, :], pad], axis=1)
    return jnp.concatenate([pad, x[:, :L + d, :]], axis=1)


def _gehring_kernel(keep_ref, emb_ref, w0_ref, b0_ref, wc_ref, bc_ref, out_ref, *,
                    hid_dim, num_layers, kernel_size, scale):
    Bb, L, Din = emb_ref.shape
    H = hid_dim
    K = kernel_size
    P = (K - 1) // 2
    M = Bb * L

    # emb2init_hid (Linear in_dim -> 2H) + GLU.  bf16 MXU inputs, f32 accumulation.
    emb = emb_ref[...].reshape(M, Din)                                       # (M, Din) bf16
    z = jnp.dot(emb, w0_ref[...], preferred_element_type=jnp.float32) + b0_ref[...]
    init_hidden = z[:, :H] * jax.nn.sigmoid(z[:, H:])                        # (M, H) f32

    # Hoist the pad-mask broadcast once (JAX does not CSE broadcast_in_dim).
    keep = jnp.broadcast_to(keep_ref[...].reshape(M, 1), (M, H))             # (M, H) f32

    hidden = init_hidden
    for layer in range(num_layers):
        # torch: hidden.masked_fill_(pad_mask, 0) is in-place -> residual uses masked hidden.
        hidden = hidden * keep
        h3 = hidden.reshape(Bb, L, H)
        # "same" conv as one fused matmul: concat the K shifted windows along channels.
        x_cat = jnp.concatenate([_shift_seq(h3, k - P, L) for k in range(K)], axis=-1)
        x_cat = x_cat.astype(jnp.bfloat16).reshape(M, K * H)
        conv = jnp.dot(x_cat, wc_ref[layer],
                       preferred_element_type=jnp.float32) + bc_ref[layer]   # (M, 2H)
        conved = conv[:, :H] * jax.nn.sigmoid(conv[:, H:])                   # GLU over channels
        hidden = (hidden + conved) * scale                                   # residual + scale

    out_ref[...] = ((init_hidden + hidden) * scale).reshape(Bb, L, H).astype(out_ref.dtype)


def gehring_conv_encoder(embedded, mask, w0, b0, wc, bc, *, scale, b_block=8):
    """embedded: (B, L, Din) f32; mask: (B, L) bool, True = padding position."""
    B, L, Din = embedded.shape
    num_layers, K, H, twoH = wc.shape
    assert twoH == 2 * H

    # Largest batch block <= b_block that divides B (MXU M-dim per step = bb*L rows).
    bb = max(1, min(b_block, B))
    while B % bb:
        bb -= 1

    keep = (~mask).astype(jnp.float32).reshape(B, L, 1)          # 1 = valid, 0 = pad
    emb_bf = embedded.astype(jnp.bfloat16)                       # halve HBM/VMEM traffic
    w0_bf = w0.astype(jnp.bfloat16)
    wc_bf = wc.reshape(num_layers, K * H, 2 * H).astype(jnp.bfloat16)   # fused (K*H, 2H) layout
    b0_2d = b0.reshape(1, 2 * H).astype(jnp.float32)
    bc_3d = bc.reshape(num_layers, 1, 2 * H).astype(jnp.float32)

    kernel = functools.partial(_gehring_kernel, hid_dim=H, num_layers=num_layers,
                               kernel_size=K, scale=scale)

    return pl.pallas_call(
        kernel,
        out_shape=jax.ShapeDtypeStruct((B, L, H), jnp.float32),
        grid_spec=pltpu.PrefetchScalarGridSpec(
            num_scalar_prefetch=0,
            grid=(B // bb,),
            in_specs=[
                pl.BlockSpec((bb, L, 1), lambda b: (b, 0, 0)),                    # keep mask
                pl.BlockSpec((bb, L, Din), lambda b: (b, 0, 0)),                  # embedded (bf16)
                pl.BlockSpec((Din, 2 * H), lambda b: (0, 0)),                     # W0 (bf16)
                pl.BlockSpec((1, 2 * H), lambda b: (0, 0)),                       # b0
                pl.BlockSpec((num_layers, K * H, 2 * H), lambda b: (0, 0, 0)),    # fused conv weights
                pl.BlockSpec((num_layers, 1, 2 * H), lambda b: (0, 0, 0)),        # conv biases
            ],
            out_specs=pl.BlockSpec((bb, L, H), lambda b: (b, 0, 0)),
        ),
        # Batch blocks are independent -> "parallel" lets v7x shard the grid across
        # its two TensorCores; neutral on single-TC v5e/v6e.
        compiler_params=pltpu.CompilerParams(dimension_semantics=("parallel",)),
    )(keep, emb_bf, w0_bf, b0_2d, wc_bf, bc_3d)


def reference_forward(embedded, mask, w0, b0, wc, bc, *, scale):
    """Pure-JAX f32 reference of the same forward pass (channels-last)."""
    B, L, _ = embedded.shape
    num_layers, K, H, _ = wc.shape
    P = (K - 1) // 2
    keep = (~mask).astype(jnp.float32)[..., None]                # (B, L, 1)

    z = jnp.einsum("bld,dh->blh", embedded, w0) + b0
    init_hidden = z[..., :H] * jax.nn.sigmoid(z[..., H:])
    hidden = init_hidden
    for layer in range(num_layers):
        hidden = hidden * keep
        xpad = jnp.pad(hidden, ((0, 0), (P, P), (0, 0)))
        acc = jnp.zeros((B, L, 2 * H), jnp.float32)
        for k in range(K):
            acc = acc + jnp.einsum("bld,dh->blh", xpad[:, k:k + L], wc[layer, k])
        conv = acc + bc[layer][None, None, :]
        conved = conv[..., :H] * jax.nn.sigmoid(conv[..., H:])
        hidden = (hidden + conved) * scale
    return (init_hidden + hidden) * scale


if __name__ == "__main__":
    # Small config consistent with EncoderConfig(arch='gehring') defaults (hid_dim=128,
    # kernel_size=3, num_layers=3, scale=sqrt(0.5)).
    B, L, IN_DIM, HID_DIM = 16, 16, 64, 128
    NUM_LAYERS, KERNEL_SIZE = 3, 3
    SCALE = math.sqrt(0.5)

    key = jax.random.PRNGKey(0)
    k_emb, k_len, k_w0, k_b0, k_wc, k_bc = jax.random.split(key, 6)

    embedded = jax.random.normal(k_emb, (B, L, IN_DIM), dtype=jnp.float32)
    # padding mask: True = pad (eznlp convention); random sequence lengths in [4, L]
    lengths = jax.random.randint(k_len, (B,), 4, L + 1)
    mask = jnp.arange(L)[None, :] >= lengths[:, None]            # (B, L) bool

    # Deterministic synthetic parameters (shapes follow GehringConvEncoder.__init__).
    w0 = 0.10 * jax.random.normal(k_w0, (IN_DIM, 2 * HID_DIM), dtype=jnp.float32)
    b0 = 0.10 * jax.random.normal(k_b0, (2 * HID_DIM,), dtype=jnp.float32)
    wc = 0.05 * jax.random.normal(k_wc, (NUM_LAYERS, KERNEL_SIZE, HID_DIM, 2 * HID_DIM),
                                  dtype=jnp.float32)
    bc = 0.10 * jax.random.normal(k_bc, (NUM_LAYERS, 2 * HID_DIM), dtype=jnp.float32)

    out = gehring_conv_encoder(embedded, mask, w0, b0, wc, bc, scale=SCALE)
    out = jax.block_until_ready(out)

    ref = reference_forward(embedded, mask, w0, b0, wc, bc, scale=SCALE)
    assert out.shape == (B, L, HID_DIM)
    # bf16 MXU inputs (f32 accumulation) -> loosened tolerance vs the pure-f32 reference.
    assert jnp.allclose(out, ref, atol=5e-2, rtol=5e-2), "mismatch vs reference"

    # TODO(synk): dropout (CombinedDropout / hid_drop_rate) is a no-op in eval mode and is omitted.
    print("KERNEL_OK")
</pallas_src>

<mosaic_0001>
module attributes {stable_mosaic.version = 11 : i64} {
  func.func @_gehring_kernel(%arg0: i32, %arg1: memref<8x16x1xf32, #tpu.memory_space<vmem>>, %arg2: memref<8x16x64xbf16, #tpu.memory_space<vmem>>, %arg3: memref<64x256xbf16, #tpu.memory_space<vmem>>, %arg4: memref<1x256xf32, #tpu.memory_space<vmem>>, %arg5: memref<3x384x256xbf16, #tpu.memory_space<vmem>>, %arg6: memref<3x1x256xf32, #tpu.memory_space<vmem>>, %arg7: memref<8x16x128xf32, #tpu.memory_space<vmem>>) attributes {dimension_semantics = [#tpu.dimension_semantics<parallel>], iteration_bounds = array<i64: 2>, scalar_prefetch = 0 : i64, scratch_operands = 0 : i64, tpu.core_type = #tpu.core_type<tc>, window_params = [{transform_indices = @transform_0, window_bounds = array<i64: 8, 16, 1>}, {transform_indices = @transform_1, window_bounds = array<i64: 8, 16, 64>}, {pipeline_mode = #tpu.pipeline_mode<synchronous>, transform_indices = @transform_2, window_bounds = array<i64: 64, 256>}, {pipeline_mode = #tpu.pipeline_mode<synchronous>, transform_indices = @transform_3, window_bounds = array<i64: 1, 256>}, {pipeline_mode = #tpu.pipeline_mode<synchronous>, transform_indices = @transform_4, window_bounds = array<i64: 3, 384, 256>}, {pipeline_mode = #tpu.pipeline_mode<synchronous>, transform_indices = @transform_5, window_bounds = array<i64: 3, 1, 256>}, {transform_indices = @transform_6, window_bounds = array<i64: 8, 16, 128>}]} {
    %c0 = arith.constant 0 : index
    %c0_0 = arith.constant 0 : index
    %c0_1 = arith.constant 0 : index
    %0 = vector.load %arg2[%c0, %c0_0, %c0_1] : memref<8x16x64xbf16, #tpu.memory_space<vmem>>, vector<8x16x64xbf16>
    %1 = vector.shape_cast %0 : vector<8x16x64xbf16> to vector<128x64xbf16>
    %c0_2 = arith.constant 0 : index
    %c0_3 = arith.constant 0 : index
    %2 = vector.load %arg3[%c0_2, %c0_3] : memref<64x256xbf16, #tpu.memory_space<vmem>>, vector<64x256xbf16>
    %cst = arith.constant dense<0.000000e+00> : vector<128x256xf32>
    %3 = tpu.matmul %1, %2, %cst {dimension_numbers = #tpu.dot_dimension_numbers<[1], [0], [0], [1], [0, 0, 1, 1], [], []>} : vector<128x64xbf16>, vector<64x256xbf16>, vector<128x256xf32> -> vector<128x256xf32>
    %c0_4 = arith.constant 0 : index
    %c0_5 = arith.constant 0 : index
    %4 = vector.load %arg4[%c0_4, %c0_5] : memref<1x256xf32, #tpu.memory_space<vmem>>, vector<1x256xf32>
    %5 = vector.broadcast %4 : vector<1x256xf32> to vector<128x256xf32>
    %6 = arith.addf %3, %5 : vector<128x256xf32>
    %7 = vector.extract_strided_slice %6 {offsets = [0, 0], sizes = [128, 128], strides = [1, 1]} : vector<128x256xf32> to vector<128x128xf32>
    %8 = vector.extract_strided_slice %6 {offsets = [0, 128], sizes = [128, 128], strides = [1, 1]} : vector<128x256xf32> to vector<128x128xf32>
    %9 = arith.negf %8 : vector<128x128xf32>
    %10 = math.exp %9 : vector<128x128xf32>
    %cst_6 = arith.constant 1.000000e+00 : f32
    %11 = vector.broadcast %cst_6 : f32 to vector<128x128xf32>
    %12 = arith.addf %11, %10 : vector<128x128xf32>
    %13 = arith.divf %11, %12 : vector<128x128xf32>
    %14 = arith.mulf %7, %13 : vector<128x128xf32>
    %c0_7 = arith.constant 0 : index
    %c0_8 = arith.constant 0 : index
    %c0_9 = arith.constant 0 : index
    %15 = vector.load %arg1[%c0_7, %c0_8, %c0_9] : memref<8x16x1xf32, #tpu.memory_space<vmem>>, vector<8x16x1xf32>
    %16 = vector.shape_cast %15 : vector<8x16x1xf32> to vector<128x1xf32>
    %17 = vector.shape_cast %16 : vector<128x1xf32> to vector<128x1xf32>
    %18 = vector.broadcast %17 : vector<128x1xf32> to vector<128x128xf32>
    %19 = arith.mulf %14, %18 : vector<128x128xf32>
    %20 = vector.shape_cast %19 : vector<128x128xf32> to vector<8x16x128xf32>
    %cst_10 = arith.constant 0.000000e+00 : f32
    %21 = vector.broadcast %cst_10 : f32 to vector<8x1x128xf32>
    %22 = vector.extract_strided_slice %20 {offsets = [0, 0, 0], sizes = [8, 15, 128], strides = [1, 1, 1]} : vector<8x16x128xf32> to vector<8x15x128xf32>
    %23 = tpu.concatenate %21, %22 in 1 : vector<8x1x128xf32>, vector<8x15x128xf32> -> vector<8x16x128xf32>
    %cst_11 = arith.constant 0.000000e+00 : f32
    %24 = vector.broadcast %cst_11 : f32 to vector<8x1x128xf32>
    %25 = vector.extract_strided_slice %20 {offsets = [0, 1, 0], sizes = [8, 15, 128], strides = [1, 1, 1]} : vector<8x16x128xf32> to vector<8x15x128xf32>
    %26 = tpu.concatenate %25, %24 in 1 : vector<8x15x128xf32>, vector<8x1x128xf32> -> vector<8x16x128xf32>
    %27 = tpu.concatenate %23, %20, %26 in 2 : vector<8x16x128xf32>, vector<8x16x128xf32>, vector<8x16x128xf32> -> vector<8x16x384xf32>
    %28 = arith.truncf %27 : vector<8x16x384xf32> to vector<8x16x384xbf16>
    %29 = vector.shape_cast %28 : vector<8x16x384xbf16> to vector<128x384xbf16>
    %c0_12 = arith.constant 0 : index
    %c0_13 = arith.constant 0 : index
    %c0_14 = arith.constant 0 : index
    %30 = vector.load %arg5[%c0_12, %c0_13, %c0_14] : memref<3x384x256xbf16, #tpu.memory_space<vmem>>, vector<1x384x256xbf16>
    %31 = vector.shape_cast %30 : vector<1x384x256xbf16> to vector<384x256xbf16>
    %cst_15 = arith.constant dense<0.000000e+00> : vector<128x256xf32>
    %32 = tpu.matmul %29, %31, %cst_15 {dimension_numbers = #tpu.dot_dimension_numbers<[1], [0], [0], [1], [0, 0, 1, 1], [], []>} : vector<128x384xbf16>, vector<384x256xbf16>, vector<128x256xf32> -> vector<128x256xf32>
    %c0_16 = arith.constant 0 : index
    %c0_17 = arith.constant 0 : index
    %c0_18 = arith.constant 0 : index
    %33 = vector.load %arg6[%c0_16, %c0_17, %c0_18] : memref<3x1x256xf32, #tpu.memory_space<vmem>>, vector<1x1x256xf32>
    %34 = vector.shape_cast %33 : vector<1x1x256xf32> to vector<1x256xf32>
    %35 = vector.broadcast %34 : vector<1x256xf32> to vector<128x256xf32>
    %36 = arith.addf %32, %35 : vector<128x256xf32>
    %37 = vector.extract_strided_slice %36 {offsets = [0, 0], sizes = [128, 128], strides = [1, 1]} : vector<128x256xf32> to vector<128x128xf32>
    %38 = vector.extract_strided_slice %36 {offsets = [0, 128], sizes = [128, 128], strides = [1, 1]} : vector<128x256xf32> to vector<128x128xf32>
    %39 = arith.negf %38 : vector<128x128xf32>
    %40 = math.exp %39 : vector<128x128xf32>
    %cst_19 = arith.constant 1.000000e+00 : f32
    %41 = vector.broadcast %cst_19 : f32 to vector<128x128xf32>
    %42 = arith.addf %41, %40 : vector<128x128xf32>
    %43 = arith.divf %41, %42 : vector<128x128xf32>
    %44 = arith.mulf %37, %43 : vector<128x128xf32>
    %45 = arith.addf %19, %44 : vector<128x128xf32>
    %cst_20 = arith.constant 0.707106769 : f32
    %46 = vector.broadcast %cst_20 : f32 to vector<128x128xf32>
    %47 = arith.mulf %45, %46 : vector<128x128xf32>
    %48 = arith.mulf %47, %18 : vector<128x128xf32>
    %49 = vector.shape_cast %48 : vector<128x128xf32> to vector<8x16x128xf32>
    %cst_21 = arith.constant 0.000000e+00 : f32
    %50 = vector.broadcast %cst_21 : f32 to vector<8x1x128xf32>
    %51 = vector.extract_strided_slice %49 {offsets = [0, 0, 0], sizes = [8, 15, 128], strides = [1, 1, 1]} : vector<8x16x128xf32> to vector<8x15x128xf32>
    %52 = tpu.concatenate %50, %51 in 1 : vector<8x1x128xf32>, vector<8x15x128xf32> -> vector<8x16x128xf32>
    %cst_22 = arith.constant 0.000000e+00 : f32
    %53 = vector.broadcast %cst_22 : f32 to vector<8x1x128xf32>
    %54 = vector.extract_strided_slice %49 {offsets = [0, 1, 0], sizes = [8, 15, 128], strides = [1, 1, 1]} : vector<8x16x128xf32> to vector<8x15x128xf32>
    %55 = tpu.concatenate %54, %53 in 1 : vector<8x15x128xf32>, vector<8x1x128xf32> -> vector<8x16x128xf32>
    %56 = tpu.concatenate %52, %49, %55 in 2 : vector<8x16x128xf32>, vector<8x16x128xf32>, vector<8x16x128xf32> -> vector<8x16x384xf32>
    %57 = arith.truncf %56 : vector<8x16x384xf32> to vector<8x16x384xbf16>
    %58 = vector.shape_cast %57 : vector<8x16x384xbf16> to vector<128x384xbf16>
    %c1 = arith.constant 1 : index
    %c0_23 = arith.constant 0 : index
    %c0_24 = arith.constant 0 : index
    %59 = vector.load %arg5[%c1, %c0_23, %c0_24] : memref<3x384x256xbf16, #tpu.memory_space<vmem>>, vector<1x384x256xbf16>
    %60 = vector.shape_cast %59 : vector<1x384x256xbf16> to vector<384x256xbf16>
    %cst_25 = arith.constant dense<0.000000e+00> : vector<128x256xf32>
    %61 = tpu.matmul %58, %60, %cst_25 {dimension_numbers = #tpu.dot_dimension_numbers<[1], [0], [0], [1], [0, 0, 1, 1], [], []>} : vector<128x384xbf16>, vector<384x256xbf16>, vector<128x256xf32> -> vector<128x256xf32>
    %c1_26 = arith.constant 1 : index
    %c0_27 = arith.constant 0 : index
    %c0_28 = arith.constant 0 : index
    %62 = vector.load %arg6[%c1_26, %c0_27, %c0_28] : memref<3x1x256xf32, #tpu.memory_space<vmem>>, vector<1x1x256xf32>
    %63 = vector.shape_cast %62 : vector<1x1x256xf32> to vector<1x256xf32>
    %64 = vector.broadcast %63 : vector<1x256xf32> to vector<128x256xf32>
    %65 = arith.addf %61, %64 : vector<128x256xf32>
    %66 = vector.extract_strided_slice %65 {offsets = [0, 0], sizes = [128, 128], strides = [1, 1]} : vector<128x256xf32> to vector<128x128xf32>
    %67 = vector.extract_strided_slice %65 {offsets = [0, 128], sizes = [128, 128], strides = [1, 1]} : vector<128x256xf32> to vector<128x128xf32>
    %68 = arith.negf %67 : vector<128x128xf32>
    %69 = math.exp %68 : vector<128x128xf32>
    %cst_29 = arith.constant 1.000000e+00 : f32
    %70 = vector.broadcast %cst_29 : f32 to vector<128x128xf32>
    %71 = arith.addf %70, %69 : vector<128x128xf32>
    %72 = arith.divf %70, %71 : vector<128x128xf32>
    %73 = arith.mulf %66, %72 : vector<128x128xf32>
    %74 = arith.addf %48, %73 : vector<128x128xf32>
    %cst_30 = arith.constant 0.707106769 : f32
    %75 = vector.broadcast %cst_30 : f32 to vector<128x128xf32>
    %76 = arith.mulf %74, %75 : vector<128x128xf32>
    %77 = arith.mulf %76, %18 : vector<128x128xf32>
    %78 = vector.shape_cast %77 : vector<128x128xf32> to vector<8x16x128xf32>
    %cst_31 = arith.constant 0.000000e+00 : f32
    %79 = vector.broadcast %cst_31 : f32 to vector<8x1x128xf32>
    %80 = vector.extract_strided_slice %78 {offsets = [0, 0, 0], sizes = [8, 15, 128], strides = [1, 1, 1]} : vector<8x16x128xf32> to vector<8x15x128xf32>
    %81 = tpu.concatenate %79, %80 in 1 : vector<8x1x128xf32>, vector<8x15x128xf32> -> vector<8x16x128xf32>
    %cst_32 = arith.constant 0.000000e+00 : f32
    %82 = vector.broadcast %cst_32 : f32 to vector<8x1x128xf32>
    %83 = vector.extract_strided_slice %78 {offsets = [0, 1, 0], sizes = [8, 15, 128], strides = [1, 1, 1]} : vector<8x16x128xf32> to vector<8x15x128xf32>
    %84 = tpu.concatenate %83, %82 in 1 : vector<8x15x128xf32>, vector<8x1x128xf32> -> vector<8x16x128xf32>
    %85 = tpu.concatenate %81, %78, %84 in 2 : vector<8x16x128xf32>, vector<8x16x128xf32>, vector<8x16x128xf32> -> vector<8x16x384xf32>
    %86 = arith.truncf %85 : vector<8x16x384xf32> to vector<8x16x384xbf16>
    %87 = vector.shape_cast %86 : vector<8x16x384xbf16> to vector<128x384xbf16>
    %c2 = arith.constant 2 : index
    %c0_33 = arith.constant 0 : index
    %c0_34 = arith.constant 0 : index
    %88 = vector.load %arg5[%c2, %c0_33, %c0_34] : memref<3x384x256xbf16, #tpu.memory_space<vmem>>, vector<1x384x256xbf16>
    %89 = vector.shape_cast %88 : vector<1x384x256xbf16> to vector<384x256xbf16>
    %cst_35 = arith.constant dense<0.000000e+00> : vector<128x256xf32>
    %90 = tpu.matmul %87, %89, %cst_35 {dimension_numbers = #tpu.dot_dimension_numbers<[1], [0], [0], [1], [0, 0, 1, 1], [], []>} : vector<128x384xbf16>, vector<384x256xbf16>, vector<128x256xf32> -> vector<128x256xf32>
    %c2_36 = arith.constant 2 : index
    %c0_37 = arith.constant 0 : index
    %c0_38 = arith.constant 0 : index
    %91 = vector.load %arg6[%c2_36, %c0_37, %c0_38] : memref<3x1x256xf32, #tpu.memory_space<vmem>>, vector<1x1x256xf32>
    %92 = vector.shape_cast %91 : vector<1x1x256xf32> to vector<1x256xf32>
    %93 = vector.broadcast %92 : vector<1x256xf32> to vector<128x256xf32>
    %94 = arith.addf %90, %93 : vector<128x256xf32>
    %95 = vector.extract_strided_slice %94 {offsets = [0, 0], sizes = [128, 128], strides = [1, 1]} : vector<128x256xf32> to vector<128x128xf32>
    %96 = vector.extract_strided_slice %94 {offsets = [0, 128], sizes = [128, 128], strides = [1, 1]} : vector<128x256xf32> to vector<128x128xf32>
    %97 = arith.negf %96 : vector<128x128xf32>
    %98 = math.exp %97 : vector<128x128xf32>
    %cst_39 = arith.constant 1.000000e+00 : f32
    %99 = vector.broadcast %cst_39 : f32 to vector<128x128xf32>
    %100 = arith.addf %99, %98 : vector<128x128xf32>
    %101 = arith.divf %99, %100 : vector<128x128xf32>
    %102 = arith.mulf %95, %101 : vector<128x128xf32>
    %103 = arith.addf %77, %102 : vector<128x128xf32>
    %cst_40 = arith.constant 0.707106769 : f32
    %104 = vector.broadcast %cst_40 : f32 to vector<128x128xf32>
    %105 = arith.mulf %103, %104 : vector<128x128xf32>
    %106 = arith.addf %14, %105 : vector<128x128xf32>
    %cst_41 = arith.constant 0.707106769 : f32
    %107 = vector.broadcast %cst_41 : f32 to vector<128x128xf32>
    %108 = arith.mulf %106, %107 : vector<128x128xf32>
    %109 = vector.shape_cast %108 : vector<128x128xf32> to vector<8x16x128xf32>
    %c0_42 = arith.constant 0 : index
    %c0_43 = arith.constant 0 : index
    %c0_44 = arith.constant 0 : index
    %110 = vector.load %arg7[%c0_42, %c0_43, %c0_44] : memref<8x16x128xf32, #tpu.memory_space<vmem>>, vector<8x16x128xf32>
    tpu.vector_store %arg7[%c0_42, %c0_43, %c0_44], %109 {strides = array<i32>} : memref<8x16x128xf32, #tpu.memory_space<vmem>>, vector<8x16x128xf32>,
    return
  }
  func.func @transform_0(%arg0: i32) -> (i32, i32, i32) {
    %c0_i32 = arith.constant 0 : i32
    %c0_i32_0 = arith.constant 0 : i32
    %c0_i32_1 = arith.constant 0 : i32
    return %arg0, %c0_i32, %c0_i32_0 : i32, i32, i32
  }
  func.func @transform_1(%arg0: i32) -> (i32, i32, i32) {
    %c0_i32 = arith.constant 0 : i32
    %c0_i32_0 = arith.constant 0 : i32
    %c0_i32_1 = arith.constant 0 : i32
    return %arg0, %c0_i32, %c0_i32_0 : i32, i32, i32
  }
  func.func @transform_2(%arg0: i32) -> (i32, i32) {
    %c0_i32 = arith.constant 0 : i32
    %c0_i32_0 = arith.constant 0 : i32
    %c0_i32_1 = arith.constant 0 : i32
    return %c0_i32, %c0_i32_0 : i32, i32
  }
  func.func @transform_3(%arg0: i32) -> (i32, i32) {
    %c0_i32 = arith.constant 0 : i32
    %c0_i32_0 = arith.constant 0 : i32
    %c0_i32_1 = arith.constant 0 : i32
    return %c0_i32, %c0_i32_0 : i32, i32
  }
  func.func @transform_4(%arg0: i32) -> (i32, i32, i32) {
    %c0_i32 = arith.constant 0 : i32
    %c0_i32_0 = arith.constant 0 : i32
    %c0_i32_1 = arith.constant 0 : i32
    %c0_i32_2 = arith.constant 0 : i32
    return %c0_i32, %c0_i32_0, %c0_i32_1 : i32, i32, i32
  }
  func.func @transform_5(%arg0: i32) -> (i32, i32, i32) {
    %c0_i32 = arith.constant 0 : i32
    %c0_i32_0 = arith.constant 0 : i32
    %c0_i32_1 = arith.constant 0 : i32
    %c0_i32_2 = arith.constant 0 : i32
    return %c0_i32, %c0_i32_0, %c0_i32_1 : i32, i32, i32
  }
  func.func @transform_6(%arg0: i32) -> (i32, i32, i32) {
    %c0_i32 = arith.constant 0 : i32
    %c0_i32_0 = arith.constant 0 : i32
    %c0_i32_1 = arith.constant 0 : i32
    return %arg0, %c0_i32, %c0_i32_0 : i32, i32, i32
  }
}

</mosaic_0001>

<bundles_post_ra>
// kernel: tpu_custom_call.1
= control target key start
LH: loop header
LB: loop body
LE: loop exit
PB: predicated region body
PF: predicated region fallthrough
CT: control target
= control target key end

     0   :  { %11 = vsyncpa [#allocation3], 0  ;;  %s5902_s0 = inlined_call_operand.vmem [shape: f32[16,16,1], index: 0, kind: input, shape index: {}]   ;;  %s5903_s1 = inlined_call_operand.vmem [shape: bf16[16,16,64], index: 1, kind: input, shape index: {}]   ;;  %s5904_s2 = inlined_call_operand.vmem [shape: bf16[64,256], index: 2, kind: input, shape index: {}]   ;;  %s5905_s3 = inlined_call_operand.vmem [shape: f32[1,256], index: 3, kind: input, shape index: {}]   ;;  %s5906_s4 = inlined_call_operand.hbm [shape: bf16[3,384,256], index: 4, kind: input, shape index: {}]   ;;  %s5907_s5 = inlined_call_operand.vmem [shape: f32[3,1,256], index: 5, kind: input, shape index: {}]   ;;  %s5908_s6 = inlined_call_operand.hbm [shape: f32[16,16,128], index: 6, kind: output, shape index: {}]  }
   0x1   :  { %12 = vsyncpa [#allocation4], 0 }
   0x2   :  { %14 = vsyncpa [#allocation4 + $0x1], 0  ;;  %s4506_s21 = smov 0   ;;  %s4508_s22 = smov 0  }
   0x3   :  { %s4510_s23 = smov 0   ;;  %s4512_s24 = smov 0  }
   0x4 LB: > { %s4527_s25 = sadd.s32 4294967295, %s4461_s24   ;;  %s3380_s26 = sadd.s32 4294967294, %s4461_s24   ;;  %s4461_s24 = sphi %s4512_s24, %s6100_s24   ;;  %s4457_s23 = sphi %s4510_s23, %s6099_s23   ;;  %s4453_s22 = sphi %s4508_s22, %s6098_s22   ;;  %s4449_s21 = sphi %s4506_s21, %s6097_s21  }
   0x5   : > { %s4531_s27 = sadd.s32 1, %s4461_s24   ;;  %s163_s28 = sadd.s32 1, %s4457_s23 }
   0x6   : > { %s160_s29 = ssub.s32 %s4461_s24, %s4531_s27  ;;  %p173_p0 = scmp.ne.s32.totalorder %s4457_s23, %s4453_s22 }
   0x7   : > { %p161_p1 = scmp.eq.s32.totalorder %s160_s29, 0  ;;  %p174_p2 = scmp.eq.s32.totalorder %s4527_s25, 1 }
   0x8   : > { %p179_p3 = scmp.ne.s32.totalorder %s4453_s22, %s4449_s21  ;;  %p180_p4 = scmp.eq.s32.totalorder %s3380_s26, 1 }
   0x9   : > { %s4542_s30 = scalar_select %p161_p1, %s4457_s23, %s163_s28  }
   0xa   : > { %p4544_p5 = por %p174_p2, %p173_p0  ;;  %p4548_p6 = por %p180_p4, %p179_p3 }
   0xb   : > { %p3381_p7 = scmp.ge.s32.totalorder %s4461_s24, 1  ;;  %p187_p8 = scmp.lt.s32.totalorder %s4461_s24, 3 }
   0xc   : > { %s5971_s8 = scalar_select %p4548_p6, 1, 0 }
   0xd   : > { %p3835_p9 = scmp.eq.s32.totalorder %s4527_s25, 0  ;;  %p4555_p10 = pnand %p3381_p7, %p187_p8 }
   0xe   : > { %s4463_s10 = smov [#allocation2]  }
   0xf   : > { %s205_s11 = sshll.u32 %s4463_s10, 4  ;;  %p3827_p11 = pneg %p4555_p10  ;;  %s206_s11 = int_to_ptr.vmem [resolvable:$true] %s205_s11 }
  0x10   : > { %s4382_s12 = scalar_lea.vmem %s206_s11, 18432  ;;  %p4390_p3 = scmp.lt.s32.totalorder %s206_s11, %s206_s11 }
  0x11   : > { %p3828_p12 = pnand %p3835_p9, %p3827_p11  ;;  %p4383_p0 = scmp.ne.s32.totalorder %s206_s11, %s4382_s12 }
  0x12   : > { %p4391_p4 = scmp.lt.s32.totalorder %s4382_s12, %s4382_s12 }
  0x13   : > { %p4373_p13 = pneg %p3828_p12 }
  0x14   : > { %p4392_p6 = por %p4391_p4, %p4390_p3 }
  0x15   : > { %p4385_p1 = pnand %p4383_p0, %p4373_p13 }
  0x17   : > { %p4386_p2 = pneg %p4385_p1 }
  0x19   : > { %p4393_p7 = pnand %p4392_p6, %p4386_p2 }
  0x1b   : > { %4396 = shalt.err (!%p4393_p7)
}
  0x1c   : > { %s4464_s13 = smov 128   ;;  %s4465_s14 = smov 8  }
  0x1d   : > { %3830 = dma.hbm_to_vmem [thread:$0]  (!%p3828_p12), %s5906_s4, 18432, %s206_s11, [#allocation3], %s4464_s13, %s4464_s13, %s4465_s14  }
  0x1e   : > { %244 = sbr.rel (%p4555_p10) target bundleno = 1118 (0x45e), region = 44 }
  0x23   : > { %4440 = dma.done.wait (%p3835_p9), [#allocation3], 18432  }
  0x24   : > { %4442 = vsyncadd (%p3835_p9), [#allocation3], 4294948864  ;;  %s3387_s17 = sshll.u32 %s4527_s25, 3  ;;  %v5909_v0 = vmov 0   ;;  %v3879_v1 = vld [vmem:[%s5904_s2 + $0x34] ss:$8 sps:$4 sm:$0xff]  }
  0x25   : > { %470 = vmatprep.mubr.bf16.mxu0 %v5909_v0  ;;  %p282_p6 = scmp.lt.s32.totalorder %s3387_s17, 15  ;;  %3877 = vset.pattern.permute.xlu0 %v5909_v0  ;;  %v3881_v2 = vld [vmem:[%s5904_s2 + $0x30] ss:$8 sps:$4 sm:$0xff]   ;;  %v3882_v3 = vld [vmem:[%s5904_s2 + $0x24] ss:$8 sps:$4 sm:$0xff]   ;;  %vm413_vm0 = vcmask 523264  }
  0x26   : > { %3878 = vset.pattern.permute.xlu1 %v5909_v0  ;;  %446 = vmatprep.subr.bf16.mxu0 %v3879_v1  ;;  %v3884_v4 = vld [vmem:[%s5904_s2 + $0x20] ss:$8 sps:$4 sm:$0xff]   ;;  %v3885_v5 = vld [vmem:[%s5904_s2 + $0x14] ss:$8 sps:$4 sm:$0xff]   ;;  %v3887_v6 = vld [vmem:[%s5904_s2 + $0x10] ss:$8 sps:$4 sm:$0xff]  }
  0x27   : > { %s6102_s17 = smov (!%p282_p6, %s3387_s17), 15  ;;  %447 = vmatpush1.bf16.msra.mxu0 %v3881_v2  ;;  %v3888_v7 = vld [vmem:[%s5904_s2 + $0x4] ss:$8 sps:$4 sm:$0xff]   ;;  %v3890_v8 = vld [vmem:[%s5904_s2] ss:$8 sps:$4 sm:$0xff]   ;;  %vm791_vm1 = vcmask 1040384  }
  0x28   : > { %s3802_s28 = sshll.u32 %s6102_s17, 3  ;;  %448 = vmatprep.subr.bf16.mxu0 %v3882_v3  ;;  %s3801_s18 = sshll.u32 %s6102_s17, 4  ;;  %v3899_v16 = vld [vmem:[#allocation2 + $0x74] ss:$8 sps:$4 sm:$0xff]   ;;  %v3901_v17 = vld [vmem:[#allocation2 + $0x70] ss:$8 sps:$4 sm:$0xff]   ;;  %vm4728_vm3 = vmneg %vm791_vm1 }
  0x29   : > { %s4594_s16 = scalar_lea.vmem %s5903_s1, %s3802_s28  ;;  %s4605_s11 = scalar_lea.vmem %s5902_s0, %s3801_s18  ;;  %v3902_v19 = vld [vmem:[#allocation2 + $0x170] ss:$8 sps:$4 sm:$0xff]   ;;  %1213 = vmatprep.subr.bf16.mxu1 %v3899_v16  ;;  %v3904_v21 = vld [vmem:[#allocation2 + $0x174] ss:$8 sps:$4 sm:$0xff]   ;;  %v3905_v23 = vld [vmem:[#allocation2 + $0x64] ss:$8 sps:$4 sm:$0xff]  }
  0x2a   : > { %v663_v9 = vld [vmem:[%s4605_s11] sm:$0xff]  ;;  %v665_v11 = vld [vmem:[%s4605_s11 + $0x10] sm:$0xff]  ;;  %v664_v12 = vld [vmem:[%s4605_s11 + $0x8] sm:$0xff]  ;;  %1214 = vmatpush1.bf16.msra.mxu1 %v3901_v17  ;;  %vm840_vm2 = vcmask 1046528   ;;  %vm4467_vm4 = vmmov 1   ;;  %s278_s26 = sand.u32 1, %s4453_s22  }
  0x2b   : > { %449 = vmatpush1.bf16.msra.mxu0 %v3884_v4  ;;  %v3891_v10 = vld [vmem:[%s4594_s16] sm:$0xff]   ;;  %681 = vperm.xlu0 %3877, %v663_v9   ;;  %v666_v13 = vld [vmem:[%s4605_s11 + $0x18] sm:$0xff]  ;;  %v668_v15 = vld [vmem:[%s4605_s11 + $0x28] sm:$0xff]  ;;  %s3386_s29 = sshll.u32 %s278_s26, 7  ;;  %s3804_s10 = sshll.u32 %s4527_s25, 11 }
  0x2c   : > { %450 = vmatprep.subr.bf16.mxu0 %v3885_v5  ;;  %691 = vperm.xlu1 %3878, %v665_v11   ;;  %v667_v14 = vld [vmem:[%s4605_s11 + $0x20] sm:$0xff]  ;;  %v3892_v18 = vld [vmem:[%s4594_s16 + $0x8] sm:$0xff]   ;;  %v669_v20 = vld [vmem:[%s4605_s11 + $0x30] sm:$0xff]  ;;  %s5746_s9 = scalar_lea.vmem [#allocation5], %s3386_s29  ;;  %s5855_s12 = scalar_lea.hbm %s5908_s6, %s3804_s10 }
  0x2d   : > { %v670_v22 = vld [vmem:[%s4605_s11 + $0x38] sm:$0xff]  ;;  %v3907_v24 = vld [vmem:[#allocation2 + $0x60] ss:$8 sps:$4 sm:$0xff]   ;;  %1215 = vmatprep.subr.bf16.mxu1 %v3905_v23  ;;  %v3913_v27 = vld [vmem:[#allocation2 + $0x164] ss:$8 sps:$4 sm:$0xff]   ;;  %s5862_s13 = scalar_lea.sflag [#allocation4], %s278_s26 }
  0x2e   : > { %v3908_v25 = vld [vmem:[#allocation2 + $0x54] ss:$8 sps:$4 sm:$0xff]   ;;  %v3911_v26 = vld [vmem:[#allocation2 + $0x160] ss:$8 sps:$4 sm:$0xff]   ;;  %v3910_v30 = vld [vmem:[#allocation2 + $0x50] ss:$8 sps:$4 sm:$0xff]   ;;  %1216 = vmatpush1.bf16.msra.mxu1 %v3907_v24 }
  0x2f   : > { %451 = vmatpush1.bf16.msra.mxu0 %v3887_v6  ;;  %686 = vperm.xlu0 %3877, %v664_v12   ;;  %v671_v28 = vld [vmem:[%s4605_s11 + $0x40] sm:$0xff]  ;;  %v672_v29 = vld [vmem:[%s4605_s11 + $0x48] sm:$0xff]  ;;  %v3893_v32 = vld [vmem:[%s4594_s16 + $0x10] sm:$0xff]   ;;  %s4468_s14 = smov [#allocation5]  }
  0x30   : > { %452 = vmatprep.subr.bf16.mxu0 %v3888_v7  ;;  %696 = vperm.xlu1 %3878, %v666_v13   ;;  %v3914_v31 = vld [vmem:[#allocation2 + $0x44] ss:$8 sps:$4 sm:$0xff]   ;;  %v673_v33 = vld [vmem:[%s4605_s11 + $0x50] sm:$0xff]  ;;  %v674_v34 = vld [vmem:[%s4605_s11 + $0x58] sm:$0xff]  ;;  %s4401_s15 = sshll.u32 %s4468_s14, 4  ;;  %s4402_s15 = int_to_ptr.vmem [resolvable:$false] %s4401_s15 }
  0x31   : > { %1217 = vmatprep.subr.bf16.mxu1 %v3908_v25  ;;  %v3916_v35 = vld [vmem:[#allocation2 + $0x40] ss:$8 sps:$4 sm:$0xff]   ;;  %v3894_v38 = vld [vmem:[%s4594_s16 + $0x18] sm:$0xff]   ;;  %v677_v39 = vld [vmem:[%s4605_s11 + $0x70] sm:$0xff] }
  0x32   : > { %1218 = vmatpush1.bf16.msra.mxu1 %v3910_v30  ;;  %v675_v36 = vld [vmem:[%s4605_s11 + $0x60] sm:$0xff]  ;;  %v676_v37 = vld [vmem:[%s4605_s11 + $0x68] sm:$0xff]  ;;  %v678_v40 = vld [vmem:[%s4605_s11 + $0x78] sm:$0xff]  ;;  %s3294_s11 = sshll.u32 %s5746_s9, 4  ;;  %s5857_s11 = int_to_ptr.vmem [resolvable:$true] %s3294_s11 }
  0x33   : > { %453 = vmatpush1.bf16.msra.mxu0 %v3890_v8  ;;  %701 = vperm.xlu0 %3877, %v667_v14   ;;  %v3895_v41 = vld [vmem:[%s4594_s16 + $0x20] sm:$0xff]   ;;  %v3896_v42 = vld [vmem:[%s4594_s16 + $0x28] sm:$0xff]   ;;  %v3897_v43 = vld [vmem:[%s4594_s16 + $0x30] sm:$0xff]   ;;  %s4397_s25 = scalar_lea.vmem %s5857_s11, 2048  ;;  %p4404_p11 = scmp.lt.s32.totalorder %s5857_s11, %s4402_s15 }
  0x34   : > { %706 = vperm.xlu1 %3878, %v668_v15   ;;  %1326 = vmatprep.subr.bf16.mxu0 %v3904_v21  ;;  %v3898_v44 = vld [vmem:[%s4594_s16 + $0x38] sm:$0xff]   ;;  %v3923_v47 = vld [vmem:[#allocation2 + $0x24] ss:$8 sps:$4 sm:$0xff]   ;;  %v3925_v48 = vld [vmem:[#allocation2 + $0x20] ss:$8 sps:$4 sm:$0xff]   ;;  %p4398_p8 = scmp.ne.s32.totalorder %s5857_s11, %s4397_s25  ;;  %s4403_s16 = scalar_lea.vmem %s4402_s15, 4096 }
  0x35   : > { %1219 = vmatprep.subr.bf16.mxu1 %v3914_v31  ;;  %v3917_v45 = vld [vmem:[#allocation2 + $0x34] ss:$8 sps:$4 sm:$0xff]   ;;  %v3919_v46 = vld [vmem:[#allocation2 + $0x30] ss:$8 sps:$4 sm:$0xff]   ;;  %v3932_v51 = vld [vmem:[#allocation2 + $0x4] ss:$8 sps:$4 sm:$0xff]   ;;  %p4405_p12 = scmp.lt.s32.totalorder %s4403_s16, %s4397_s25 }
  0x36   : > { %3409 = vmatmul.mubr.msk.bf16.vlgmr.msra.gmra.mxu0 %vm413_vm0, %v3891_v10  ;;  %1220 = vmatpush1.bf16.msra.mxu1 %v3916_v35  ;;  %v3926_v49 = vld [vmem:[#allocation2 + $0x14] ss:$8 sps:$4 sm:$0xff]   ;;  %v3928_v50 = vld [vmem:[#allocation2 + $0x10] ss:$8 sps:$4 sm:$0xff]   ;;  %v3934_v52 = vld [vmem:[#allocation2] ss:$8 sps:$4 sm:$0xff]   ;;  %p4399_p9 = pnand %p4398_p8, %p4544_p5 }
  0x37   : > { %480 = vmatprep.mubr.bf16.mxu0 %v5909_v0  ;;  %1327 = vmatpush1.bf16.msra.mxu0 %v3902_v19  ;;  %v3935_v53 = vld [vmem:[#allocation2 + $0xf4] ss:$8 sps:$4 sm:$0xff]   ;;  %v3937_v54 = vld [vmem:[#allocation2 + $0xf0] ss:$8 sps:$4 sm:$0xff]   ;;  %v3941_v55 = vld [vmem:[#allocation2 + $0xe4] ss:$8 sps:$4 sm:$0xff]   ;;  %p4406_p13 = por %p4405_p12, %p4404_p11 }
  0x38   : > { %711 = vperm.xlu0 %3877, %v669_v20   ;;  %716 = vperm.xlu1 %3878, %v670_v22   ;;  %v3943_v56 = vld [vmem:[#allocation2 + $0xe0] ss:$8 sps:$4 sm:$0xff]   ;;  %v3920_v57 = vld [vmem:[#allocation2 + $0x150] ss:$8 sps:$4 sm:$0xff]   ;;  %v3922_v58 = vld [vmem:[#allocation2 + $0x154] ss:$8 sps:$4 sm:$0xff]   ;;  %v323_v20 = vlaneseq  ;;  %p4400_p10 = pneg %p4399_p9 }
  0x39   : > { %1328 = vmatprep.subr.bf16.mxu0 %v3913_v27  ;;  %1221 = vmatprep.subr.bf16.mxu1 %v3917_v45  ;;  %v3944_v59 = vld [vmem:[#allocation2 + $0xd4] ss:$8 sps:$4 sm:$0xff]   ;;  %v3946_v60 = vld [vmem:[#allocation2 + $0xd0] ss:$8 sps:$4 sm:$0xff]   ;;  %v3931_v61 = vld [vmem:[#allocation2 + $0x144] ss:$8 sps:$4 sm:$0xff]  }
  0x3a   : > { %1222 = vmatpush1.bf16.msra.mxu1 %v3919_v46  ;;  %v3929_v62 = vld [vmem:[#allocation2 + $0x140] ss:$8 sps:$4 sm:$0xff]   ;;  %v3950_v63 = vld [vmem:[#allocation2 + $0xc4] ss:$8 sps:$4 sm:$0xff]   ;;  %v3940_v2 = vld [vmem:[#allocation2 + $0x134] ss:$8 sps:$4 sm:$0xff]   ;;  %p4407_p0 = pnand %p4406_p13, %p4400_p10 }
  0x3b   : > { %1329 = vmatpush1.bf16.msra.mxu0 %v3911_v26  ;;  %1223 = vmatprep.subr.bf16.mxu1 %v3923_v47  ;;  %v3952_v1 = vld [vmem:[#allocation2 + $0xc0] ss:$8 sps:$4 sm:$0xff]   ;;  %v3953_v3 = vld [vmem:[#allocation2 + $0xb4] ss:$8 sps:$4 sm:$0xff]   ;;  %v3938_v4 = vld [vmem:[#allocation2 + $0x130] ss:$8 sps:$4 sm:$0xff]  }
  0x3c   : > { %721 = vperm.xlu0 %3877, %v671_v28   ;;  %726 = vperm.xlu1 %3878, %v672_v29   ;;  %v3955_v5 = vld [vmem:[#allocation2 + $0xb0] ss:$8 sps:$4 sm:$0xff]   ;;  %v3949_v6 = vld [vmem:[#allocation2 + $0x124] ss:$8 sps:$4 sm:$0xff]   ;;  %v3947_v8 = vld [vmem:[#allocation2 + $0x120] ss:$8 sps:$4 sm:$0xff]  }
  0x3d   : > { %1330 = vmatprep.subr.bf16.mxu0 %v3922_v58  ;;  %v3959_v7 = vld [vmem:[#allocation2 + $0xa4] ss:$8 sps:$4 sm:$0xff]   ;;  %v3961_v9 = vld [vmem:[#allocation2 + $0xa0] ss:$8 sps:$4 sm:$0xff]   ;;  %v3958_v10 = vld [vmem:[#allocation2 + $0x114] ss:$8 sps:$4 sm:$0xff]  }
  0x3e   : > { %3410 = vmatmul.mubr.msk.bf16.gmra.mxu0 %vm413_vm0, %v3892_v18  ;;  %1224 = vmatpush1.bf16.msra.mxu1 %v3925_v48  ;;  %v3962_v11 = vld [vmem:[#allocation2 + $0x94] ss:$8 sps:$4 sm:$0xff]   ;;  %v3956_v12 = vld [vmem:[#allocation2 + $0x110] ss:$8 sps:$4 sm:$0xff]   ;;  %v3967_v14 = vld [vmem:[#allocation2 + $0x104] ss:$8 sps:$4 sm:$0xff]  }
  0x3f   : > { %490 = vmatprep.mubr.bf16.mxu0 %v5909_v0  ;;  %1225 = vmatprep.subr.bf16.mxu1 %v3926_v49  ;;  %v3964_v13 = vld [vmem:[#allocation2 + $0x90] ss:$8 sps:$4 sm:$0xff]   ;;  %v3968_v15 = vld [vmem:[#allocation2 + $0x84] ss:$8 sps:$4 sm:$0xff]   ;;  %v3965_v16 = vld [vmem:[#allocation2 + $0x100] ss:$8 sps:$4 sm:$0xff]  }
  0x40   : > { %731 = vperm.xlu0 %3877, %v673_v33   ;;  %736 = vperm.xlu1 %3878, %v674_v34   ;;  %v3970_v17 = vld [vmem:[#allocation2 + $0x80] ss:$8 sps:$4 sm:$0xff]   ;;  %v3973_v18 = vld [vmem:[#allocation2 + $0x1f4] ss:$8 sps:$4 sm:$0xff]   ;;  %v324_v21 = vshrl.u32 %v323_v20, 7  ;;  %vm4737_vm5 = vmpackc.low %vm840_vm2, %vm4467_vm4 }
  0x41   : > { %1331 = vmatpush1.bf16.msra.mxu0 %v3920_v57  ;;  %v3976_v19 = vld [vmem:[#allocation2 + $0x2f4] ss:$8 sps:$4 sm:$0xff]   ;;  %v321_v23 = vld [vmem:[%s5905_s3] sm:$0x3]  ;;  %vm4752_vm6 = vmpackc.low %vm4467_vm4, %vm4728_vm3 }
  0x42   : > { %1226 = vmatpush1.bf16.msra.mxu1 %v3928_v50  ;;  %1332 = vmatprep.subr.bf16.mxu0 %v3931_v61  ;;  %v4650_v22 = vsub.s32 1, %v324_v21 }
  0x43   : > { %1227 = vmatprep.subr.bf16.mxu1 %v3932_v51 }
  0x44   : > { %741 = vperm.xlu0 %3877, %v675_v36   ;;  %746 = vperm.xlu1 %3878, %v676_v37   ;;  %5973 = vst [vmem:[#allocation8_spill] sm:$0xff] %v4650_v22  ;;  %v4656_v24 = vrot.slane %v321_v23, %v4650_v22 }
  0x45   : > { %1333 = vmatpush1.bf16.msra.mxu0 %v3929_v62 }
  0x46   : > { %3411 = vmatmul.mubr.msk.bf16.gmra.mxu0 %vm413_vm0, %v3893_v32  ;;  %1228 = vmatpush1.bf16.msra.mxu1 %v3934_v52 }
  0x47   : > { %500 = vmatprep.mubr.bf16.mxu0 %v5909_v0  ;;  %1229 = vmatprep.subr.bf16.mxu1 %v3935_v53 }
  0x48   : > { %751 = vperm.xlu0 %3877, %v677_v39   ;;  %756 = vperm.xlu1 %3878, %v678_v40  }
  0x49   : > { %1334 = vmatprep.subr.bf16.mxu0 %v3940_v2 }
  0x4a   : > { %1230 = vmatpush2.bf16.msra.mxu1 %v3937_v54  ;;  %1335 = vmatpush1.bf16.msra.mxu0 %v3938_v4 }
  0x4b   : > { %1231 = vmatprep.subr.bf16.mxu1 %v3941_v55  ;;  %1336 = vmatprep.subr.bf16.mxu0 %v3949_v6  ;;  %v4676_v55 = vsub.s32 0, %v324_v21 }
  0x4d   : > { %5974 = vst [vmem:[#allocation9_spill] sm:$0xff] %v4676_v55  ;;  %v4682_v62 = vrot.slane %v321_v23, %v4676_v55 }
  0x4e   : > { %3412 = vmatmul.mubr.msk.bf16.gmra.mxu0 %vm413_vm0, %v3894_v38  ;;  %1232 = vmatpush2.bf16.msra.mxu1 %v3943_v56 }
  0x4f   : > { %510 = vmatprep.mubr.bf16.mxu0 %v5909_v0  ;;  %1233 = vmatprep.subr.bf16.mxu1 %v3944_v59 }
  0x50   : > { %1337 = vmatpush1.bf16.msra.mxu0 %v3947_v8 }
  0x51   : > { %1338 = vmatprep.subr.bf16.mxu0 %v3958_v10 }
  0x52   : > { %1234 = vmatpush2.bf16.msra.mxu1 %v3946_v60 }
  0x53   : > { %1235 = vmatprep.subr.bf16.mxu1 %v3950_v63 }
  0x54   : > { %1339 = vmatpush1.bf16.msra.mxu0 %v3956_v12 }
  0x55   : > { %1340 = vmatprep.subr.bf16.mxu0 %v3967_v14 }
  0x56   : > { %3413 = vmatmul.mubr.msk.bf16.gmra.mxu0 %vm413_vm0, %v3895_v41  ;;  %1236 = vmatpush2.bf16.msra.mxu1 %v3952_v1 }
  0x57   : > { %520 = vmatprep.mubr.bf16.mxu0 %v5909_v0  ;;  %1237 = vmatprep.subr.bf16.mxu1 %v3953_v3 }
  0x58   : > { %1341 = vmatpush1.bf16.msra.mxu0 %v3965_v16 }
  0x59   : > { %2150 = vmatprep.subr.bf16.mxu0 %v3976_v19 }
  0x5a   : > { %1238 = vmatpush2.bf16.msra.mxu1 %v3955_v5 }
  0x5b   : > { %1239 = vmatprep.subr.bf16.mxu1 %v3959_v7 }
  0x5e   : > { %3414 = vmatmul.mubr.msk.bf16.gmra.mxu0 %vm413_vm0, %v3896_v42  ;;  %1240 = vmatpush2.bf16.msra.mxu1 %v3961_v9 }
  0x5f   : > { %530 = vmatprep.mubr.bf16.mxu0 %v5909_v0  ;;  %1241 = vmatprep.subr.bf16.mxu1 %v3962_v11 }
  0x62   : > { %1242 = vmatpush2.bf16.msra.mxu1 %v3964_v13 }
  0x63   : > { %1243 = vmatprep.subr.bf16.mxu1 %v3968_v15 }
  0x66   : > { %3415 = vmatmul.mubr.msk.bf16.gmra.mxu0 %vm413_vm0, %v3897_v43  ;;  %1244 = vmatpush2.bf16.msra.mxu1 %v3970_v17 }
  0x67   : > { %540 = vmatprep.mubr.bf16.mxu0 %v5909_v0  ;;  %2037 = vmatprep.subr.bf16.mxu1 %v3973_v18 }
  0x6e   : > { %3416 = vmatmul.mubr.msk.bf16.gmra.mxu0 %vm413_vm0, %v3898_v44 }
  0x6f   : > { %1358 = vmatprep.mubr.bf16.mxu0 %v5909_v0 }
  0xa6   : > { %v4689_v9 = vpop.permute.xlu0 %681 }
  0xa7   : > { %5975 = vst [vmem:[#allocation10_spill] sm:$0xff] %v4689_v9 }
  0xf6   : > { %v472_v25 = vpop.f32.mrf.mxu0 }
  0xf7   : > { %v473_v6 = vadd.f32 %v472_v25, %v4682_v62 }
  0xf8   : > { %v474_v26 = vpop.f32.mrf.mxu0 }
  0xf9   : > { %v475_v27 = vadd.f32 %v474_v26, %v4656_v24  ;;  %v4706_v26 = vpop.permute.xlu0 %686 }
  0xfa   : > { %v4659_v28 = vpop.f32.mrf.mxu0  ;;  %5978 = vst [vmem:[#allocation13_spill] sm:$0xff] %v4706_v26 }
  0xfb   : > { %v3417_v29 = vmul.f32 -1.442695, %v475_v27  ;;  %v477_v16 = vadd.f32 %v4659_v28, %v4682_v62 }
  0xfc   : > { %v478_v30 = vpop.f32.mrf.mxu0 }
  0xfd   : > { %4115 = vpow2.f32 %v3417_v29  ;;  %v479_v31 = vadd.f32 %v478_v30, %v4656_v24 }
  0xfe   : > { %v4662_v32 = vpop.f32.mrf.mxu0 }
  0xff   : > { %v3418_v33 = vmul.f32 -1.442695, %v479_v31  ;;  %v483_v28 = vadd.f32 %v4662_v32, %v4682_v62 }
 0x100   : > { %v484_v34 = vpop.f32.mrf.mxu0 }
 0x101   : > { %4117 = vpow2.f32 %v3418_v33  ;;  %v485_v35 = vadd.f32 %v484_v34, %v4656_v24 }
 0x102   : > { %v4665_v36 = vpop.f32.mrf.mxu0 }
 0x103   : > { %v3419_v37 = vmul.f32 -1.442695, %v485_v35  ;;  %v4716_v35 = vpop.permute.xlu1 %691 }
 0x104   : > { %v488_v38 = vpop.f32.mrf.mxu0 }
 0x105   : > { %4119 = vpow2.f32 %v3419_v37  ;;  %v489_v39 = vadd.f32 %v488_v38, %v4656_v24 }
 0x106   : > { %v4668_v40 = vpop.f32.mrf.mxu0 }
 0x107   : > { %v3420_v41 = vmul.f32 -1.442695, %v489_v39 }
 0x108   : > { %v494_v42 = vpop.f32.mrf.mxu0 }
 0x109   : > { %4121 = vpow2.f32 %v3420_v41  ;;  %v495_v43 = vadd.f32 %v494_v42, %v4656_v24 }
 0x10a   : > { %v4116_v44 = vpop.eup %4115  ;;  %v4671_v45 = vpop.f32.mrf.mxu0 }
 0x10b   : > { %v599_v46 = vadd.f32 1.0, %v4116_v44  ;;  %v3421_v47 = vmul.f32 -1.442695, %v495_v43 }
 0x10c   : > { %v498_v48 = vpop.f32.mrf.mxu0 }
 0x10d   : > { %4123 = vrcp.f32 %v599_v46  ;;  %v499_v49 = vadd.f32 %v498_v48, %v4656_v24 }
 0x10e   : > { %v4118_v50 = vpop.eup %4117  ;;  %4125 = vpow2.f32 %v3421_v47  ;;  %v4674_v51 = vpop.f32.mrf.mxu0 }
 0x10f   : > { %v600_v52 = vadd.f32 1.0, %v4118_v50  ;;  %v3422_v53 = vmul.f32 -1.442695, %v499_v49  ;;  %v487_v49 = vadd.f32 %v4665_v36, %v4682_v62 }
 0x110   : > { %v504_v54 = vpop.f32.mrf.mxu0 }
 0x111   : > { %4127 = vrcp.f32 %v600_v52  ;;  %v505_v56 = vadd.f32 %v504_v54, %v4656_v24  ;;  %v3974_v54 = vld [vmem:[#allocation2 + $0x2f0] ss:$8 sps:$4 sm:$0xff]  }
 0x112   : > { %v4120_v57 = vpop.eup %4119  ;;  %4129 = vpow2.f32 %v3422_v53  ;;  %v4679_v58 = vpop.f32.mrf.mxu0 }
 0x113   : > { %v601_v59 = vadd.f32 1.0, %v4120_v57  ;;  %v3423_v60 = vmul.f32 -1.442695, %v505_v56 }
 0x114   : > { %v508_v61 = vpop.f32.mrf.mxu0 }
 0x115   : > { %4131 = vrcp.f32 %v601_v59  ;;  %v509_v63 = vadd.f32 %v508_v61, %v4656_v24 }
 0x116   : > { %v4122_v1 = vpop.eup %4121  ;;  %4133 = vpow2.f32 %v3423_v60  ;;  %v4685_v2 = vpop.f32.mrf.mxu0 }
 0x117   : > { %v602_v3 = vadd.f32 1.0, %v4122_v1  ;;  %v3424_v4 = vmul.f32 -1.442695, %v509_v63 }
 0x118   : > { %v514_v5 = vpop.f32.mrf.mxu0 }
 0x119   : > { %4135 = vrcp.f32 %v602_v3  ;;  %v515_v7 = vadd.f32 %v514_v5, %v4656_v24  ;;  %v4756_v5 = vpop.permute.xlu1 %696 }
 0x11a   : > { %v4124_v8 = vpop.eup %4123  ;;  %4137 = vpow2.f32 %v3424_v4  ;;  %v4691_v10 = vpop.f32.mrf.mxu0  ;;  %v3971_v4 = vld [vmem:[#allocation2 + $0x1f0] ss:$8 sps:$4 sm:$0xff]   ;;  %5987 = vst [vmem:[#allocation16_spill] sm:$0xff] %v4756_v5 }
 0x11b   : > { %v4126_v11 = vpop.eup %4125  ;;  %v4693_v12 = vmul.f32 %v4124_v8, %v473_v6  ;;  %v3425_v13 = vmul.f32 -1.442695, %v515_v7 }
 0x11c   : > { %v603_v14 = vadd.f32 1.0, %v4126_v11  ;;  %v518_v15 = vpop.f32.mrf.mxu0  ;;  %v3979_v11 = vld [vmem:[#allocation2 + $0x1e4] ss:$8 sps:$4 sm:$0xff]  }
 0x11d   : > { %5976 = vst [vmem:[#allocation11_spill] sm:$0xff] %v4693_v12  ;;  %4139 = vpow2.f32 %v3425_v13  ;;  %v519_v17 = vadd.f32 %v518_v15, %v4656_v24  ;;  %v4700_v19 = vmul.f32 %v4689_v9, %v4693_v12 }
 0x11e   : > { %v4128_v18 = vpop.eup %4127  ;;  %4141 = vrcp.f32 %v603_v14  ;;  %v4702_v20 = vpop.f32.mrf.mxu0 }
 0x11f   : > { %v4130_v21 = vpop.eup %4129  ;;  %v4704_v23 = vmul.f32 %v4128_v18, %v477_v16  ;;  %v3426_v25 = vmul.f32 -1.442695, %v519_v17  ;;  %v841_v34 = vrot.slane %v4700_v19, 1  ;;  %v792_v47 = vrot.slane %v4700_v19, 7  ;;  %v3977_v18 = vld [vmem:[#allocation2 + $0x1e0] ss:$8 sps:$4 sm:$0xff]  }
 0x120   : > { %v604_v27 = vadd.f32 1.0, %v4130_v21  ;;  %v524_v29 = vpop.f32.mrf.mxu0  ;;  %v493_v16 = vadd.f32 %v4668_v40, %v4682_v62 }
 0x121   : > { %5977 = vst [vmem:[#allocation12_spill] sm:$0xff] %v4704_v23  ;;  %v4712_v30 = vmul.f32 %v4706_v26, %v4704_v23  ;;  %4143 = vpow2.f32 %v3426_v25  ;;  %v525_v31 = vadd.f32 %v524_v29, %v4656_v24 }
 0x122   : > { %v4132_v33 = vpop.eup %4131  ;;  %4145 = vrcp.f32 %v604_v27  ;;  %v4718_v37 = vpop.f32.mrf.mxu0 }
 0x123   : > { %v4134_v38 = vpop.eup %4133  ;;  %v793_v39 = vrot.slane %v4712_v30, 7  ;;  %v842_v32 = vrot.slane %v4712_v30, 1  ;;  %v4722_v41 = vmul.f32 %v4132_v33, %v483_v28  ;;  %v3427_v42 = vmul.f32 -1.442695, %v525_v31 }
 0x124   : > { %v605_v43 = vadd.f32 1.0, %v4134_v38  ;;  %v528_v44 = vpop.f32.mrf.mxu0  ;;  %v890_v46 = vpack.c.bf16 %v4712_v30, %v4700_v19 }
 0x125   : > { %5979 = vst [vmem:[#allocation14_spill] sm:$0xff] %v4722_v41  ;;  %v843_v50 = vsel %vm840_vm2, %v841_v34, %v842_v32  ;;  %4147 = vpow2.f32 %v3427_v42  ;;  %v529_v52 = vadd.f32 %v528_v44, %v4656_v24  ;;  %v794_v36 = vsel %vm791_vm1, %v792_v47, %v793_v39  ;;  %v3982_v39 = vld [vmem:[#allocation2 + $0x1d4] ss:$8 sps:$4 sm:$0xff]   ;;  %v4782_v44 = vpop.permute.xlu0 %701 }
 0x126   : > { %v4136_v56 = vpop.eup %4135  ;;  %v3514_v57 = vpack.c.bf16 %v842_v32, %v843_v50  ;;  %4149 = vrcp.f32 %v605_v43  ;;  %1245 = vmatprep.mubr.bf16.mxu1 %v890_v46  ;;  %v4741_v59 = vpop.f32.mrf.mxu0  ;;  %v4746_v61 = vmul.f32 %v4716_v35, %v4722_v41  ;;  %v3483_v8 = vpack.c.bf16 %v794_v36, %v792_v47  ;;  %v3980_v36 = vld [vmem:[#allocation2 + $0x1d0] ss:$8 sps:$4 sm:$0xff]  }
 0x127   : > { %v4138_v60 = vpop.eup %4137  ;;  %v4748_v63 = vmul.f32 %v4136_v56, %v487_v49  ;;  %v3428_v1 = vmul.f32 -1.442695, %v529_v52  ;;  %v497_v46 = vadd.f32 %v4671_v45, %v4682_v62 }
 0x128   : > { %v606_v6 = vadd.f32 1.0, %v4138_v60  ;;  %v534_v7 = vpop.f32.mrf.mxu0  ;;  %3515 = vmatmul.mubr.msk.bf16.vlgmr.msra.gmra.mxu0 %vm4737_vm5, %v3514_v57  ;;  %3484 = vmatmul.mubr.msk.bf16.vlgmr.msra.gmra.mxu1 %vm4752_vm6, %v3483_v8  ;;  %v795_v28 = vrot.slane %v4746_v61, 7  ;;  %v844_v31 = vrot.slane %v4746_v61, 1 }
 0x129   : > { %5984 = vst [vmem:[#allocation15_spill] sm:$0xff] %v4748_v63  ;;  %v4762_v13 = vmul.f32 %v4756_v5, %v4748_v63  ;;  %4151 = vpow2.f32 %v3428_v1  ;;  %v535_v14 = vadd.f32 %v534_v7, %v4656_v24  ;;  %1368 = vmatprep.mubr.bf16.mxu0 %v5909_v0  ;;  %2151 = vmatpush1.bf16.msra.mxu0 %v3974_v54  ;;  %v4795_v1 = vpop.permute.xlu1 %706 }
 0x12a   : > { %v4140_v15 = vpop.eup %4139  ;;  %4153 = vrcp.f32 %v606_v6  ;;  %v4770_v17 = vpop.f32.mrf.mxu0  ;;  %2038 = vmatpush1.bf16.msra.mxu1 %v3971_v4  ;;  %v503_v7 = vadd.f32 %v4674_v51, %v4682_v62 }
 0x12b   : > { %v4142_v21 = vpop.eup %4141  ;;  %v796_v25 = vrot.slane %v4762_v13, 7  ;;  %v607_v27 = vadd.f32 1.0, %v4140_v15  ;;  %v3429_v29 = vmul.f32 -1.442695, %v535_v14  ;;  %v893_v40 = vpack.c.bf16 %v4762_v13, %v4746_v61  ;;  %2039 = vmatprep.subr.bf16.mxu1 %v3979_v11 }
 0x12c   : > { %v538_v33 = vpop.f32.mrf.mxu0  ;;  %v845_v34 = vrot.slane %v4762_v13, 1  ;;  %v4778_v38 = vmul.f32 %v4142_v21, %v493_v16 }
 0x12d   : > { %4155 = vrcp.f32 %v607_v27  ;;  %v539_v32 = vadd.f32 %v538_v33, %v4656_v24  ;;  %v797_v42 = vsel %vm791_vm1, %v795_v28, %v796_v25  ;;  %1255 = vmatprep.mubr.bf16.mxu1 %v893_v40  ;;  %v507_v33 = vadd.f32 %v4679_v58, %v4682_v62 }
 0x12e   : > { %5988 = vst [vmem:[#allocation17_spill] sm:$0xff] %v4778_v38  ;;  %v4144_v43 = vpop.eup %4143  ;;  %4157 = vpow2.f32 %v3429_v29  ;;  %v4786_v47 = vpop.f32.mrf.mxu0  ;;  %v3487_v48 = vpack.c.bf16 %v797_v42, %v795_v28  ;;  %v846_v49 = vsel %vm840_vm2, %v844_v31, %v845_v34  ;;  %v4791_v57 = vmul.f32 %v4782_v44, %v4778_v38  ;;  %2040 = vmatpush1.bf16.msra.mxu1 %v3977_v18 }
 0x12f   : > { %v4146_v50 = vpop.eup %4145  ;;  %v608_v52 = vadd.f32 1.0, %v4144_v43  ;;  %v3430_v54 = vmul.f32 -1.442695, %v539_v32  ;;  %v3517_v56 = vpack.c.bf16 %v845_v34, %v846_v49  ;;  %2041 = vmatprep.subr.bf16.mxu1 %v3982_v39  ;;  %v4819_v31 = vpop.permute.xlu0 %711 }
 0x130   : > { %v4793_v60 = vmul.f32 %v4146_v50, %v497_v46  ;;  %v544_v45 = vpop.f32.mrf.mxu0  ;;  %3488 = vmatmul.mubr.msk.bf16.gmra.mxu1 %vm4752_vm6, %v3487_v48  ;;  %v798_v18 = vrot.slane %v4791_v57, 7  ;;  %v847_v21 = vrot.slane %v4791_v57, 1 }
 0x131   : > { %4159 = vrcp.f32 %v608_v52  ;;  %v545_v4 = vadd.f32 %v544_v45, %v4656_v24  ;;  %3518 = vmatmul.mubr.msk.bf16.gmra.mxu0 %vm4737_vm5, %v3517_v56  ;;  %v4832_v52 = vpop.permute.xlu1 %716 }
 0x132   : > { %5989 = vst [vmem:[#allocation18_spill] sm:$0xff] %v4793_v60  ;;  %v4148_v6 = vpop.eup %4147  ;;  %v4804_v8 = vmul.f32 %v4795_v1, %v4793_v60  ;;  %4161 = vpow2.f32 %v3430_v54  ;;  %v4808_v11 = vpop.f32.mrf.mxu0  ;;  %1378 = vmatprep.mubr.bf16.mxu0 %v5909_v0  ;;  %2042 = vmatpush1.bf16.msra.mxu1 %v3980_v36 }
 0x133   : > { %v4150_v14 = vpop.eup %4149  ;;  %v609_v15 = vadd.f32 1.0, %v4148_v6  ;;  %v3431_v16 = vmul.f32 -1.442695, %v545_v4 }
 0x134   : > { %v799_v51 = vrot.slane %v4804_v8, 7  ;;  %v548_v25 = vpop.f32.mrf.mxu0  ;;  %v896_v27 = vpack.c.bf16 %v4804_v8, %v4791_v57  ;;  %v848_v29 = vrot.slane %v4804_v8, 1  ;;  %v4817_v28 = vmul.f32 %v4150_v14, %v503_v7 }
 0x135   : > { %4163 = vrcp.f32 %v609_v15  ;;  %v549_v40 = vadd.f32 %v548_v25, %v4656_v24  ;;  %v513_v24 = vadd.f32 %v4685_v2, %v4682_v62 }
 0x136   : > { %5990 = vst [vmem:[#allocation19_spill] sm:$0xff] %v4817_v28  ;;  %v4152_v34 = vpop.eup %4151  ;;  %4165 = vpow2.f32 %v3431_v16  ;;  %1265 = vmatprep.mubr.bf16.mxu1 %v896_v27  ;;  %v800_v39 = vsel %vm791_vm1, %v798_v18, %v799_v51  ;;  %v849_v32 = vsel %vm840_vm2, %v847_v21, %v848_v29  ;;  %v4828_v42 = vmul.f32 %v4819_v31, %v4817_v28  ;;  %v4853_v16 = vpop.permute.xlu0 %721 }
 0x137   : > { %v4154_v43 = vpop.eup %4153  ;;  %v610_v46 = vadd.f32 1.0, %v4152_v34  ;;  %v3432_v48 = vmul.f32 -1.442695, %v549_v40  ;;  %v3491_v49 = vpack.c.bf16 %v800_v39, %v798_v18  ;;  %v3520_v50 = vpack.c.bf16 %v848_v29, %v849_v32  ;;  %5993 = vst [vmem:[#allocation22_spill] sm:$0xff] %v4853_v16  ;;  %v4865_v39 = vpop.permute.xlu1 %726 }
 0x138   : > { %v4830_v58 = vmul.f32 %v4154_v43, %v507_v33  ;;  %v801_v45 = vrot.slane %v4828_v42, 7  ;;  %v850_v2 = vrot.slane %v4828_v42, 1  ;;  %v517_v18 = vadd.f32 %v4691_v10, %v4682_v62  ;;  %5995 = vst [vmem:[#allocation24_spill] sm:$0xff] %v4865_v39 }
 0x139   : > { %4167 = vrcp.f32 %v610_v46  ;;  %3521 = vmatmul.mubr.msk.bf16.gmra.mxu0 %vm4737_vm5, %v3520_v50  ;;  %3492 = vmatmul.mubr.msk.bf16.gmra.mxu1 %vm4752_vm6, %v3491_v49  ;;  %v523_v10 = vadd.f32 %v4702_v20, %v4682_v62 }
 0x13a   : > { %5991 = vst [vmem:[#allocation20_spill] sm:$0xff] %v4830_v58  ;;  %v4156_v54 = vpop.eup %4155  ;;  %4169 = vpow2.f32 %v3432_v48  ;;  %v4842_v56 = vmul.f32 %v4832_v52, %v4830_v58  ;;  %1388 = vmatprep.mubr.bf16.mxu0 %v5909_v0 }
 0x13b   : > { %v4158_v36 = vpop.eup %4157  ;;  %v4847_v4 = vmul.f32 %v4156_v54, %v513_v24 }
 0x13c   : > { %v611_v6 = vadd.f32 1.0, %v4158_v36  ;;  %v899_v7 = vpack.c.bf16 %v4842_v56, %v4828_v42  ;;  %v802_v14 = vrot.slane %v4842_v56, 7  ;;  %v851_v15 = vrot.slane %v4842_v56, 1 }
 0x13d   : > { %5992 = vst [vmem:[#allocation21_spill] sm:$0xff] %v4847_v4  ;;  %v4861_v27 = vmul.f32 %v4853_v16, %v4847_v4 }
 0x13e   : > { %v4160_v21 = vpop.eup %4159  ;;  %4171 = vrcp.f32 %v611_v6  ;;  %1275 = vmatprep.mubr.bf16.mxu1 %v899_v7  ;;  %v803_v51 = vsel %vm791_vm1, %v801_v45, %v802_v14  ;;  %v852_v25 = vsel %vm840_vm2, %v850_v2, %v851_v15  ;;  %v4886_v2 = vpop.permute.xlu0 %731  ;;  %v527_v6 = vadd.f32 %v4718_v37, %v4682_v62 }
 0x13f   : > { %v4162_v29 = vpop.eup %4161  ;;  %v3495_v33 = vpack.c.bf16 %v803_v51, %v801_v45  ;;  %v3523_v40 = vpack.c.bf16 %v851_v15, %v852_v25  ;;  %v4863_v34 = vmul.f32 %v4160_v21, %v517_v18  ;;  %v804_v48 = vrot.slane %v4861_v27, 7  ;;  %5997 = vst [vmem:[#allocation26_spill] sm:$0xff] %v4886_v2 }
 0x140   : > { %v612_v32 = vadd.f32 1.0, %v4162_v29  ;;  %v853_v49 = vrot.slane %v4861_v27, 1 }
 0x141   : > { %5994 = vst [vmem:[#allocation23_spill] sm:$0xff] %v4863_v34  ;;  %3524 = vmatmul.mubr.msk.bf16.gmra.mxu0 %vm4737_vm5, %v3523_v40  ;;  %v4873_v43 = vmul.f32 %v4865_v39, %v4863_v34  ;;  %3496 = vmatmul.mubr.msk.bf16.gmra.mxu1 %vm4752_vm6, %v3495_v33  ;;  %v4898_v33 = vpop.permute.xlu1 %736 }
 0x142   : > { %v4164_v46 = vpop.eup %4163  ;;  %4173 = vrcp.f32 %v612_v32  ;;  %1398 = vmatprep.mubr.bf16.mxu0 %v5909_v0  ;;  %5999 = vst [vmem:[#allocation28_spill] sm:$0xff] %v4898_v33  ;;  %v533_v32 = vadd.f32 %v4741_v59, %v4682_v62 }
 0x143   : > { %v4166_v50 = vpop.eup %4165  ;;  %v902_v20 = vpack.c.bf16 %v4873_v43, %v4861_v27  ;;  %v805_v24 = vrot.slane %v4873_v43, 7  ;;  %v854_v54 = vrot.slane %v4873_v43, 1  ;;  %v4884_v36 = vmul.f32 %v4164_v46, %v523_v10 }
 0x144   : > { %v613_v45 = vadd.f32 1.0, %v4166_v50 }
 0x145   : > { %5996 = vst [vmem:[#allocation25_spill] sm:$0xff] %v4884_v36  ;;  %1285 = vmatprep.mubr.bf16.mxu1 %v902_v20  ;;  %v806_v7 = vsel %vm791_vm1, %v804_v48, %v805_v24  ;;  %v855_v14 = vsel %vm840_vm2, %v853_v49, %v854_v54  ;;  %v4894_v51 = vmul.f32 %v4886_v2, %v4884_v36 }
 0x146   : > { %v4168_v15 = vpop.eup %4167  ;;  %4175 = vrcp.f32 %v613_v45  ;;  %v3499_v18 = vpack.c.bf16 %v806_v7, %v804_v48  ;;  %v3526_v21 = vpack.c.bf16 %v854_v54, %v855_v14  ;;  %v4921_v45 = vpop.permute.xlu0 %741 }
 0x147   : > { %v4170_v25 = vpop.eup %4169  ;;  %v4896_v29 = vmul.f32 %v4168_v15, %v527_v6  ;;  %v807_v10 = vrot.slane %v4894_v51, 7  ;;  %v856_v50 = vrot.slane %v4894_v51, 1  ;;  %6002 = vst [vmem:[#allocation31_spill] sm:$0xff] %v4921_v45  ;;  %v537_v6 = vadd.f32 %v4770_v17, %v4682_v62 }
 0x148   : > { %v614_v40 = vadd.f32 1.0, %v4170_v25  ;;  %v4931_v25 = vpop.permute.xlu1 %746 }
 0x149   : > { %5998 = vst [vmem:[#allocation27_spill] sm:$0xff] %v4896_v29  ;;  %3527 = vmatmul.mubr.msk.bf16.gmra.mxu0 %vm4737_vm5, %v3526_v21  ;;  %v4904_v37 = vmul.f32 %v4898_v33, %v4896_v29  ;;  %3500 = vmatmul.mubr.msk.bf16.gmra.mxu1 %vm4752_vm6, %v3499_v18  ;;  %6005 = vst [vmem:[#allocation34_spill] sm:$0xff] %v4931_v25 }
 0x14a   : > { %4177 = vrcp.f32 %v614_v40  ;;  %1408 = vmatprep.mubr.bf16.mxu0 %v5909_v0  ;;  %v543_v40 = vadd.f32 %v4786_v47, %v4682_v62 }
 0x14b   : > { %6000 = vst [vmem:[#allocation29_spill] sm:$0xff] %v4904_v37  ;;  %v4172_v46 = vpop.eup %4171  ;;  %v905_v48 = vpack.c.bf16 %v4904_v37, %v4894_v51  ;;  %v808_v49 = vrot.slane %v4904_v37, 7  ;;  %v857_v20 = vrot.slane %v4904_v37, 1 }
 0x14c   : > { %v4917_v24 = vmul.f32 %v4172_v46, %v533_v32 }
 0x14d   : > { %1295 = vmatprep.mubr.bf16.mxu1 %v905_v48  ;;  %v809_v59 = vsel %vm791_vm1, %v807_v10, %v808_v49  ;;  %v858_v54 = vsel %vm840_vm2, %v856_v50, %v857_v20 }
 0x14e   : > { %6001 = vst [vmem:[#allocation30_spill] sm:$0xff] %v4917_v24  ;;  %v3503_v7 = vpack.c.bf16 %v809_v59, %v807_v10  ;;  %v3529_v14 = vpack.c.bf16 %v857_v20, %v858_v54  ;;  %v4927_v18 = vmul.f32 %v4921_v45, %v4917_v24  ;;  %v4952_v20 = vpop.permute.xlu0 %751  ;;  %v547_v59 = vadd.f32 %v4808_v11, %v4682_v62 }
 0x14f   : > { %v4174_v15 = vpop.eup %4173  ;;  %6008 = vst [vmem:[#allocation37_spill] sm:$0xff] %v4952_v20  ;;  %v6013_v11 = vmov 0  }
 0x150   : > { %6003 = vst [vmem:[#allocation32_spill] sm:$0xff] %v4927_v18  ;;  %v4929_v21 = vmul.f32 %v4174_v15, %v537_v6  ;;  %v810_v10 = vrot.slane %v4927_v18, 7  ;;  %v859_v46 = vrot.slane %v4927_v18, 1 }
 0x151   : > { %3530 = vmatmul.mubr.msk.bf16.gmra.mxu0 %vm4737_vm5, %v3529_v14  ;;  %3504 = vmatmul.mubr.msk.bf16.gmra.mxu1 %vm4752_vm6, %v3503_v7 }
 0x152   : > { %6004 = vst [vmem:[#allocation33_spill] sm:$0xff] %v4929_v21  ;;  %v4941_v17 = vmul.f32 %v4931_v25, %v4929_v21  ;;  %1418 = vmatprep.mubr.bf16.mxu0 %v5909_v0 }
 0x153   : > { %v4176_v32 = vpop.eup %4175 }
 0x154   : > { %6006 = vst [vmem:[#allocation35_spill] sm:$0xff] %v4941_v17  ;;  %v908_v48 = vpack.c.bf16 %v4941_v17, %v4927_v18  ;;  %v811_v49 = vrot.slane %v4941_v17, 7  ;;  %v860_v47 = vrot.slane %v4941_v17, 1  ;;  %v4950_v50 = vmul.f32 %v4176_v32, %v543_v40  ;;  %v4964_v40 = vpop.permute.xlu1 %756 }
 0x155   : > { %6011 = vst [vmem:[#allocation40_spill] sm:$0xff] %v4964_v40 }
 0x156   : > { %6007 = vst [vmem:[#allocation36_spill] sm:$0xff] %v4950_v50  ;;  %1305 = vmatprep.mubr.bf16.mxu1 %v908_v48  ;;  %v812_v54 = vsel %vm791_vm1, %v810_v10, %v811_v49  ;;  %v861_v6 = vsel %vm840_vm2, %v859_v46, %v860_v47  ;;  %v4960_v0 = vmul.f32 %v4952_v20, %v4950_v50  ;;  %v4025_v50 = vld [vmem:[#allocation2 + $0x230] ss:$8 sps:$4 sm:$0xff]  }
 0x157   : > { %v4178_v7 = vpop.eup %4177  ;;  %v3507_v14 = vpack.c.bf16 %v812_v54, %v810_v10  ;;  %v3532_v15 = vpack.c.bf16 %v860_v47, %v861_v6 }
 0x158   : > { %6009 = vst [vmem:[#allocation38_spill] sm:$0xff] %v4960_v0  ;;  %v4962_v21 = vmul.f32 %v4178_v7, %v547_v59  ;;  %v813_v32 = vrot.slane %v4960_v0, 7  ;;  %v862_v48 = vrot.slane %v4960_v0, 1  ;;  %v3988_v7 = vld [vmem:[#allocation2 + $0x1c4] ss:$8 sps:$4 sm:$0xff]  }
 0x159   : > { %3533 = vmatmul.mubr.msk.bf16.gmra.mxu0 %vm4737_vm5, %v3532_v15  ;;  %3508 = vmatmul.mubr.msk.bf16.gmra.mxu1 %vm4752_vm6, %v3507_v14  ;;  %v3983_v14 = vld [vmem:[#allocation2 + $0x2e0] ss:$8 sps:$4 sm:$0xff]   ;;  %v3985_v15 = vld [vmem:[#allocation2 + $0x2e4] ss:$8 sps:$4 sm:$0xff]  }
 0x15a   : > { %6010 = vst [vmem:[#allocation39_spill] sm:$0xff] %v4962_v21  ;;  %v4972_v62 = vmul.f32 %v4964_v40, %v4962_v21  ;;  %1428 = vmatprep.mubr.bf16.mxu0 %v6013_v11  ;;  %v3986_v21 = vld [vmem:[#allocation2 + $0x1c0] ss:$8 sps:$4 sm:$0xff]   ;;  %2043 = vmatprep.subr.bf16.mxu1 %v3988_v7  ;;  %v4007_v7 = vld [vmem:[#allocation2 + $0x270] ss:$8 sps:$4 sm:$0xff]  }
 0x15b   : > { %2152 = vmatprep.subr.bf16.mxu0 %v3985_v15  ;;  %2044 = vmatpush1.bf16.msra.mxu1 %v3986_v21  ;;  %v4015_v21 = vld [vmem:[#allocation2 + $0x264] ss:$8 sps:$4 sm:$0xff]   ;;  %v3992_v15 = vld [vmem:[#allocation2 + $0x2d0] ss:$8 sps:$4 sm:$0xff]  }
 0x15c   : > { %6012 = vst [vmem:[#allocation41_spill] sm:$0xff] %v4972_v62  ;;  %v911_v10 = vpack.c.bf16 %v4972_v62, %v4960_v0  ;;  %v814_v46 = vrot.slane %v4972_v62, 7  ;;  %v863_v49 = vrot.slane %v4972_v62, 1  ;;  %2153 = vmatpush1.bf16.msra.mxu0 %v3983_v14  ;;  %v4013_v14 = vld [vmem:[#allocation2 + $0x260] ss:$8 sps:$4 sm:$0xff]  }
 0x15e   : > { %1315 = vmatprep.mubr.bf16.mxu1 %v911_v10  ;;  %v815_v47 = vsel %vm791_vm1, %v813_v32, %v814_v46  ;;  %v864_v59 = vsel %vm840_vm2, %v862_v48, %v863_v49  ;;  %v3991_v10 = vld [vmem:[#allocation2 + $0x1b4] ss:$8 sps:$4 sm:$0xff]   ;;  %v3989_v46 = vld [vmem:[#allocation2 + $0x1b0] ss:$8 sps:$4 sm:$0xff]   ;;  %v3995_v48 = vld [vmem:[#allocation2 + $0x1a0] ss:$8 sps:$4 sm:$0xff]  }
 0x15f   : > { %v3511_v54 = vpack.c.bf16 %v815_v47, %v813_v32  ;;  %v3535_v6 = vpack.c.bf16 %v863_v49, %v864_v59  ;;  %2045 = vmatprep.subr.bf16.mxu1 %v3991_v10  ;;  %v3997_v32 = vld [vmem:[#allocation2 + $0x1a4] ss:$8 sps:$4 sm:$0xff]   ;;  %v4000_v49 = vld [vmem:[#allocation2 + $0x194] ss:$8 sps:$4 sm:$0xff]   ;;  %v3998_v47 = vld [vmem:[#allocation2 + $0x190] ss:$8 sps:$4 sm:$0xff]  }
 0x160   : > { %2046 = vmatpush1.bf16.msra.mxu1 %v3989_v46  ;;  %v4006_v59 = vld [vmem:[#allocation2 + $0x184] ss:$8 sps:$4 sm:$0xff]   ;;  %v3994_v10 = vld [vmem:[#allocation2 + $0x2d4] ss:$8 sps:$4 sm:$0xff]  }
 0x161   : > { %3536 = vmatmul.mubr.msk.bf16.gmra.mxu0 %vm4737_vm5, %v3535_v6  ;;  %3512 = vmatmul.mubr.msk.bf16.gmra.mxu1 %vm4752_vm6, %v3511_v54  ;;  %v4004_v54 = vld [vmem:[#allocation2 + $0x180] ss:$8 sps:$4 sm:$0xff]   ;;  %v4009_v6 = vld [vmem:[#allocation2 + $0x274] ss:$8 sps:$4 sm:$0xff]  }
 0x162   : > { %2182 = vmatprep.mubr.bf16.mxu0 %v6013_v11  ;;  %2047 = vmatprep.subr.bf16.mxu1 %v3997_v32  ;;  %v4018_v46 = vld [vmem:[#allocation2 + $0x254] ss:$8 sps:$4 sm:$0xff]   ;;  %v4016_v32 = vld [vmem:[#allocation2 + $0x250] ss:$8 sps:$4 sm:$0xff]  }
 0x163   : > { %2154 = vmatprep.subr.bf16.mxu0 %v3994_v10  ;;  %v4031_v10 = vld [vmem:[#allocation2 + $0x220] ss:$8 sps:$4 sm:$0xff]  }
 0x164   : > { %2048 = vmatpush1.bf16.msra.mxu1 %v3995_v48  ;;  %2155 = vmatpush1.bf16.msra.mxu0 %v3992_v15  ;;  %v4003_v48 = vld [vmem:[#allocation2 + $0x2c4] ss:$8 sps:$4 sm:$0xff]   ;;  %v4019_v15 = vld [vmem:[#allocation2 + $0x2a0] ss:$8 sps:$4 sm:$0xff]  }
 0x165   : > { %2049 = vmatprep.subr.bf16.mxu1 %v4000_v49  ;;  %v4001_v49 = vld [vmem:[#allocation2 + $0x2c0] ss:$8 sps:$4 sm:$0xff]   ;;  %2156 = vmatprep.subr.bf16.mxu0 %v4003_v48  ;;  %v4028_v48 = vld [vmem:[#allocation2 + $0x290] ss:$8 sps:$4 sm:$0xff]  }
 0x168   : > { %2050 = vmatpush1.bf16.msra.mxu1 %v3998_v47  ;;  %v4024_v47 = vld [vmem:[#allocation2 + $0x244] ss:$8 sps:$4 sm:$0xff]   ;;  %2157 = vmatpush1.bf16.msra.mxu0 %v4001_v49  ;;  %v4034_v49 = vld [vmem:[#allocation2 + $0x210] ss:$8 sps:$4 sm:$0xff]  }
 0x169   : > { %2051 = vmatprep.subr.bf16.mxu1 %v4006_v59  ;;  %v4022_v59 = vld [vmem:[#allocation2 + $0x240] ss:$8 sps:$4 sm:$0xff]  }
 0x16c   : > { %2052 = vmatpush1.bf16.msra.mxu1 %v4004_v54  ;;  %v4012_v54 = vld [vmem:[#allocation2 + $0x2b4] ss:$8 sps:$4 sm:$0xff]  }
 0x16d   : > { %2053 = vmatprep.subr.bf16.mxu1 %v4009_v6  ;;  %v4027_v6 = vld [vmem:[#allocation2 + $0x234] ss:$8 sps:$4 sm:$0xff]   ;;  %2158 = vmatprep.subr.bf16.mxu0 %v4012_v54  ;;  %v4037_v54 = vld [vmem:[#allocation2 + $0x280] ss:$8 sps:$4 sm:$0xff]  }
 0x170   : > { %2054 = vmatpush2.bf16.msra.mxu1 %v4007_v7  ;;  %v4010_v7 = vld [vmem:[#allocation2 + $0x2b0] ss:$8 sps:$4 sm:$0xff]  }
 0x171   : > { %2055 = vmatprep.subr.bf16.mxu1 %v4015_v21  ;;  %2159 = vmatpush1.bf16.msra.mxu0 %v4010_v7  ;;  %v4021_v21 = vld [vmem:[#allocation2 + $0x2a4] ss:$8 sps:$4 sm:$0xff]   ;;  %v961_v7 = vld [vmem:[%s5907_s5] sm:$0x3] }
 0x172   : > { %2160 = vmatprep.subr.bf16.mxu0 %v4021_v21 }
 0x174   : > { %2056 = vmatpush2.bf16.msra.mxu1 %v4013_v14  ;;  %v4033_v14 = vld [vmem:[#allocation2 + $0x224] ss:$8 sps:$4 sm:$0xff]  }
 0x175   : > { %2057 = vmatprep.subr.bf16.mxu1 %v4018_v46  ;;  %2161 = vmatpush1.bf16.msra.mxu0 %v4019_v15  ;;  %v4030_v46 = vld [vmem:[#allocation2 + $0x294] ss:$8 sps:$4 sm:$0xff]  }
 0x176   : > { %2162 = vmatprep.subr.bf16.mxu0 %v4030_v46 }
 0x178   : > { %2058 = vmatpush2.bf16.msra.mxu1 %v4016_v32  ;;  %v4036_v32 = vld [vmem:[#allocation2 + $0x214] ss:$8 sps:$4 sm:$0xff]  }
 0x179   : > { %2059 = vmatprep.subr.bf16.mxu1 %v4024_v47  ;;  %2163 = vmatpush1.bf16.msra.mxu0 %v4028_v48  ;;  %v4039_v47 = vld [vmem:[#allocation2 + $0x284] ss:$8 sps:$4 sm:$0xff]  }
 0x17a   : > { %2164 = vmatprep.subr.bf16.mxu0 %v4039_v47 }
 0x17c   : > { %2060 = vmatpush2.bf16.msra.mxu1 %v4022_v59  ;;  %v4042_v59 = vld [vmem:[#allocation2 + $0x204] ss:$8 sps:$4 sm:$0xff]  }
 0x17d   : > { %2061 = vmatprep.subr.bf16.mxu1 %v4027_v6  ;;  %2165 = vmatpush1.bf16.msra.mxu0 %v4037_v54  ;;  %v4045_v6 = vld [vmem:[#allocation2 + $0x374] ss:$8 sps:$4 sm:$0xff]  }
 0x180   : > { %2062 = vmatpush2.bf16.msra.mxu1 %v4025_v50  ;;  %v4040_v50 = vld [vmem:[#allocation2 + $0x200] ss:$8 sps:$4 sm:$0xff]  }
 0x181   : > { %2063 = vmatprep.subr.bf16.mxu1 %v4033_v14  ;;  %v4994_v14 = vrot.slane %v961_v7, %v4650_v22 }
 0x184   : > { %2064 = vmatpush2.bf16.msra.mxu1 %v4031_v10 }
 0x185   : > { %2065 = vmatprep.subr.bf16.mxu1 %v4036_v32 }
 0x188   : > { %2066 = vmatpush2.bf16.msra.mxu1 %v4034_v49 }
 0x189   : > { %2067 = vmatprep.subr.bf16.mxu1 %v4042_v59 }
 0x18c   : > { %2068 = vmatpush2.bf16.msra.mxu1 %v4040_v50 }
 0x18d   : > { %2861 = vmatprep.subr.bf16.mxu1 %v4045_v6 }
 0x1e8   : > { %v4991_v21 = vpop.f32.mrf.mxu0  ;;  %v4996_v15 = vpop.f32.mrf.mxu1 }
 0x1ea   : > { %v1362_v10 = vpop.f32.mrf.mxu0  ;;  %v1249_v46 = vpop.f32.mrf.mxu1 }
 0x1eb   : > { %v1250_v48 = vadd.f32 %v1249_v46, %v4994_v14 }
 0x1ec   : > { %v4998_v32 = vpop.f32.mrf.mxu0  ;;  %v5001_v49 = vpop.f32.mrf.mxu1 }
 0x1ed   : > { %v1363_v59 = vadd.f32 %v1362_v10, %v1250_v48 }
 0x1ee   : > { %v1366_v47 = vpop.f32.mrf.mxu0  ;;  %v1253_v54 = vpop.f32.mrf.mxu1 }
 0x1ef   : > { %v3537_v50 = vmul.f32 -1.442695, %v1363_v59  ;;  %v1254_v6 = vadd.f32 %v1253_v54, %v4994_v14 }
 0x1f0   : > { %v5006_v29 = vpop.f32.mrf.mxu1 }
 0x1f1   : > { %v5004_v24 = vpop.f32.mrf.mxu0  ;;  %4179 = vpow2.f32 %v3537_v50  ;;  %v1367_v36 = vadd.f32 %v1366_v47, %v1254_v6 }
 0x1f2   : > { %v1259_v4 = vpop.f32.mrf.mxu1 }
 0x1f3   : > { %v1372_v34 = vpop.f32.mrf.mxu0  ;;  %v3538_v58 = vmul.f32 -1.442695, %v1367_v36  ;;  %v1260_v28 = vadd.f32 %v1259_v4, %v4994_v14 }
 0x1f4   : > { %v5011_v60 = vpop.f32.mrf.mxu1 }
 0x1f5   : > { %v5009_v46 = vpop.f32.mrf.mxu0  ;;  %4181 = vpow2.f32 %v3538_v58  ;;  %v1373_v10 = vadd.f32 %v1372_v34, %v1260_v28 }
 0x1f6   : > { %v1263_v59 = vpop.f32.mrf.mxu1 }
 0x1f7   : > { %v1376_v48 = vpop.f32.mrf.mxu0  ;;  %v3539_v54 = vmul.f32 -1.442695, %v1373_v10  ;;  %v1264_v38 = vadd.f32 %v1263_v59, %v4994_v14 }
 0x1f9   : > { %v5014_v63 = vpop.f32.mrf.mxu0  ;;  %v5016_v50 = vpop.f32.mrf.mxu1  ;;  %4183 = vpow2.f32 %v3539_v54  ;;  %v1377_v47 = vadd.f32 %v1376_v48, %v1264_v38 }
 0x1fb   : > { %v1382_v36 = vpop.f32.mrf.mxu0  ;;  %v1269_v6 = vpop.f32.mrf.mxu1  ;;  %v3540_v4 = vmul.f32 -1.442695, %v1377_v47 }
 0x1fc   : > { %v1270_v41 = vadd.f32 %v1269_v6, %v4994_v14 }
 0x1fd   : > { %v5019_v23 = vpop.f32.mrf.mxu0  ;;  %v5021_v58 = vpop.f32.mrf.mxu1  ;;  %4185 = vpow2.f32 %v3540_v4 }
 0x1fe   : > { %v1383_v28 = vadd.f32 %v1382_v36, %v1270_v41  ;;  %v4180_v10 = vpop.eup %4179 }
 0x1ff   : > { %v1386_v34 = vpop.f32.mrf.mxu0  ;;  %v1273_v59 = vpop.f32.mrf.mxu1  ;;  %v1487_v12 = vadd.f32 1.0, %v4180_v10 }
 0x200   : > { %v3541_v22 = vmul.f32 -1.442695, %v1383_v28  ;;  %v1274_v40 = vadd.f32 %v1273_v59, %v4994_v14  ;;  %v5034_v28 = vrot.slane %v961_v7, %v4676_v55 }
 0x201   : > { %v5024_v54 = vpop.f32.mrf.mxu0  ;;  %v5026_v38 = vpop.f32.mrf.mxu1  ;;  %4187 = vrcp.f32 %v1487_v12 }
 0x202   : > { %v1387_v48 = vadd.f32 %v1386_v34, %v1274_v40  ;;  %v4182_v6 = vpop.eup %4181  ;;  %4189 = vpow2.f32 %v3541_v22  ;;  %v1248_v25 = vadd.f32 %v4996_v15, %v5034_v28  ;;  %v1252_v17 = vadd.f32 %v5001_v49, %v5034_v28 }
 0x203   : > { %v1392_v47 = vpop.f32.mrf.mxu0  ;;  %v1279_v20 = vpop.f32.mrf.mxu1  ;;  %v1488_v62 = vadd.f32 1.0, %v4182_v6 }
 0x204   : > { %v3542_v4 = vmul.f32 -1.442695, %v1387_v48  ;;  %v1280_v41 = vadd.f32 %v1279_v20, %v4994_v14  ;;  %v1361_v45 = vadd.f32 %v4991_v21, %v1248_v25  ;;  %v1365_v25 = vadd.f32 %v4998_v32, %v1252_v17 }
 0x205   : > { %v5029_v36 = vpop.f32.mrf.mxu0  ;;  %v5031_v10 = vpop.f32.mrf.mxu1  ;;  %4191 = vrcp.f32 %v1488_v62 }
 0x206   : > { %v1393_v59 = vadd.f32 %v1392_v47, %v1280_v41  ;;  %v4184_v12 = vpop.eup %4183  ;;  %4193 = vpow2.f32 %v3542_v4 }
 0x207   : > { %v1396_v0 = vpop.f32.mrf.mxu0  ;;  %v1283_v40 = vpop.f32.mrf.mxu1  ;;  %v1489_v34 = vadd.f32 1.0, %v4184_v12 }
 0x208   : > { %v3543_v22 = vmul.f32 -1.442695, %v1393_v59  ;;  %v1284_v6 = vadd.f32 %v1283_v40, %v4994_v14 }
 0x209   : > { %v5037_v48 = vpop.f32.mrf.mxu0  ;;  %v5039_v20 = vpop.f32.mrf.mxu1  ;;  %4195 = vrcp.f32 %v1489_v34 }
 0x20a   : > { %v1397_v7 = vadd.f32 %v1396_v0, %v1284_v6  ;;  %v4186_v62 = vpop.eup %4185  ;;  %4197 = vpow2.f32 %v3543_v22 }
 0x20b   : > { %v1402_v55 = vpop.f32.mrf.mxu0  ;;  %v1289_v47 = vpop.f32.mrf.mxu1  ;;  %v1490_v41 = vadd.f32 1.0, %v4186_v62 }
 0x20c   : > { %v3544_v4 = vmul.f32 -1.442695, %v1397_v7  ;;  %v1290_v12 = vadd.f32 %v1289_v47, %v4994_v14 }
 0x20d   : > { %v5044_v59 = vpop.f32.mrf.mxu0  ;;  %v5046_v40 = vpop.f32.mrf.mxu1  ;;  %4199 = vrcp.f32 %v1490_v41 }
 0x20e   : > { %v1403_v15 = vadd.f32 %v1402_v55, %v1290_v12  ;;  %v4188_v34 = vpop.eup %4187  ;;  %4201 = vpow2.f32 %v3544_v4  ;;  %v1258_v4 = vadd.f32 %v5006_v29, %v5034_v28 }
 0x20f   : > { %v1406_v0 = vpop.f32.mrf.mxu0  ;;  %v1293_v22 = vpop.f32.mrf.mxu1  ;;  %v1535_v18 = vmul.f32 %v4188_v34, %v1361_v45 }
 0x210   : > { %v4190_v6 = vpop.eup %4189  ;;  %v3545_v62 = vmul.f32 -1.442695, %v1403_v15  ;;  %v1294_v7 = vadd.f32 %v1293_v22, %v4994_v14 }
 0x211   : > { %v5052_v47 = vpop.f32.mrf.mxu0  ;;  %v1491_v33 = vadd.f32 1.0, %v4190_v6  ;;  %v5054_v2 = vpop.f32.mrf.mxu1  ;;  %v1551_v55 = vadd.f32 %v1535_v18, %v4700_v19  ;;  %v1262_v19 = vadd.f32 %v5011_v60, %v5034_v28 }
 0x212   : > { %4203 = vpow2.f32 %v3545_v62  ;;  %v1407_v21 = vadd.f32 %v1406_v0, %v1294_v7  ;;  %v4192_v41 = vpop.eup %4191  ;;  %v1371_v62 = vadd.f32 %v5004_v24, %v1258_v4  ;;  %v1268_v7 = vadd.f32 %v5016_v50, %v5034_v28 }
 0x213   : > { %v1412_v49 = vpop.f32.mrf.mxu0  ;;  %4205 = vrcp.f32 %v1491_v33  ;;  %v1299_v12 = vpop.f32.mrf.mxu1  ;;  %v1536_v6 = vmul.f32 %v4192_v41, %v1365_v25  ;;  %v1567_v32 = vmul.f32 0.70710677, %v1551_v55  ;;  %v1375_v24 = vadd.f32 %v5009_v46, %v1262_v19 }
 0x214   : > { %v4194_v15 = vpop.eup %4193  ;;  %v3546_v22 = vmul.f32 -1.442695, %v1407_v21  ;;  %v1300_v45 = vadd.f32 %v1299_v12, %v4994_v14 }
 0x215   : > { %v5061_v34 = vpop.f32.mrf.mxu0  ;;  %v1492_v37 = vadd.f32 1.0, %v4194_v15  ;;  %v5063_v17 = vpop.f32.mrf.mxu1  ;;  %v1552_v29 = vadd.f32 %v1536_v6, %v4712_v30  ;;  %v5072_v21 = vmul.f32 %v1567_v32, %v4689_v9  ;;  %v1381_v6 = vadd.f32 %v5014_v63, %v1268_v7 }
 0x216   : > { %4207 = vpow2.f32 %v3546_v22  ;;  %v1413_v18 = vadd.f32 %v1412_v49, %v1300_v45  ;;  %v4196_v33 = vpop.eup %4195 }
 0x217   : > { %v1416_v0 = vpop.f32.mrf.mxu0  ;;  %4209 = vrcp.f32 %v1492_v37  ;;  %v1303_v25 = vpop.f32.mrf.mxu1  ;;  %6014 = vst [vmem:[#allocation42_spill] sm:$0xff] %v5072_v21  ;;  %v1568_v49 = vmul.f32 0.70710677, %v1552_v29  ;;  %v1537_v22 = vmul.f32 %v4196_v33, %v1371_v62  ;;  %v1615_v29 = vrot.slane %v5072_v21, 7 }
 0x218   : > { %v4198_v55 = vpop.eup %4197  ;;  %v3547_v41 = vmul.f32 -1.442695, %v1413_v18  ;;  %v1304_v60 = vadd.f32 %v1303_v25, %v4994_v14  ;;  %v1663_v18 = vrot.slane %v5072_v21, 1 }
 0x219   : > { %v5075_v12 = vpop.f32.mrf.mxu0  ;;  %v1493_v15 = vadd.f32 1.0, %v4198_v55  ;;  %v5077_v30 = vpop.f32.mrf.mxu1  ;;  %v5081_v4 = vmul.f32 %v1568_v49, %v4706_v26  ;;  %v1272_v49 = vadd.f32 %v5021_v58, %v5034_v28  ;;  %v4043_v26 = vld [vmem:[#allocation2 + $0x370] ss:$8 sps:$4 sm:$0xff]   ;;  %v1278_v58 = vadd.f32 %v5026_v38, %v5034_v28 }
 0x21a   : > { %4211 = vpow2.f32 %v3547_v41  ;;  %v1417_v50 = vadd.f32 %v1416_v0, %v1304_v60  ;;  %v4200_v45 = vpop.eup %4199  ;;  %v1553_v0 = vadd.f32 %v1537_v22, %v4746_v61 }
 0x21b   : > { %v1422_v37 = vpop.f32.mrf.mxu0  ;;  %6015 = vst [vmem:[#allocation43_spill] sm:$0xff] %v5081_v4  ;;  %4213 = vrcp.f32 %v1493_v15  ;;  %v1309_v32 = vpop.f32.mrf.mxu1  ;;  %v1616_v19 = vrot.slane %v5081_v4, 7  ;;  %v1712_v63 = vpack.c.bf16 %v5081_v4, %v5072_v21  ;;  %v1664_v7 = vrot.slane %v5081_v4, 1  ;;  %v4048_v4 = vld [vmem:[#allocation2 + $0x364] ss:$8 sps:$4 sm:$0xff]  }
 0x21c   : > { %v4202_v25 = vpop.eup %4201  ;;  %v3548_v55 = vmul.f32 -1.442695, %v1417_v50  ;;  %v1310_v33 = vadd.f32 %v1309_v32, %v4994_v14  ;;  %v1538_v60 = vmul.f32 %v4200_v45, %v1375_v24 }
 0x21d   : > { %v5087_v46 = vpop.f32.mrf.mxu0  ;;  %v1494_v62 = vadd.f32 1.0, %v4202_v25  ;;  %v5091_v41 = vpop.f32.mrf.mxu1  ;;  %v1617_v32 = vsel %vm791_vm1, %v1615_v29, %v1616_v19  ;;  %2069 = vmatprep.mubr.bf16.mxu1 %v1712_v63  ;;  %v1665_v25 = vsel %vm840_vm2, %v1663_v18, %v1664_v7  ;;  %v1569_v18 = vmul.f32 0.70710677, %v1553_v0 }
 0x21e   : > { %4215 = vpow2.f32 %v3548_v55  ;;  %v1423_v15 = vadd.f32 %v1422_v37, %v1310_v33  ;;  %v3604_v22 = vpack.c.bf16 %v1617_v32, %v1615_v29  ;;  %v1554_v21 = vadd.f32 %v1538_v60, %v4762_v13 }
 0x21f   : > { %v1426_v50 = vpop.f32.mrf.mxu0  ;;  %v4204_v9 = vpop.eup %4203  ;;  %4217 = vrcp.f32 %v1494_v62  ;;  %v3635_v29 = vpack.c.bf16 %v1664_v7, %v1665_v25  ;;  %v1385_v63 = vadd.f32 %v5019_v23, %v1272_v49  ;;  %v4051_v23 = vld [vmem:[#allocation2 + $0x354] ss:$8 sps:$4 sm:$0xff]  }
 0x220   : > { %v1313_v61 = vpop.f32.mrf.mxu1  ;;  %v4206_v24 = vpop.eup %4205  ;;  %v1495_v45 = vadd.f32 1.0, %v4204_v9  ;;  %v3549_v37 = vmul.f32 -1.442695, %v1423_v15  ;;  %3605 = vmatmul.mubr.msk.bf16.vlgmr.msra.gmra.mxu1 %vm4752_vm6, %v3604_v22  ;;  %v1570_v62 = vmul.f32 0.70710677, %v1554_v21  ;;  %v1282_v22 = vadd.f32 %v5031_v10, %v5034_v28 }
 0x221   : > { %v1314_v55 = vadd.f32 %v1313_v61, %v4994_v14  ;;  %v5104_v33 = vpop.f32.mrf.mxu0  ;;  %v1539_v13 = vmul.f32 %v4206_v24, %v1381_v6  ;;  %2862 = vmatpush1.bf16.msra.mxu1 %v4043_v26  ;;  %v4046_v9 = vld [vmem:[#allocation2 + $0x360] ss:$8 sps:$4 sm:$0xff]   ;;  %3636 = vmatmul.mubr.msk.bf16.vlgmr.msra.gmra.mxu0 %vm4737_vm5, %v3635_v29  ;;  %v5114_v61 = vmul.f32 %v1569_v18, %v4716_v35 }
 0x222   : > { %v5106_v19 = vpop.f32.mrf.mxu1  ;;  %4219 = vrcp.f32 %v1495_v45  ;;  %v5117_v0 = vmul.f32 %v1570_v62, %v4756_v5  ;;  %2863 = vmatprep.subr.bf16.mxu1 %v4048_v4  ;;  %v1391_v26 = vadd.f32 %v5024_v54, %v1278_v58  ;;  %2192 = vmatprep.mubr.bf16.mxu0 %v6013_v11 }
 0x223   : > { %v1427_v60 = vadd.f32 %v1426_v50, %v1314_v55  ;;  %v1432_v38 = vpop.f32.mrf.mxu0  ;;  %v4208_v15 = vpop.eup %4207  ;;  %4221 = vpow2.f32 %v3549_v37  ;;  %v1555_v21 = vadd.f32 %v1539_v13, %v4791_v57  ;;  %v1618_v4 = vrot.slane %v5114_v61, 7  ;;  %v4049_v55 = vld [vmem:[#allocation2 + $0x350] ss:$8 sps:$4 sm:$0xff]  }
 0x224   : > { %v1319_v32 = vpop.f32.mrf.mxu1  ;;  %v4210_v6 = vpop.eup %4209  ;;  %v1496_v7 = vadd.f32 1.0, %v4208_v15  ;;  %v1715_v57 = vpack.c.bf16 %v5117_v0, %v5114_v61  ;;  %v1619_v54 = vrot.slane %v5117_v0, 7  ;;  %v1666_v45 = vrot.slane %v5114_v61, 1 }
 0x225   : > { %v3550_v49 = vmul.f32 -1.442695, %v1427_v60  ;;  %v1320_v50 = vadd.f32 %v1319_v32, %v4994_v14  ;;  %v5127_v24 = vpop.f32.mrf.mxu0  ;;  %v1667_v37 = vrot.slane %v5117_v0, 1  ;;  %2864 = vmatpush1.bf16.msra.mxu1 %v4046_v9  ;;  %v1540_v62 = vmul.f32 %v4210_v6, %v1385_v63 }
 0x226   : > { %v5125_v25 = vpop.f32.mrf.mxu1  ;;  %4223 = vrcp.f32 %v1496_v7  ;;  %2079 = vmatprep.mubr.bf16.mxu1 %v1715_v57  ;;  %v1620_v18 = vsel %vm791_vm1, %v1618_v4, %v1619_v54  ;;  %v1571_v13 = vmul.f32 0.70710677, %v1555_v21  ;;  %2865 = vmatprep.subr.bf16.mxu1 %v4051_v23  ;;  %v1288_v15 = vadd.f32 %v5039_v20, %v5034_v28 }
 0x227   : > { %v1433_v58 = vadd.f32 %v1432_v38, %v1320_v50  ;;  %v4212_v10 = vpop.eup %4211  ;;  %4225 = vpow2.f32 %v3550_v49  ;;  %v1436_v50 = vpop.f32.mrf.mxu0  ;;  %v3608_v9 = vpack.c.bf16 %v1620_v18, %v1618_v4  ;;  %v1668_v5 = vsel %vm840_vm2, %v1666_v45, %v1667_v37 }
 0x228   : > { %v1323_v29 = vpop.f32.mrf.mxu1  ;;  %v4214_v60 = vpop.eup %4213  ;;  %v1497_v38 = vadd.f32 1.0, %v4212_v10  ;;  %v1556_v49 = vadd.f32 %v1540_v62, %v4804_v8  ;;  %v5142_v57 = vmul.f32 %v1571_v13, %v4782_v44  ;;  %v3638_v21 = vpack.c.bf16 %v1667_v37, %v1668_v5 }
 0x229   : > { %v3551_v32 = vmul.f32 -1.442695, %v1433_v58  ;;  %v1324_v7 = vadd.f32 %v1323_v29, %v4994_v14  ;;  %v1541_v23 = vmul.f32 %v4214_v60, %v1391_v26  ;;  %2866 = vmatpush1.bf16.msra.mxu1 %v4049_v55  ;;  %v1395_v20 = vadd.f32 %v5029_v36, %v1282_v22 }
 0x22a   : > { %4227 = vrcp.f32 %v1497_v38  ;;  %3609 = vmatmul.mubr.msk.bf16.gmra.mxu1 %vm4752_vm6, %v3608_v9  ;;  %v1572_v14 = vmul.f32 0.70710677, %v1556_v49  ;;  %v1401_v54 = vadd.f32 %v5037_v48, %v1288_v15  ;;  %3639 = vmatmul.mubr.msk.bf16.gmra.mxu0 %vm4737_vm5, %v3638_v21  ;;  %v1292_v26 = vadd.f32 %v5046_v40, %v5034_v28 }
 0x22b   : > { %v1437_v63 = vadd.f32 %v1436_v50, %v1324_v7  ;;  %v4216_v6 = vpop.eup %4215  ;;  %4229 = vpow2.f32 %v3551_v32  ;;  %v1557_v5 = vadd.f32 %v1541_v23, %v4828_v42  ;;  %v1298_v36 = vadd.f32 %v5054_v2, %v5034_v28  ;;  %2202 = vmatprep.mubr.bf16.mxu0 %v6013_v11 }
 0x22c   : > { %v4218_v4 = vpop.eup %4217  ;;  %v1498_v8 = vadd.f32 1.0, %v4216_v6  ;;  %v5156_v22 = vmul.f32 %v1572_v14, %v4795_v1  ;;  %v1621_v48 = vrot.slane %v5142_v57, 7  ;;  %v1669_v37 = vrot.slane %v5142_v57, 1 }
 0x22d   : > { %v3552_v58 = vmul.f32 -1.442695, %v1437_v63  ;;  %v1542_v45 = vmul.f32 %v4218_v4, %v1395_v20  ;;  %v1573_v55 = vmul.f32 0.70710677, %v1557_v5  ;;  %v1405_v32 = vadd.f32 %v5044_v59, %v1292_v26 }
 0x22e   : > { %4231 = vrcp.f32 %v1498_v8  ;;  %v1718_v42 = vpack.c.bf16 %v5156_v22, %v5142_v57  ;;  %v1622_v40 = vrot.slane %v5156_v22, 7  ;;  %v1670_v2 = vrot.slane %v5156_v22, 1 }
 0x22f   : > { %v4220_v10 = vpop.eup %4219  ;;  %4233 = vpow2.f32 %v3552_v58  ;;  %v1558_v18 = vadd.f32 %v1542_v45, %v4842_v56  ;;  %v5169_v38 = vmul.f32 %v1573_v55, %v4819_v31  ;;  %v1411_v63 = vadd.f32 %v5052_v47, %v1298_v36 }
 0x230   : > { %v4222_v29 = vpop.eup %4221  ;;  %v1543_v62 = vmul.f32 %v4220_v10, %v1401_v54  ;;  %2089 = vmatprep.mubr.bf16.mxu1 %v1718_v42  ;;  %v1623_v60 = vsel %vm791_vm1, %v1621_v48, %v1622_v40  ;;  %v1671_v15 = vsel %vm840_vm2, %v1669_v37, %v1670_v2  ;;  %v1302_v23 = vadd.f32 %v5063_v17, %v5034_v28 }
 0x231   : > { %v1499_v13 = vadd.f32 1.0, %v4222_v29  ;;  %v3612_v7 = vpack.c.bf16 %v1623_v60, %v1621_v48  ;;  %v3641_v50 = vpack.c.bf16 %v1670_v2, %v1671_v15  ;;  %v1574_v9 = vmul.f32 0.70710677, %v1558_v18 }
 0x232   : > { %v1559_v56 = vadd.f32 %v1543_v62, %v4861_v27  ;;  %v1624_v47 = vrot.slane %v5169_v38, 7  ;;  %v1672_v27 = vrot.slane %v5169_v38, 1  ;;  %v1415_v40 = vadd.f32 %v5061_v34, %v1302_v23  ;;  %v6018_v23 = vld [vmem:[#allocation26_spill] sm:$0xff] }
 0x233   : > { %v4224_v49 = vpop.eup %4223  ;;  %4235 = vrcp.f32 %v1499_v13  ;;  %3613 = vmatmul.mubr.msk.bf16.gmra.mxu1 %vm4752_vm6, %v3612_v7  ;;  %3642 = vmatmul.mubr.msk.bf16.gmra.mxu0 %vm4737_vm5, %v3641_v50  ;;  %v5181_v59 = vmul.f32 %v1574_v9, %v4832_v52  ;;  %v1308_v18 = vadd.f32 %v5077_v30, %v5034_v28 }
 0x234   : > { %v4226_v21 = vpop.eup %4225  ;;  %v1544_v6 = vmul.f32 %v4224_v49, %v1405_v32  ;;  %2212 = vmatprep.mubr.bf16.mxu0 %v6013_v11  ;;  %v1575_v14 = vmul.f32 0.70710677, %v1559_v56  ;;  %v6017_v49 = vld [vmem:[#allocation29_spill] sm:$0xff] }
 0x235   : > { %v1500_v20 = vadd.f32 1.0, %v4226_v21  ;;  %v1721_v17 = vpack.c.bf16 %v5181_v59, %v5169_v38  ;;  %v1625_v4 = vrot.slane %v5181_v59, 7  ;;  %v1673_v54 = vrot.slane %v5181_v59, 1 }
 0x236   : > { %v1560_v8 = vadd.f32 %v1544_v6, %v4873_v43  ;;  %v5192_v5 = vmul.f32 %v1575_v14, %v4853_v16  ;;  %v1421_v56 = vadd.f32 %v5075_v12, %v1308_v18  ;;  %v1312_v21 = vadd.f32 %v5091_v41, %v5034_v28  ;;  %v6022_v41 = vld [vmem:[#allocation32_spill] sm:$0xff] }
 0x237   : > { %v4228_v58 = vpop.eup %4227  ;;  %4237 = vrcp.f32 %v1500_v20  ;;  %2099 = vmatprep.mubr.bf16.mxu1 %v1721_v17  ;;  %v1626_v36 = vsel %vm791_vm1, %v1624_v47, %v1625_v4  ;;  %v1674_v45 = vsel %vm840_vm2, %v1672_v27, %v1673_v54  ;;  %v6020_v4 = vld [vmem:[#allocation28_spill] sm:$0xff]  ;;  %v1318_v12 = vadd.f32 %v5106_v19, %v5034_v28 }
 0x238   : > { %v4230_v26 = vpop.eup %4229  ;;  %v1576_v48 = vmul.f32 0.70710677, %v1560_v8  ;;  %v1545_v37 = vmul.f32 %v4228_v58, %v1411_v63  ;;  %v3616_v10 = vpack.c.bf16 %v1626_v36, %v1624_v47  ;;  %v3644_v42 = vpack.c.bf16 %v1673_v54, %v1674_v45 }
 0x239   : > { %v1501_v55 = vadd.f32 1.0, %v4230_v26  ;;  %v1627_v62 = vrot.slane %v5192_v5, 7  ;;  %v1675_v13 = vrot.slane %v5192_v5, 1  ;;  %v1425_v8 = vadd.f32 %v5087_v46, %v1312_v21 }
 0x23a   : > { %v5198_v43 = vmul.f32 %v1576_v48, %v4865_v39  ;;  %v1561_v2 = vadd.f32 %v1545_v37, %v4894_v51 }
 0x23b   : > { %v4232_v29 = vpop.eup %4231  ;;  %4239 = vrcp.f32 %v1501_v55  ;;  %3617 = vmatmul.mubr.msk.bf16.gmra.mxu1 %vm4752_vm6, %v3616_v10  ;;  %3645 = vmatmul.mubr.msk.bf16.gmra.mxu0 %vm4737_vm5, %v3644_v42 }
 0x23c   : > { %6016 = vst [vmem:[#allocation44_spill] sm:$0xff] %v5198_v43  ;;  %v4234_v60 = vpop.eup %4233  ;;  %v1724_v34 = vpack.c.bf16 %v5198_v43, %v5192_v5  ;;  %v1628_v51 = vrot.slane %v5198_v43, 7  ;;  %v1676_v15 = vrot.slane %v5198_v43, 1  ;;  %v1546_v30 = vmul.f32 %v4232_v29, %v1415_v40  ;;  %2222 = vmatprep.mubr.bf16.mxu0 %v6013_v11  ;;  %v6023_v29 = vld [vmem:[#allocation35_spill] sm:$0xff] }
 0x23d   : > { %v1502_v32 = vadd.f32 1.0, %v4234_v60  ;;  %v1577_v7 = vmul.f32 0.70710677, %v1561_v2  ;;  %v1431_v40 = vadd.f32 %v5104_v33, %v1318_v12  ;;  %v1322_v2 = vadd.f32 %v5125_v25, %v5034_v28 }
 0x23e   : > { %2109 = vmatprep.mubr.bf16.mxu1 %v1724_v34  ;;  %v1629_v50 = vsel %vm791_vm1, %v1627_v62, %v1628_v51  ;;  %v1677_v9 = vsel %vm840_vm2, %v1675_v13, %v1676_v15  ;;  %v1562_v63 = vadd.f32 %v1546_v30, %v6017_v49  ;;  %v6024_v34 = vld [vmem:[#allocation31_spill] sm:$0xff] }
 0x23f   : > { %4241 = vrcp.f32 %v1502_v32  ;;  %v5221_v6 = vmul.f32 %v1577_v7, %v6018_v23  ;;  %v3620_v47 = vpack.c.bf16 %v1629_v50, %v1627_v62  ;;  %v3647_v27 = vpack.c.bf16 %v1676_v15, %v1677_v9  ;;  %v6026_v7 = vld [vmem:[#allocation34_spill] sm:$0xff] }
 0x240   : > { %v4236_v20 = vpop.eup %4235  ;;  %v1578_v14 = vmul.f32 0.70710677, %v1562_v63  ;;  %v1435_v32 = vadd.f32 %v5127_v24, %v1322_v2  ;;  %v6028_v9 = vld [vmem:[#allocation38_spill] sm:$0xff] }
 0x241   : > { %6019 = vst [vmem:[#allocation29_spill] sm:$0xff] %v5221_v6  ;;  %v1547_v17 = vmul.f32 %v4236_v20, %v1421_v56  ;;  %v1630_v58 = vrot.slane %v5221_v6, 7  ;;  %v1678_v46 = vrot.slane %v5221_v6, 1 }
 0x242   : > { %v5224_v54 = vmul.f32 %v1578_v14, %v6020_v4  ;;  %v6029_v14 = vld [vmem:[#allocation41_spill] sm:$0xff] }
 0x243   : > { %v1563_v26 = vadd.f32 %v1547_v17, %v6022_v41  ;;  %3621 = vmatmul.mubr.msk.bf16.gmra.mxu1 %vm4752_vm6, %v3620_v47  ;;  %3648 = vmatmul.mubr.msk.bf16.gmra.mxu0 %vm4737_vm5, %v3647_v27 }
 0x244   : > { %6021 = vst [vmem:[#allocation45_spill] sm:$0xff] %v5224_v54  ;;  %v4238_v36 = vpop.eup %4237  ;;  %v1727_v45 = vpack.c.bf16 %v5224_v54, %v5221_v6  ;;  %v1631_v48 = vrot.slane %v5224_v54, 7  ;;  %v1679_v19 = vrot.slane %v5224_v54, 1  ;;  %2232 = vmatprep.mubr.bf16.mxu0 %v6013_v11 }
 0x245   : > { %v1548_v37 = vmul.f32 %v4238_v36, %v1425_v8  ;;  %v1579_v55 = vmul.f32 0.70710677, %v1563_v26  ;;  %v6032_v36 = vld [vmem:[#allocation40_spill] sm:$0xff] }
 0x246   : > { %2119 = vmatprep.mubr.bf16.mxu1 %v1727_v45  ;;  %v1632_v10 = vsel %vm791_vm1, %v1630_v58, %v1631_v48  ;;  %v1680_v42 = vsel %vm840_vm2, %v1678_v46, %v1679_v19 }
 0x247   : > { %v1564_v18 = vadd.f32 %v1548_v37, %v6023_v29  ;;  %v3624_v13 = vpack.c.bf16 %v1632_v10, %v1630_v58  ;;  %v3650_v60 = vpack.c.bf16 %v1679_v19, %v1680_v42  ;;  %v5248_v51 = vmul.f32 %v1579_v55, %v6024_v34  ;;  %v6030_v58 = vld [vmem:[#allocation37_spill] sm:$0xff] }
 0x248   : > { %v4240_v62 = vpop.eup %4239  ;;  %v4054_v29 = vld [vmem:[#allocation2 + $0x344] ss:$8 sps:$4 sm:$0xff]  }
 0x249   : > { %6025 = vst [vmem:[#allocation32_spill] sm:$0xff] %v5248_v51  ;;  %v1580_v15 = vmul.f32 0.70710677, %v1564_v18  ;;  %v1549_v30 = vmul.f32 %v4240_v62, %v1431_v40  ;;  %v1633_v28 = vrot.slane %v5248_v51, 7  ;;  %v1681_v25 = vrot.slane %v5248_v51, 1  ;;  %2867 = vmatprep.subr.bf16.mxu1 %v4054_v29 }
 0x24a   : > { %v4052_v18 = vld [vmem:[#allocation2 + $0x340] ss:$8 sps:$4 sm:$0xff]   ;;  %v4057_v62 = vld [vmem:[#allocation2 + $0x334] ss:$8 sps:$4 sm:$0xff]  }
 0x24b   : > { %v5252_v50 = vmul.f32 %v1580_v15, %v6026_v7  ;;  %v1565_v33 = vadd.f32 %v1549_v30, %v6028_v9  ;;  %3625 = vmatmul.mubr.msk.bf16.gmra.mxu1 %vm4752_vm6, %v3624_v13  ;;  %3651 = vmatmul.mubr.msk.bf16.gmra.mxu0 %vm4737_vm5, %v3650_v60  ;;  %v4055_v13 = vld [vmem:[#allocation2 + $0x330] ss:$8 sps:$4 sm:$0xff]   ;;  %v4063_v60 = vld [vmem:[#allocation2 + $0x324] ss:$8 sps:$4 sm:$0xff]   ;;  %v4061_v15 = vld [vmem:[#allocation2 + $0x320] ss:$8 sps:$4 sm:$0xff]  }
 0x24c   : > { %v4242_v49 = vpop.eup %4241  ;;  %2242 = vmatprep.mubr.bf16.mxu0 %v6013_v11  ;;  %2868 = vmatpush1.bf16.msra.mxu1 %v4052_v18  ;;  %v4066_v30 = vld [vmem:[#allocation2 + $0x314] ss:$8 sps:$4 sm:$0xff]   ;;  %v4072_v9 = vld [vmem:[#allocation2 + $0x304] ss:$8 sps:$4 sm:$0xff]  }
 0x24d   : > { %6027 = vst [vmem:[#allocation35_spill] sm:$0xff] %v5252_v50  ;;  %v1730_v63 = vpack.c.bf16 %v5252_v50, %v5248_v51  ;;  %v1634_v24 = vrot.slane %v5252_v50, 7  ;;  %v1682_v56 = vrot.slane %v5252_v50, 1  ;;  %v1550_v21 = vmul.f32 %v4242_v49, %v1435_v32  ;;  %2869 = vmatprep.subr.bf16.mxu1 %v4057_v62  ;;  %v4064_v32 = vld [vmem:[#allocation2 + $0x310] ss:$8 sps:$4 sm:$0xff]  }
 0x24e   : > { %v1581_v20 = vmul.f32 0.70710677, %v1565_v33  ;;  %v4070_v33 = vld [vmem:[#allocation2 + $0x300] ss:$8 sps:$4 sm:$0xff]   ;;  %v5293_v49 = vld [vmem:[#allocation2 + $0x474] ss:$8 sps:$4 sm:$0xff]  }
 0x24f   : > { %2129 = vmatprep.mubr.bf16.mxu1 %v1730_v63  ;;  %v1635_v47 = vsel %vm791_vm1, %v1633_v28, %v1634_v24  ;;  %v1683_v27 = vsel %vm840_vm2, %v1681_v25, %v1682_v56  ;;  %v1566_v17 = vadd.f32 %v1550_v21, %v6029_v14  ;;  %v5295_v25 = vld [vmem:[#allocation2 + $0x470] ss:$8 sps:$4 sm:$0xff]   ;;  %2974 = vmatprep.subr.bf16.mxu0 %v5293_v49  ;;  %v5299_v24 = vld [vmem:[#allocation2 + $0x464] ss:$8 sps:$4 sm:$0xff]   ;;  %v5301_v21 = vld [vmem:[#allocation2 + $0x460] ss:$8 sps:$4 sm:$0xff]  }
 0x250   : > { %v3628_v8 = vpack.c.bf16 %v1635_v47, %v1633_v28  ;;  %v3653_v12 = vpack.c.bf16 %v1682_v56, %v1683_v27  ;;  %v5270_v41 = vmul.f32 %v1581_v20, %v6030_v58  ;;  %2870 = vmatpush1.bf16.msra.mxu1 %v4055_v13  ;;  %v4075_v28 = vld [vmem:[#allocation2 + $0x3f4] ss:$8 sps:$4 sm:$0xff]   ;;  %v4073_v63 = vld [vmem:[#allocation2 + $0x3f0] ss:$8 sps:$4 sm:$0xff]   ;;  %2975 = vmatpush1.bf16.msra.mxu0 %v5295_v25  ;;  %v4081_v56 = vld [vmem:[#allocation2 + $0x3e4] ss:$8 sps:$4 sm:$0xff]  }
 0x251   : > { %v1582_v26 = vmul.f32 0.70710677, %v1566_v17  ;;  %2871 = vmatprep.subr.bf16.mxu1 %v4063_v60  ;;  %v4079_v20 = vld [vmem:[#allocation2 + $0x3e0] ss:$8 sps:$4 sm:$0xff]   ;;  %2976 = vmatprep.subr.bf16.mxu0 %v5299_v24  ;;  %v5305_v47 = vld [vmem:[#allocation2 + $0x454] ss:$8 sps:$4 sm:$0xff]  }
 0x252   : > { %6031 = vst [vmem:[#allocation38_spill] sm:$0xff] %v5270_v41  ;;  %v1636_v48 = vrot.slane %v5270_v41, 7  ;;  %v1684_v37 = vrot.slane %v5270_v41, 1  ;;  %v4084_v27 = vld [vmem:[#allocation2 + $0x3d4] ss:$8 sps:$4 sm:$0xff]  }
 0x253   : > { %v5273_v45 = vmul.f32 %v1582_v26, %v6032_v36  ;;  %3629 = vmatmul.mubr.msk.bf16.gmra.mxu1 %vm4752_vm6, %v3628_v8  ;;  %3654 = vmatmul.mubr.msk.bf16.gmra.mxu0 %vm4737_vm5, %v3653_v12  ;;  %v5307_v14 = vld [vmem:[#allocation2 + $0x450] ss:$8 sps:$4 sm:$0xff]   ;;  %v5311_v8 = vld [vmem:[#allocation2 + $0x444] ss:$8 sps:$4 sm:$0xff]   ;;  %v5313_v26 = vld [vmem:[#allocation2 + $0x440] ss:$8 sps:$4 sm:$0xff]  }
 0x254   : > { %2252 = vmatprep.mubr.bf16.mxu0 %v6013_v11  ;;  %2872 = vmatpush1.bf16.msra.mxu1 %v4061_v15  ;;  %v4082_v17 = vld [vmem:[#allocation2 + $0x3d0] ss:$8 sps:$4 sm:$0xff]   ;;  %v4090_v12 = vld [vmem:[#allocation2 + $0x3c4] ss:$8 sps:$4 sm:$0xff]   ;;  %v4105_v29 = vld [vmem:[#allocation2 + $0x394] ss:$8 sps:$4 sm:$0xff]  }
 0x255   : > { %6033 = vst [vmem:[#allocation41_spill] sm:$0xff] %v5273_v45  ;;  %v1733_v46 = vpack.c.bf16 %v5273_v45, %v5270_v41  ;;  %v1637_v19 = vrot.slane %v5273_v45, 7  ;;  %v1685_v55 = vrot.slane %v5273_v45, 1  ;;  %2873 = vmatprep.subr.bf16.mxu1 %v4066_v30  ;;  %2977 = vmatpush1.bf16.msra.mxu0 %v5301_v21  ;;  %v5329_v18 = vld [vmem:[#allocation2 + $0x414] ss:$8 sps:$4 sm:$0xff]  }
 0x256   : > { %2978 = vmatprep.subr.bf16.mxu0 %v5305_v47  ;;  %6036 = vst [vmem:[#allocation48_spill] sm:$0xff] %v5329_v18  ;;  %v4103_v62 = vld [vmem:[#allocation2 + $0x390] ss:$8 sps:$4 sm:$0xff]   ;;  %v4111_v60 = vld [vmem:[#allocation2 + $0x384] ss:$8 sps:$4 sm:$0xff]  }
 0x257   : > { %2139 = vmatprep.mubr.bf16.mxu1 %v1733_v46  ;;  %v1638_v10 = vsel %vm791_vm1, %v1636_v48, %v1637_v19  ;;  %v1686_v42 = vsel %vm840_vm2, %v1684_v37, %v1685_v55  ;;  %v4093_v46 = vld [vmem:[#allocation2 + $0x3b4] ss:$8 sps:$4 sm:$0xff]   ;;  %v4091_v37 = vld [vmem:[#allocation2 + $0x3b0] ss:$8 sps:$4 sm:$0xff]   ;;  %v5335_v15 = vld [vmem:[#allocation2 + $0x404] ss:$8 sps:$4 sm:$0xff]  }
 0x258   : > { %v3632_v40 = vpack.c.bf16 %v1638_v10, %v1636_v48  ;;  %v3656_v2 = vpack.c.bf16 %v1685_v55, %v1686_v42  ;;  %2874 = vmatpush1.bf16.msra.mxu1 %v4064_v32  ;;  %v4088_v48 = vld [vmem:[#allocation2 + $0x3c0] ss:$8 sps:$4 sm:$0xff]   ;;  %v5317_v19 = vld [vmem:[#allocation2 + $0x434] ss:$8 sps:$4 sm:$0xff]   ;;  %v5319_v55 = vld [vmem:[#allocation2 + $0x430] ss:$8 sps:$4 sm:$0xff]  }
 0x259   : > { %2875 = vmatprep.subr.bf16.mxu1 %v4072_v9  ;;  %2979 = vmatpush1.bf16.msra.mxu0 %v5307_v14  ;;  %v4099_v10 = vld [vmem:[#allocation2 + $0x3a4] ss:$8 sps:$4 sm:$0xff]   ;;  %v5331_v13 = vld [vmem:[#allocation2 + $0x410] ss:$8 sps:$4 sm:$0xff]   ;;  %6038 = vst [vmem:[#allocation50_spill] sm:$0xff] %v5335_v15 }
 0x25a   : > { %2980 = vmatprep.subr.bf16.mxu0 %v5311_v8  ;;  %v5323_v42 = vld [vmem:[#allocation2 + $0x424] ss:$8 sps:$4 sm:$0xff]   ;;  %6037 = vst [vmem:[#allocation49_spill] sm:$0xff] %v5331_v13  ;;  %v4109_v30 = vld [vmem:[#allocation2 + $0x380] ss:$8 sps:$4 sm:$0xff]  }
 0x25b   : > { %3633 = vmatmul.mubr.msk.bf16.gmra.mxu1 %vm4752_vm6, %v3632_v40  ;;  %3657 = vmatmul.mubr.msk.bf16.gmra.mxu0 %vm4737_vm5, %v3656_v2  ;;  %6034 = vst [vmem:[#allocation46_spill] sm:$0xff] %v5323_v42  ;;  %v4097_v40 = vld [vmem:[#allocation2 + $0x3a0] ss:$8 sps:$4 sm:$0xff]  }
 0x25c   : > { %3006 = vmatprep.mubr.bf16.mxu0 %v6013_v11  ;;  %2876 = vmatpush1.bf16.msra.mxu1 %v4070_v33  ;;  %v5325_v2 = vld [vmem:[#allocation2 + $0x420] ss:$8 sps:$4 sm:$0xff]  }
 0x25d   : > { %2877 = vmatprep.subr.bf16.mxu1 %v4075_v28  ;;  %2981 = vmatpush1.bf16.msra.mxu0 %v5313_v26  ;;  %6035 = vst [vmem:[#allocation47_spill] sm:$0xff] %v5325_v2  ;;  %v5337_v32 = vld [vmem:[#allocation2 + $0x400] ss:$8 sps:$4 sm:$0xff]  }
 0x25e   : > { %2982 = vmatprep.subr.bf16.mxu0 %v5317_v19  ;;  %6039 = vst [vmem:[#allocation51_spill] sm:$0xff] %v5337_v32  ;;  %v3553_v9 = vld [vmem:[%s5907_s5 + $0x2] sm:$0x3] }
 0x25f   : > { %v6040_v33 = vld [vmem:[#allocation8_spill] sm:$0xff] }
 0x260   : > { %2878 = vmatpush2.bf16.msra.mxu1 %v4073_v63  ;;  %v5346_v28 = vrot.slane %v3553_v9, %v6040_v33 }
 0x261   : > { %2879 = vmatprep.subr.bf16.mxu1 %v4081_v56  ;;  %2983 = vmatpush1.bf16.msra.mxu0 %v5319_v55 }
 0x262   : > { %2984 = vmatprep.subr.bf16.mxu0 %v5323_v42 }
 0x264   : > { %2880 = vmatpush2.bf16.msra.mxu1 %v4079_v20 }
 0x265   : > { %2881 = vmatprep.subr.bf16.mxu1 %v4084_v27  ;;  %2985 = vmatpush1.bf16.msra.mxu0 %v5325_v2 }
 0x266   : > { %2986 = vmatprep.subr.bf16.mxu0 %v5329_v18 }
 0x268   : > { %2882 = vmatpush2.bf16.msra.mxu1 %v4082_v17 }
 0x269   : > { %2883 = vmatprep.subr.bf16.mxu1 %v4090_v12  ;;  %2987 = vmatpush1.bf16.msra.mxu0 %v5331_v13 }
 0x26a   : > { %2988 = vmatprep.subr.bf16.mxu0 %v5335_v15 }
 0x26c   : > { %2884 = vmatpush2.bf16.msra.mxu1 %v4088_v48 }
 0x26d   : > { %2885 = vmatprep.subr.bf16.mxu1 %v4093_v46  ;;  %2989 = vmatpush1.bf16.msra.mxu0 %v5337_v32 }
 0x270   : > { %2886 = vmatpush2.bf16.msra.mxu1 %v4091_v37 }
 0x271   : > { %2887 = vmatprep.subr.bf16.mxu1 %v4099_v10 }
 0x274   : > { %2888 = vmatpush2.bf16.msra.mxu1 %v4097_v40 }
 0x275   : > { %2889 = vmatprep.subr.bf16.mxu1 %v4105_v29 }
 0x278   : > { %2890 = vmatpush2.bf16.msra.mxu1 %v4103_v62 }
 0x279   : > { %2891 = vmatprep.subr.bf16.mxu1 %v4111_v60 }
 0x27c   : > { %2892 = vmatpush2.bf16.msra.mxu1 %v4109_v30 }
 0x27d   : > { %3805 = vmatprep.subr.bf16.mxu1 %v5293_v49 }
 0x2e0   : > { %v5348_v63 = vpop.f32.mrf.mxu1 }
 0x2e1   : > { %v5350_v56 = vpop.f32.mrf.mxu0 }
 0x2e2   : > { %v2073_v20 = vpop.f32.mrf.mxu1 }
 0x2e3   : > { %v2074_v27 = vadd.f32 %v2073_v20, %v5346_v28  ;;  %v2186_v17 = vpop.f32.mrf.mxu0 }
 0x2e4   : > { %v5353_v12 = vpop.f32.mrf.mxu1 }
 0x2e5   : > { %v2187_v48 = vadd.f32 %v2186_v17, %v2074_v27  ;;  %v5355_v46 = vpop.f32.mrf.mxu0 }
 0x2e6   : > { %v2077_v49 = vpop.f32.mrf.mxu1 }
 0x2e7   : > { %v3658_v37 = vmul.f32 -1.442695, %v2187_v48  ;;  %v2078_v10 = vadd.f32 %v2077_v49, %v5346_v28  ;;  %v2190_v40 = vpop.f32.mrf.mxu0 }
 0x2e9   : > { %4243 = vpow2.f32 %v3658_v37  ;;  %v2191_v29 = vadd.f32 %v2190_v40, %v2078_v10 }
 0x2ea   : > { %v5358_v62 = vpop.f32.mrf.mxu1  ;;  %v5360_v30 = vpop.f32.mrf.mxu0 }
 0x2eb   : > { %v3659_v60 = vmul.f32 -1.442695, %v2191_v29 }
 0x2ec   : > { %v2083_v33 = vpop.f32.mrf.mxu1  ;;  %v2196_v36 = vpop.f32.mrf.mxu0 }
 0x2ed   : > { %4245 = vpow2.f32 %v3659_v60  ;;  %v2084_v20 = vadd.f32 %v2083_v33, %v5346_v28 }
 0x2ee   : > { %v5363_v27 = vpop.f32.mrf.mxu1  ;;  %v5365_v58 = vpop.f32.mrf.mxu0 }
 0x2ef   : > { %v2197_v17 = vadd.f32 %v2196_v36, %v2084_v20 }
 0x2f0   : > { %v2087_v48 = vpop.f32.mrf.mxu1  ;;  %v2200_v10 = vpop.f32.mrf.mxu0 }
 0x2f1   : > { %v3660_v49 = vmul.f32 -1.442695, %v2197_v17  ;;  %v2088_v37 = vadd.f32 %v2087_v48, %v5346_v28 }
 0x2f3   : > { %4247 = vpow2.f32 %v3660_v49  ;;  %v2201_v40 = vadd.f32 %v2200_v10, %v2088_v37  ;;  %v5368_v29 = vpop.f32.mrf.mxu1  ;;  %v5370_v45 = vpop.f32.mrf.mxu0 }
 0x2f5   : > { %v3661_v60 = vmul.f32 -1.442695, %v2201_v40  ;;  %v2093_v41 = vpop.f32.mrf.mxu1  ;;  %v2206_v33 = vpop.f32.mrf.mxu0 }
 0x2f6   : > { %v4244_v7 = vpop.eup %4243  ;;  %v2094_v34 = vadd.f32 %v2093_v41, %v5346_v28  ;;  %v6041_v41 = vld [vmem:[#allocation9_spill] sm:$0xff] }
 0x2f7   : > { %v2311_v36 = vadd.f32 1.0, %v4244_v7  ;;  %4249 = vpow2.f32 %v3661_v60  ;;  %v5373_v20 = vpop.f32.mrf.mxu1  ;;  %v5375_v17 = vpop.f32.mrf.mxu0  ;;  %v5383_v60 = vrot.slane %v3553_v9, %v6041_v41 }
 0x2f8   : > { %v2207_v48 = vadd.f32 %v2206_v33, %v2094_v34 }
 0x2f9   : > { %4251 = vrcp.f32 %v2311_v36  ;;  %v2097_v49 = vpop.f32.mrf.mxu1  ;;  %v2210_v37 = vpop.f32.mrf.mxu0 }
 0x2fa   : > { %v4246_v10 = vpop.eup %4245  ;;  %v3662_v50 = vmul.f32 -1.442695, %v2207_v48  ;;  %v2098_v4 = vadd.f32 %v2097_v49, %v5346_v28 }
 0x2fb   : > { %v2312_v40 = vadd.f32 1.0, %v4246_v10  ;;  %v5378_v51 = vpop.f32.mrf.mxu1  ;;  %v5380_v23 = vpop.f32.mrf.mxu0 }
 0x2fc   : > { %4253 = vpow2.f32 %v3662_v50  ;;  %v2211_v7 = vadd.f32 %v2210_v37, %v2098_v4  ;;  %v2072_v50 = vadd.f32 %v5348_v63, %v5383_v60 }
 0x2fd   : > { %4255 = vrcp.f32 %v2312_v40  ;;  %v2103_v54 = vpop.f32.mrf.mxu1  ;;  %v2216_v34 = vpop.f32.mrf.mxu0 }
 0x2fe   : > { %v3663_v33 = vmul.f32 -1.442695, %v2211_v7  ;;  %v2104_v36 = vadd.f32 %v2103_v54, %v5346_v28 }
 0x2ff   : > { %v5386_v32 = vpop.f32.mrf.mxu1  ;;  %v5388_v48 = vpop.f32.mrf.mxu0 }
 0x300   : > { %v4248_v49 = vpop.eup %4247  ;;  %4257 = vpow2.f32 %v3663_v33  ;;  %v2217_v10 = vadd.f32 %v2216_v34, %v2104_v36  ;;  %v2185_v33 = vadd.f32 %v5350_v56, %v2072_v50  ;;  %v2076_v34 = vadd.f32 %v5353_v12, %v5383_v60 }
 0x301   : > { %v2313_v4 = vadd.f32 1.0, %v4248_v49  ;;  %v2107_v37 = vpop.f32.mrf.mxu1  ;;  %v2220_v9 = vpop.f32.mrf.mxu0 }
 0x302   : > { %v3664_v41 = vmul.f32 -1.442695, %v2217_v10  ;;  %v2108_v40 = vadd.f32 %v2107_v37, %v5346_v28  ;;  %v2189_v56 = vadd.f32 %v5355_v46, %v2076_v34  ;;  %v2086_v46 = vadd.f32 %v5363_v27, %v5383_v60 }
 0x303   : > { %4259 = vrcp.f32 %v2313_v4  ;;  %v5393_v7 = vpop.f32.mrf.mxu1  ;;  %v5395_v54 = vpop.f32.mrf.mxu0 }
 0x304   : > { %v4250_v15 = vpop.eup %4249  ;;  %4261 = vpow2.f32 %v3664_v41  ;;  %v2221_v6 = vadd.f32 %v2220_v9, %v2108_v40 }
 0x305   : > { %v2314_v63 = vadd.f32 1.0, %v4250_v15  ;;  %v2113_v36 = vpop.f32.mrf.mxu1  ;;  %v2226_v49 = vpop.f32.mrf.mxu0  ;;  %v6042_v15 = vld [vmem:[#allocation42_spill] sm:$0xff] }
 0x306   : > { %v4252_v39 = vpop.eup %4251  ;;  %v3665_v10 = vmul.f32 -1.442695, %v2221_v6  ;;  %v2114_v37 = vadd.f32 %v2113_v36, %v5346_v28 }
 0x307   : > { %4263 = vrcp.f32 %v2314_v63  ;;  %v5401_v4 = vpop.f32.mrf.mxu1  ;;  %v5403_v13 = vpop.f32.mrf.mxu0  ;;  %v2359_v16 = vmul.f32 %v4252_v39, %v2185_v33  ;;  %v2082_v63 = vadd.f32 %v5358_v62, %v5383_v60 }
 0x308   : > { %4265 = vpow2.f32 %v3665_v10  ;;  %v2227_v41 = vadd.f32 %v2226_v49, %v2114_v37 }
 0x309   : > { %v4254_v9 = vpop.eup %4253  ;;  %v2117_v50 = vpop.f32.mrf.mxu1  ;;  %v2375_v40 = vadd.f32 %v2359_v16, %v6042_v15 }
 0x30a   : > { %v2230_v12 = vpop.f32.mrf.mxu0  ;;  %v4256_v43 = vpop.eup %4255  ;;  %v2315_v18 = vadd.f32 1.0, %v4254_v9  ;;  %v3666_v6 = vmul.f32 -1.442695, %v2227_v41  ;;  %v2118_v36 = vadd.f32 %v2117_v50, %v5346_v28  ;;  %v6044_v41 = vld [vmem:[#allocation43_spill] sm:$0xff]  ;;  %v6045_v50 = vld [vmem:[#allocation10_spill] sm:$0xff] }
 0x30b   : > { %v5410_v2 = vpop.f32.mrf.mxu1  ;;  %v2360_v33 = vmul.f32 %v4256_v43, %v2189_v56  ;;  %v2391_v49 = vmul.f32 0.70710677, %v2375_v40  ;;  %v2195_v43 = vadd.f32 %v5360_v30, %v2082_v63  ;;  %v2199_v40 = vadd.f32 %v5365_v58, %v2086_v46 }
 0x30c   : > { %v5412_v39 = vpop.f32.mrf.mxu0  ;;  %4267 = vrcp.f32 %v2315_v18  ;;  %v2231_v34 = vadd.f32 %v2230_v12, %v2118_v36 }
 0x30d   : > { %6043 = vst [vmem:[#allocation42_spill] sm:$0xff] %v5412_v39  ;;  %v4258_v16 = vpop.eup %4257  ;;  %4269 = vpow2.f32 %v3666_v6  ;;  %v2123_v10 = vpop.f32.mrf.mxu1  ;;  %v2376_v9 = vadd.f32 %v2360_v33, %v6044_v41  ;;  %v5418_v15 = vmul.f32 %v2391_v49, %v6045_v50 }
 0x30e   : > { %v2236_v37 = vpop.f32.mrf.mxu0  ;;  %v2316_v62 = vadd.f32 1.0, %v4258_v16  ;;  %v3667_v42 = vmul.f32 -1.442695, %v2231_v34  ;;  %v2124_v39 = vadd.f32 %v2123_v10, %v5346_v28  ;;  %v6048_v16 = vld [vmem:[#allocation13_spill] sm:$0xff] }
 0x30f   : > { %6046 = vst [vmem:[#allocation43_spill] sm:$0xff] %v5418_v15  ;;  %v5422_v56 = vpop.f32.mrf.mxu1  ;;  %v2392_v18 = vmul.f32 0.70710677, %v2376_v9  ;;  %v2487_v10 = vrot.slane %v5418_v15, 1  ;;  %v2439_v9 = vrot.slane %v5418_v15, 7 }
 0x310   : > { %v5424_v27 = vpop.f32.mrf.mxu0  ;;  %v4260_v12 = vpop.eup %4259  ;;  %4271 = vrcp.f32 %v2316_v62  ;;  %v2237_v6 = vadd.f32 %v2236_v37, %v2124_v39 }
 0x311   : > { %6047 = vst [vmem:[#allocation10_spill] sm:$0xff] %v5424_v27  ;;  %v4262_v36 = vpop.eup %4261  ;;  %4273 = vpow2.f32 %v3667_v42  ;;  %v2127_v33 = vpop.f32.mrf.mxu1  ;;  %v5428_v34 = vmul.f32 %v2392_v18, %v6048_v16  ;;  %v2361_v30 = vmul.f32 %v4260_v12, %v2195_v43  ;;  %v2092_v43 = vadd.f32 %v5368_v29, %v5383_v60 }
 0x312   : > { %v2240_v49 = vpop.f32.mrf.mxu0  ;;  %v2317_v63 = vadd.f32 1.0, %v4262_v36  ;;  %v3668_v41 = vmul.f32 -1.442695, %v2237_v6  ;;  %v2128_v50 = vadd.f32 %v2127_v33, %v5346_v28 }
 0x313   : > { %6049 = vst [vmem:[#allocation13_spill] sm:$0xff] %v5428_v34  ;;  %v5433_v27 = vpop.f32.mrf.mxu1  ;;  %v2440_v42 = vrot.slane %v5428_v34, 7  ;;  %v2536_v39 = vpack.c.bf16 %v5428_v34, %v5418_v15  ;;  %v2488_v46 = vrot.slane %v5428_v34, 1  ;;  %v2377_v37 = vadd.f32 %v2361_v30, %v5114_v61 }
 0x314   : > { %v5435_v58 = vpop.f32.mrf.mxu0  ;;  %v4264_v62 = vpop.eup %4263  ;;  %4275 = vrcp.f32 %v2317_v63  ;;  %v2241_v18 = vadd.f32 %v2240_v49, %v2128_v50  ;;  %v2096_v34 = vadd.f32 %v5373_v20, %v5383_v60 }
 0x315   : > { %6050 = vst [vmem:[#allocation52_spill] sm:$0xff] %v5435_v58  ;;  %v4266_v12 = vpop.eup %4265  ;;  %4277 = vpow2.f32 %v3668_v41  ;;  %v2133_v6 = vpop.f32.mrf.mxu1  ;;  %2893 = vmatprep.mubr.bf16.mxu1 %v2536_v39  ;;  %v2441_v33 = vsel %vm791_vm1, %v2439_v9, %v2440_v42  ;;  %v2489_v16 = vsel %vm840_vm2, %v2487_v10, %v2488_v46  ;;  %v2362_v15 = vmul.f32 %v4264_v62, %v2199_v40 }
 0x316   : > { %v2246_v36 = vpop.f32.mrf.mxu0  ;;  %v2318_v61 = vadd.f32 1.0, %v4266_v12  ;;  %v3669_v30 = vmul.f32 -1.442695, %v2241_v18  ;;  %v2134_v58 = vadd.f32 %v2133_v6, %v5346_v28  ;;  %v3725_v63 = vpack.c.bf16 %v2441_v33, %v2439_v9 }
 0x317   : > { %v5449_v29 = vpop.f32.mrf.mxu1  ;;  %v3756_v41 = vpack.c.bf16 %v2488_v46, %v2489_v16  ;;  %v2378_v50 = vadd.f32 %v2362_v15, %v5117_v0  ;;  %v2393_v39 = vmul.f32 0.70710677, %v2377_v37  ;;  %v2205_v42 = vadd.f32 %v5370_v45, %v2092_v43 }
 0x318   : > { %v5451_v49 = vpop.f32.mrf.mxu0  ;;  %4279 = vrcp.f32 %v2318_v61  ;;  %v2247_v40 = vadd.f32 %v2246_v36, %v2134_v58  ;;  %3726 = vmatmul.mubr.msk.bf16.vlgmr.msra.gmra.mxu1 %vm4752_vm6, %v3725_v63  ;;  %v2209_v15 = vadd.f32 %v5375_v17, %v2096_v34  ;;  %v2102_v37 = vadd.f32 %v5378_v51, %v5383_v60 }
 0x319   : > { %v4268_v10 = vpop.eup %4267  ;;  %4281 = vpow2.f32 %v3669_v30  ;;  %v2137_v20 = vpop.f32.mrf.mxu1  ;;  %3757 = vmatmul.mubr.msk.bf16.vlgmr.msra.gmra.mxu0 %vm4737_vm5, %v3756_v41  ;;  %v2394_v18 = vmul.f32 0.70710677, %v2378_v50  ;;  %v5460_v9 = vmul.f32 %v2393_v39, %v4716_v35  ;;  %3813 = vmatpush1.bf16.msra.mxu1 %v5295_v25  ;;  %v6051_v35 = vld [vmem:[#allocation16_spill] sm:$0xff]  ;;  %v2106_v50 = vadd.f32 %v5386_v32, %v5383_v60 }
 0x31a   : > { %v2250_v62 = vpop.f32.mrf.mxu0  ;;  %v4270_v0 = vpop.eup %4269  ;;  %v3670_v45 = vmul.f32 -1.442695, %v2247_v40  ;;  %v2138_v58 = vadd.f32 %v2137_v20, %v5346_v28  ;;  %3016 = vmatprep.mubr.bf16.mxu0 %v6013_v11  ;;  %v2363_v46 = vmul.f32 %v4268_v10, %v2205_v42  ;;  %3806 = vmatprep.subr.bf16.mxu1 %v5299_v24  ;;  %v2215_v32 = vadd.f32 %v5380_v23, %v2102_v37 }
 0x31b   : > { %v2319_v43 = vadd.f32 1.0, %v4270_v0  ;;  %v5468_v12 = vpop.f32.mrf.mxu1  ;;  %v5473_v36 = vmul.f32 %v2394_v18, %v6051_v35  ;;  %v2442_v17 = vrot.slane %v5460_v9, 7  ;;  %v2490_v34 = vrot.slane %v5460_v9, 1 }
 0x31c   : > { %v5470_v6 = vpop.f32.mrf.mxu0  ;;  %4283 = vpow2.f32 %v3670_v45  ;;  %v2251_v25 = vadd.f32 %v2250_v62, %v2138_v58  ;;  %v2379_v33 = vadd.f32 %v2363_v46, %v5142_v57 }
 0x31d   : > { %v4272_v16 = vpop.eup %4271  ;;  %4285 = vrcp.f32 %v2319_v43  ;;  %v2143_v51 = vpop.f32.mrf.mxu1  ;;  %v2539_v30 = vpack.c.bf16 %v5473_v36, %v5460_v9  ;;  %v2443_v63 = vrot.slane %v5473_v36, 7  ;;  %v2491_v41 = vrot.slane %v5473_v36, 1  ;;  %3814 = vmatpush1.bf16.msra.mxu1 %v5301_v21 }
 0x31e   : > { %v2256_v61 = vpop.f32.mrf.mxu0  ;;  %v4274_v24 = vpop.eup %4273  ;;  %v3671_v39 = vmul.f32 -1.442695, %v2251_v25  ;;  %v2144_v42 = vadd.f32 %v2143_v51, %v5346_v28  ;;  %v2364_v57 = vmul.f32 %v4272_v16, %v2209_v15  ;;  %v2395_v0 = vmul.f32 0.70710677, %v2379_v33  ;;  %3807 = vmatprep.subr.bf16.mxu1 %v5305_v47 }
 0x31f   : > { %v2320_v40 = vadd.f32 1.0, %v4274_v24  ;;  %v5487_v10 = vpop.f32.mrf.mxu1  ;;  %2903 = vmatprep.mubr.bf16.mxu1 %v2539_v30  ;;  %v2444_v62 = vsel %vm791_vm1, %v2442_v17, %v2443_v63  ;;  %v2492_v18 = vsel %vm840_vm2, %v2490_v34, %v2491_v41  ;;  %v2219_v47 = vadd.f32 %v5388_v48, %v2106_v50 }
 0x320   : > { %v5489_v20 = vpop.f32.mrf.mxu0  ;;  %4287 = vpow2.f32 %v3671_v39  ;;  %v2257_v45 = vadd.f32 %v2256_v61, %v2144_v42  ;;  %v3729_v58 = vpack.c.bf16 %v2444_v62, %v2442_v17  ;;  %v3759_v46 = vpack.c.bf16 %v2491_v41, %v2492_v18 }
 0x321   : > { %v4276_v21 = vpop.eup %4275  ;;  %4289 = vrcp.f32 %v2320_v40  ;;  %v2147_v15 = vpop.f32.mrf.mxu1  ;;  %v2380_v43 = vadd.f32 %v2364_v57, %v5156_v22  ;;  %v5497_v35 = vmul.f32 %v2395_v0, %v4782_v44  ;;  %3815 = vmatpush1.bf16.msra.mxu1 %v5307_v14  ;;  %v2112_v44 = vadd.f32 %v5393_v7, %v5383_v60 }
 0x322   : > { %v4278_v25 = vpop.eup %4277  ;;  %v3672_v16 = vmul.f32 -1.442695, %v2257_v45  ;;  %v2148_v34 = vadd.f32 %v2147_v15, %v5346_v28  ;;  %3730 = vmatmul.mubr.msk.bf16.gmra.mxu1 %vm4752_vm6, %v3729_v58  ;;  %v2365_v23 = vmul.f32 %v4276_v21, %v2215_v32  ;;  %v2260_v17 = vpop.f32.mrf.mxu0  ;;  %3760 = vmatmul.mubr.msk.bf16.gmra.mxu0 %vm4737_vm5, %v3759_v46  ;;  %v2116_v39 = vadd.f32 %v5401_v4, %v5383_v60  ;;  %v6052_v15 = vld [vmem:[#allocation46_spill] sm:$0xff] }
 0x323   : > { %v2321_v37 = vadd.f32 1.0, %v4278_v25  ;;  %v2396_v33 = vmul.f32 0.70710677, %v2380_v43  ;;  %3026 = vmatprep.mubr.bf16.mxu0 %v6013_v11  ;;  %3808 = vmatprep.subr.bf16.mxu1 %v5311_v8  ;;  %v2445_v61 = vrot.slane %v5497_v35, 7  ;;  %v2493_v63 = vrot.slane %v5497_v35, 1 }
 0x324   : > { %4291 = vpow2.f32 %v3672_v16  ;;  %v2261_v22 = vadd.f32 %v2260_v17, %v2148_v34  ;;  %v2381_v28 = vadd.f32 %v2365_v23, %v5169_v38  ;;  %v2229_v58 = vadd.f32 %v5403_v13, %v2116_v39  ;;  %v6053_v23 = vld [vmem:[#allocation47_spill] sm:$0xff] }
 0x325   : > { %v4280_v48 = vpop.eup %4279  ;;  %4293 = vrcp.f32 %v2321_v37  ;;  %v5512_v51 = vmul.f32 %v2396_v33, %v4795_v1  ;;  %3816 = vmatpush1.bf16.msra.mxu1 %v5313_v26  ;;  %v2225_v1 = vadd.f32 %v5395_v54, %v2112_v44  ;;  %v6055_v33 = vld [vmem:[#allocation48_spill] sm:$0xff] }
 0x326   : > { %v4282_v30 = vpop.eup %4281  ;;  %v3673_v14 = vmul.f32 -1.442695, %v2261_v22  ;;  %v2366_v7 = vmul.f32 %v4280_v48, %v2219_v47  ;;  %v2397_v41 = vmul.f32 0.70710677, %v2381_v28  ;;  %3809 = vmatprep.subr.bf16.mxu1 %v5317_v19  ;;  %v6054_v47 = vld [vmem:[#allocation42_spill] sm:$0xff]  ;;  %v2126_v22 = vadd.f32 %v5422_v56, %v5383_v60 }
 0x327   : > { %v2322_v24 = vadd.f32 1.0, %v4282_v30  ;;  %v2542_v50 = vpack.c.bf16 %v5512_v51, %v5497_v35  ;;  %v2446_v38 = vrot.slane %v5512_v51, 7  ;;  %v2494_v8 = vrot.slane %v5512_v51, 1 }
 0x328   : > { %4295 = vpow2.f32 %v3673_v14  ;;  %v2382_v42 = vadd.f32 %v2366_v7, %v5181_v59  ;;  %v5529_v18 = vmul.f32 %v2397_v41, %v4819_v31  ;;  %v2122_v59 = vadd.f32 %v5410_v2, %v5383_v60  ;;  %v6057_v7 = vld [vmem:[#allocation22_spill] sm:$0xff] }
 0x329   : > { %v4284_v57 = vpop.eup %4283  ;;  %4297 = vrcp.f32 %v2322_v24  ;;  %2913 = vmatprep.mubr.bf16.mxu1 %v2542_v50  ;;  %v2447_v40 = vsel %vm791_vm1, %v2445_v61, %v2446_v38  ;;  %v2495_v62 = vsel %vm840_vm2, %v2493_v63, %v2494_v8  ;;  %3817 = vmatpush1.bf16.msra.mxu1 %v5319_v55  ;;  %v6058_v38 = vld [vmem:[#allocation49_spill] sm:$0xff] }
 0x32a   : > { %v4286_v26 = vpop.eup %4285  ;;  %v2323_v54 = vadd.f32 1.0, %v4284_v57  ;;  %v3733_v0 = vpack.c.bf16 %v2447_v40, %v2445_v61  ;;  %v3762_v32 = vpack.c.bf16 %v2494_v8, %v2495_v62  ;;  %v2398_v4 = vmul.f32 0.70710677, %v2382_v42  ;;  %3810 = vmatprep.subr.bf16.mxu1 %v6052_v15  ;;  %v6056_v61 = vld [vmem:[#allocation44_spill] sm:$0xff]  ;;  %v6061_v40 = vld [vmem:[#allocation29_spill] sm:$0xff] }
 0x32b   : > { %v2367_v45 = vmul.f32 %v4286_v26, %v2225_v1  ;;  %v2448_v55 = vrot.slane %v5529_v18, 7  ;;  %v2496_v21 = vrot.slane %v5529_v18, 1  ;;  %v2235_v37 = vadd.f32 %v6054_v47, %v2122_v59  ;;  %v6059_v1 = vld [vmem:[#allocation10_spill] sm:$0xff]  ;;  %v6060_v42 = vld [vmem:[#allocation24_spill] sm:$0xff] }
 0x32c   : > { %4299 = vrcp.f32 %v2323_v54  ;;  %3734 = vmatmul.mubr.msk.bf16.gmra.mxu1 %vm4752_vm6, %v3733_v0  ;;  %3763 = vmatmul.mubr.msk.bf16.gmra.mxu0 %vm4737_vm5, %v3762_v32  ;;  %v5539_v31 = vmul.f32 %v2398_v4, %v4832_v52  ;;  %v2132_v8 = vadd.f32 %v5433_v27, %v5383_v60  ;;  %v2239_v39 = vadd.f32 %v6059_v1, %v2126_v22  ;;  %v6062_v26 = vld [vmem:[#allocation50_spill] sm:$0xff] }
 0x32d   : > { %v4288_v19 = vpop.eup %4287  ;;  %3036 = vmatprep.mubr.bf16.mxu0 %v6013_v11  ;;  %v2383_v2 = vadd.f32 %v2367_v45, %v5192_v5  ;;  %3818 = vmatpush1.bf16.msra.mxu1 %v6053_v23  ;;  %v6066_v23 = vld [vmem:[#allocation26_spill] sm:$0xff]  ;;  %v2142_v22 = vadd.f32 %v5468_v12, %v5383_v60  ;;  %v2146_v12 = vadd.f32 %v5487_v10, %v5383_v60 }
 0x32e   : > { %v4290_v46 = vpop.eup %4289  ;;  %v2324_v43 = vadd.f32 1.0, %v4288_v19  ;;  %v2545_v25 = vpack.c.bf16 %v5539_v31, %v5529_v18  ;;  %v2449_v52 = vrot.slane %v5539_v31, 7  ;;  %v2497_v16 = vrot.slane %v5539_v31, 1  ;;  %3811 = vmatprep.subr.bf16.mxu1 %v6055_v33 }
 0x32f   : > { %v2368_v13 = vmul.f32 %v4290_v46, %v2229_v58  ;;  %v2399_v34 = vmul.f32 0.70710677, %v2383_v2  ;;  %v6063_v58 = vld [vmem:[#allocation51_spill] sm:$0xff]  ;;  %v2136_v2 = vadd.f32 %v5449_v29, %v5383_v60  ;;  %v6067_v29 = vld [vmem:[#allocation32_spill] sm:$0xff]  ;;  %v6071_v60 = vld [vmem:[#allocation34_spill] sm:$0xff] }
 0x330   : > { %4301 = vrcp.f32 %v2324_v43  ;;  %2923 = vmatprep.mubr.bf16.mxu1 %v2545_v25  ;;  %v2450_v5 = vsel %vm791_vm1, %v2448_v55, %v2449_v52  ;;  %v2498_v17 = vsel %vm840_vm2, %v2496_v21, %v2497_v16  ;;  %v6065_v52 = vld [vmem:[#allocation45_spill] sm:$0xff] }
 0x331   : > { %v4292_v44 = vpop.eup %4291  ;;  %v3737_v28 = vpack.c.bf16 %v2450_v5, %v2448_v55  ;;  %v3765_v48 = vpack.c.bf16 %v2497_v16, %v2498_v17  ;;  %v2384_v30 = vadd.f32 %v2368_v13, %v6056_v61  ;;  %v5560_v41 = vmul.f32 %v2399_v34, %v6057_v7  ;;  %3819 = vmatpush1.bf16.msra.mxu1 %v6058_v38  ;;  %v6064_v55 = vld [vmem:[#allocation52_spill] sm:$0xff] }
 0x332   : > { %v4294_v14 = vpop.eup %4293  ;;  %v2325_v63 = vadd.f32 1.0, %v4292_v44  ;;  %3812 = vmatprep.subr.bf16.mxu1 %v6062_v26  ;;  %v2245_v21 = vadd.f32 %v6064_v55, %v2132_v8  ;;  %v2249_v17 = vadd.f32 %v5451_v49, %v2136_v2 }
 0x333   : > { %v2400_v24 = vmul.f32 0.70710677, %v2384_v30  ;;  %v2369_v50 = vmul.f32 %v4294_v14, %v2235_v37  ;;  %v2451_v0 = vrot.slane %v5560_v41, 7  ;;  %v2499_v32 = vrot.slane %v5560_v41, 1 }
 0x334   : > { %4303 = vrcp.f32 %v2325_v63  ;;  %3738 = vmatmul.mubr.msk.bf16.gmra.mxu1 %vm4752_vm6, %v3737_v28  ;;  %3766 = vmatmul.mubr.msk.bf16.gmra.mxu0 %vm4737_vm5, %v3765_v48  ;;  %v6068_v28 = vld [vmem:[#allocation28_spill] sm:$0xff] }
 0x335   : > { %v4296_v56 = vpop.eup %4295  ;;  %v5571_v57 = vmul.f32 %v2400_v24, %v6060_v42  ;;  %3046 = vmatprep.mubr.bf16.mxu0 %v6013_v11  ;;  %v2385_v62 = vadd.f32 %v2369_v50, %v6061_v40  ;;  %3820 = vmatpush1.bf16.msra.mxu1 %v6063_v58  ;;  %v6069_v50 = vld [vmem:[#allocation35_spill] sm:$0xff] }
 0x336   : > { %v4298_v27 = vpop.eup %4297  ;;  %v2326_v54 = vadd.f32 1.0, %v4296_v56  ;;  %v2255_v56 = vadd.f32 %v5470_v6, %v2142_v22  ;;  %v6070_v42 = vld [vmem:[#allocation31_spill] sm:$0xff] }
 0x337   : > { %v2548_v4 = vpack.c.bf16 %v5571_v57, %v5560_v41  ;;  %v2452_v45 = vrot.slane %v5571_v57, 7  ;;  %v2500_v59 = vrot.slane %v5571_v57, 1  ;;  %v2370_v19 = vmul.f32 %v4298_v27, %v2239_v39 }
 0x338   : > { %4305 = vrcp.f32 %v2326_v54  ;;  %v2401_v15 = vmul.f32 0.70710677, %v2385_v62 }
 0x339   : > { %v4300_v46 = vpop.eup %4299  ;;  %2933 = vmatprep.mubr.bf16.mxu1 %v2548_v4  ;;  %v2453_v43 = vsel %vm791_vm1, %v2451_v0, %v2452_v45  ;;  %v2501_v25 = vsel %vm840_vm2, %v2499_v32, %v2500_v59  ;;  %v2386_v16 = vadd.f32 %v2370_v19, %v6065_v52  ;;  %v6072_v45 = vld [vmem:[#allocation38_spill] sm:$0xff] }
 0x33a   : > { %v3741_v13 = vpack.c.bf16 %v2453_v43, %v2451_v0  ;;  %v3768_v34 = vpack.c.bf16 %v2500_v59, %v2501_v25  ;;  %v5590_v47 = vmul.f32 %v2401_v15, %v6066_v23  ;;  %v2371_v37 = vmul.f32 %v4300_v46, %v2245_v21  ;;  %v6073_v46 = vld [vmem:[#allocation41_spill] sm:$0xff]  ;;  %v6075_v23 = vld [vmem:[#allocation40_spill] sm:$0xff] }
 0x33b   : > { %v2402_v5 = vmul.f32 0.70710677, %v2386_v16  ;;  %v2259_v0 = vadd.f32 %v5489_v20, %v2146_v12 }
 0x33c   : > { %3742 = vmatmul.mubr.msk.bf16.gmra.mxu1 %vm4752_vm6, %v3741_v13  ;;  %3769 = vmatmul.mubr.msk.bf16.gmra.mxu0 %vm4737_vm5, %v3768_v34  ;;  %v2387_v33 = vadd.f32 %v2371_v37, %v6067_v29  ;;  %v2454_v61 = vrot.slane %v5590_v47, 7  ;;  %v2502_v7 = vrot.slane %v5590_v47, 1  ;;  %v6074_v13 = vld [vmem:[#allocation37_spill] sm:$0xff] }
 0x33d   : > { %v4302_v44 = vpop.eup %4301  ;;  %v5601_v48 = vmul.f32 %v2402_v5, %v6068_v28  ;;  %3056 = vmatprep.mubr.bf16.mxu0 %v6013_v11 }
 0x33e   : > { %v2372_v49 = vmul.f32 %v4302_v44, %v2249_v17  ;;  %v2403_v30 = vmul.f32 0.70710677, %v2387_v33 }
 0x33f   : > { %v2551_v14 = vpack.c.bf16 %v5601_v48, %v5590_v47  ;;  %v2455_v63 = vrot.slane %v5601_v48, 7  ;;  %v2503_v24 = vrot.slane %v5601_v48, 1 }
 0x340   : > { %v2388_v38 = vadd.f32 %v2372_v49, %v6069_v50  ;;  %v5617_v40 = vmul.f32 %v2403_v30, %v6070_v42  ;;  %v3674_v30 = vld [vmem:[%s5907_s5 + $0x4] sm:$0x3] }
 0x341   : > { %v4304_v8 = vpop.eup %4303  ;;  %2943 = vmatprep.mubr.bf16.mxu1 %v2551_v14  ;;  %v2456_v1 = vsel %vm791_vm1, %v2454_v61, %v2455_v63  ;;  %v2504_v39 = vsel %vm840_vm2, %v2502_v7, %v2503_v24  ;;  %v6076_v14 = vld [vmem:[#allocation8_spill] sm:$0xff] }
 0x342   : > { %v3745_v62 = vpack.c.bf16 %v2456_v1, %v2454_v61  ;;  %v3771_v26 = vpack.c.bf16 %v2503_v24, %v2504_v39  ;;  %v2404_v27 = vmul.f32 0.70710677, %v2388_v38  ;;  %v2373_v54 = vmul.f32 %v4304_v8, %v2255_v56 }
 0x343   : > { %v2457_v32 = vrot.slane %v5617_v40, 7  ;;  %v2505_v4 = vrot.slane %v5617_v40, 1  ;;  %v5665_v63 = vrot.slane %v3674_v30, %v6076_v14  ;;  %v6077_v14 = vld [vmem:[#allocation9_spill] sm:$0xff] }
 0x344   : > { %3746 = vmatmul.mubr.msk.bf16.gmra.mxu1 %vm4752_vm6, %v3745_v62  ;;  %3772 = vmatmul.mubr.msk.bf16.gmra.mxu0 %vm4737_vm5, %v3771_v26  ;;  %v5625_v6 = vmul.f32 %v2404_v27, %v6071_v60  ;;  %v2389_v59 = vadd.f32 %v2373_v54, %v6072_v45 }
 0x345   : > { %v4306_v10 = vpop.eup %4305  ;;  %3066 = vmatprep.mubr.bf16.mxu0 %v6013_v11 }
 0x346   : > { %v2554_v20 = vpack.c.bf16 %v5625_v6, %v5617_v40  ;;  %v2458_v19 = vrot.slane %v5625_v6, 7  ;;  %v2506_v58 = vrot.slane %v5625_v6, 1  ;;  %v2374_v55 = vmul.f32 %v4306_v10, %v2259_v0 }
 0x347   : > { %v2405_v21 = vmul.f32 0.70710677, %v2389_v59 }
 0x348   : > { %2953 = vmatprep.mubr.bf16.mxu1 %v2554_v20  ;;  %v2459_v2 = vsel %vm791_vm1, %v2457_v32, %v2458_v19  ;;  %v2507_v15 = vsel %vm840_vm2, %v2505_v4, %v2506_v58  ;;  %v2390_v43 = vadd.f32 %v2374_v55, %v6073_v46 }
 0x349   : > { %v3749_v25 = vpack.c.bf16 %v2459_v2, %v2457_v32  ;;  %v3774_v52 = vpack.c.bf16 %v2506_v58, %v2507_v15  ;;  %v5639_v34 = vmul.f32 %v2405_v21, %v6074_v13 }
 0x34a   : > { %v2406_v16 = vmul.f32 0.70710677, %v2390_v43 }
 0x34b   : > { %v2460_v17 = vrot.slane %v5639_v34, 7  ;;  %v2508_v28 = vrot.slane %v5639_v34, 1 }
 0x34c   : > { %3750 = vmatmul.mubr.msk.bf16.gmra.mxu1 %vm4752_vm6, %v3749_v25  ;;  %3775 = vmatmul.mubr.msk.bf16.gmra.mxu0 %vm4737_vm5, %v3774_v52  ;;  %v5646_v37 = vmul.f32 %v2406_v16, %v6075_v23 }
 0x34e   : > { %v2557_v5 = vpack.c.bf16 %v5646_v37, %v5639_v34  ;;  %v2461_v29 = vrot.slane %v5646_v37, 7  ;;  %v2509_v22 = vrot.slane %v5646_v37, 1 }
 0x350   : > { %2963 = vmatprep.mubr.bf16.mxu1 %v2557_v5  ;;  %v2462_v33 = vsel %vm791_vm1, %v2460_v17, %v2461_v29  ;;  %v2510_v61 = vsel %vm840_vm2, %v2508_v28, %v2509_v22 }
 0x351   : > { %v3753_v44 = vpack.c.bf16 %v2462_v33, %v2460_v17  ;;  %v3777_v49 = vpack.c.bf16 %v2509_v22, %v2510_v61 }
 0x354   : > { %3754 = vmatmul.mubr.msk.bf16.gmra.mxu1 %vm4752_vm6, %v3753_v44 }
 0x355   : > { %3076 = vmatprep.mubr.bf16.mxu1 %v6013_v11 }
 0x35c   : > { %3778 = vmatmul.mubr.msk.bf16.vlgmr.msra.gmra.mxu1 %vm4737_vm5, %v3777_v49 }
 0x3d8   : > { %v5667_v7 = vpop.f32.mrf.mxu1 }
 0x3d9   : > { %v5669_v3 = vpop.f32.mrf.mxu0 }
 0x3da   : > { %v2897_v24 = vpop.f32.mrf.mxu1 }
 0x3db   : > { %v3010_v12 = vpop.f32.mrf.mxu0  ;;  %v2898_v11 = vadd.f32 %v2897_v24, %v5665_v63  ;;  %v5702_v24 = vrot.slane %v3674_v30, %v6077_v14 }
 0x3dc   : > { %v5672_v50 = vpop.f32.mrf.mxu1 }
 0x3dd   : > { %v5674_v38 = vpop.f32.mrf.mxu0  ;;  %v3011_v53 = vadd.f32 %v3010_v12, %v2898_v11 }
 0x3de   : > { %v2901_v8 = vpop.f32.mrf.mxu1 }
 0x3df   : > { %v3014_v56 = vpop.f32.mrf.mxu0  ;;  %v3779_v1 = vmul.f32 -1.442695, %v3011_v53  ;;  %v2902_v39 = vadd.f32 %v2901_v8, %v5665_v63 }
 0x3e1   : > { %4307 = vpow2.f32 %v3779_v1  ;;  %v3015_v42 = vadd.f32 %v3014_v56, %v2902_v39 }
 0x3e2   : > { %v5677_v62 = vpop.f32.mrf.mxu1  ;;  %v5679_v26 = vpop.f32.mrf.mxu0 }
 0x3e3   : > { %v3780_v27 = vmul.f32 -1.442695, %v3015_v42 }
 0x3e4   : > { %v2907_v54 = vpop.f32.mrf.mxu1  ;;  %v3020_v60 = vpop.f32.mrf.mxu0 }
 0x3e5   : > { %v2908_v0 = vadd.f32 %v2907_v54, %v5665_v63  ;;  %4309 = vpow2.f32 %v3780_v27  ;;  %v2896_v54 = vadd.f32 %v5667_v7, %v5702_v24  ;;  %v2900_v7 = vadd.f32 %v5672_v50, %v5702_v24 }
 0x3e6   : > { %v5682_v10 = vpop.f32.mrf.mxu1  ;;  %v5684_v4 = vpop.f32.mrf.mxu0 }
 0x3e7   : > { %v3021_v32 = vadd.f32 %v3020_v60, %v2908_v0  ;;  %v3013_v50 = vadd.f32 %v5674_v38, %v2900_v7 }
 0x3e8   : > { %v2911_v45 = vpop.f32.mrf.mxu1  ;;  %v3024_v19 = vpop.f32.mrf.mxu0 }
 0x3e9   : > { %v3781_v59 = vmul.f32 -1.442695, %v3021_v32  ;;  %v2912_v20 = vadd.f32 %v2911_v45, %v5665_v63 }
 0x3eb   : > { %4311 = vpow2.f32 %v3781_v59  ;;  %v3025_v58 = vadd.f32 %v3024_v19, %v2912_v20 }
 0x3ec   : > { %v5687_v55 = vpop.f32.mrf.mxu1  ;;  %v5689_v21 = vpop.f32.mrf.mxu0 }
 0x3ed   : > { %v3782_v2 = vmul.f32 -1.442695, %v3025_v58 }
 0x3ee   : > { %v2917_v15 = vpop.f32.mrf.mxu1  ;;  %v3030_v46 = vpop.f32.mrf.mxu0 }
 0x3ef   : > { %v4308_v43 = vpop.eup %4307  ;;  %4313 = vpow2.f32 %v3782_v2  ;;  %v2918_v25 = vadd.f32 %v2917_v15, %v5665_v63  ;;  %v3009_v2 = vadd.f32 %v5669_v3, %v2896_v54 }
 0x3f0   : > { %v3135_v52 = vadd.f32 1.0, %v4308_v43  ;;  %v5692_v16 = vpop.f32.mrf.mxu1  ;;  %v5694_v13 = vpop.f32.mrf.mxu0 }
 0x3f1   : > { %v3031_v23 = vadd.f32 %v3030_v46, %v2918_v25 }
 0x3f2   : > { %4315 = vrcp.f32 %v3135_v52  ;;  %v2921_v5 = vpop.f32.mrf.mxu1  ;;  %v3034_v17 = vpop.f32.mrf.mxu0 }
 0x3f3   : > { %v4310_v29 = vpop.eup %4309  ;;  %v3783_v33 = vmul.f32 -1.442695, %v3031_v23  ;;  %v2922_v44 = vadd.f32 %v2921_v5, %v5665_v63 }
 0x3f4   : > { %v3136_v22 = vadd.f32 1.0, %v4310_v29  ;;  %v5697_v28 = vpop.f32.mrf.mxu1  ;;  %v5699_v61 = vpop.f32.mrf.mxu0 }
 0x3f5   : > { %4317 = vpow2.f32 %v3783_v33  ;;  %v3035_v49 = vadd.f32 %v3034_v17, %v2922_v44  ;;  %v6078_v33 = vld [vmem:[#allocation43_spill] sm:$0xff] }
 0x3f6   : > { %4319 = vrcp.f32 %v3136_v22  ;;  %v2927_v12 = vpop.f32.mrf.mxu1  ;;  %v3040_v11 = vpop.f32.mrf.mxu0  ;;  %v2906_v22 = vadd.f32 %v5677_v62, %v5702_v24 }
 0x3f7   : > { %v3784_v53 = vmul.f32 -1.442695, %v3035_v49  ;;  %v2928_v8 = vadd.f32 %v2927_v12, %v5665_v63 }
 0x3f8   : > { %v4312_v56 = vpop.eup %4311  ;;  %v5705_v1 = vpop.f32.mrf.mxu1 }
 0x3f9   : > { %v5707_v39 = vpop.f32.mrf.mxu0  ;;  %v3137_v42 = vadd.f32 1.0, %v4312_v56  ;;  %4321 = vpow2.f32 %v3784_v53  ;;  %v3041_v27 = vadd.f32 %v3040_v11, %v2928_v8 }
 0x3fa   : > { %v2931_v0 = vpop.f32.mrf.mxu1 }
 0x3fb   : > { %v3044_v30 = vpop.f32.mrf.mxu0  ;;  %4323 = vrcp.f32 %v3137_v42  ;;  %v3785_v60 = vmul.f32 -1.442695, %v3041_v27  ;;  %v2932_v32 = vadd.f32 %v2931_v0, %v5665_v63 }
 0x3fc   : > { %v4314_v45 = vpop.eup %4313  ;;  %v5712_v59 = vpop.f32.mrf.mxu1 }
 0x3fd   : > { %v5714_v20 = vpop.f32.mrf.mxu0  ;;  %v3138_v19 = vadd.f32 1.0, %v4314_v45  ;;  %4325 = vpow2.f32 %v3785_v60  ;;  %v3045_v58 = vadd.f32 %v3044_v30, %v2932_v32  ;;  %v6079_v30 = vld [vmem:[#allocation11_spill] sm:$0xff]  ;;  %v6080_v60 = vld [vmem:[#allocation13_spill] sm:$0xff]  ;;  %v3019_v45 = vadd.f32 %v5679_v26, %v2906_v22 }
 0x3fe   : > { %v2937_v15 = vpop.f32.mrf.mxu1 }
 0x3ff   : > { %v3050_v46 = vpop.f32.mrf.mxu0  ;;  %v4316_v43 = vpop.eup %4315  ;;  %4327 = vrcp.f32 %v3138_v19  ;;  %v3786_v25 = vmul.f32 -1.442695, %v3045_v58  ;;  %v2938_v52 = vadd.f32 %v2937_v15, %v5665_v63 }
 0x400   : > { %v3183_v23 = vmul.f32 %v4316_v43, %v3009_v2  ;;  %v5720_v5 = vpop.f32.mrf.mxu1  ;;  %v2910_v2 = vadd.f32 %v5682_v10, %v5702_v24  ;;  %v6081_v10 = vld [vmem:[#allocation12_spill] sm:$0xff] }
 0x401   : > { %v5722_v17 = vpop.f32.mrf.mxu0  ;;  %4329 = vpow2.f32 %v3786_v25  ;;  %v3051_v29 = vadd.f32 %v3050_v46, %v2938_v52 }
 0x402   : > { %v4318_v3 = vpop.eup %4317  ;;  %v3199_v44 = vadd.f32 %v3183_v23, %v6078_v33  ;;  %v2941_v49 = vpop.f32.mrf.mxu1 }
 0x403   : > { %v3054_v14 = vpop.f32.mrf.mxu0  ;;  %v4320_v12 = vpop.eup %4319  ;;  %v3139_v11 = vadd.f32 1.0, %v4318_v3  ;;  %v3787_v53 = vmul.f32 -1.442695, %v3051_v29  ;;  %v2942_v8 = vadd.f32 %v2941_v49, %v5665_v63 }
 0x404   : > { %v3215_v56 = vmul.f32 0.70710677, %v3199_v44  ;;  %v3184_v42 = vmul.f32 %v4320_v12, %v3013_v50  ;;  %v5732_v27 = vpop.f32.mrf.mxu1 }
 0x405   : > { %v5734_v54 = vpop.f32.mrf.mxu0  ;;  %4331 = vrcp.f32 %v3139_v11  ;;  %v3055_v38 = vadd.f32 %v3054_v14, %v2942_v8  ;;  %v3023_v14 = vadd.f32 %v5684_v4, %v2910_v2 }
 0x406   : > { %v4322_v0 = vpop.eup %4321  ;;  %v3231_v62 = vadd.f32 %v3215_v56, %v6079_v30  ;;  %v3200_v32 = vadd.f32 %v3184_v42, %v6080_v60  ;;  %4333 = vpow2.f32 %v3787_v53  ;;  %v2947_v19 = vpop.f32.mrf.mxu1  ;;  %v2916_v56 = vadd.f32 %v5687_v55, %v5702_v24 }
 0x407   : > { %v3060_v58 = vpop.f32.mrf.mxu0  ;;  %v3140_v7 = vadd.f32 1.0, %v4322_v0  ;;  %v3788_v15 = vmul.f32 -1.442695, %v3055_v38  ;;  %v2948_v46 = vadd.f32 %v2947_v19, %v5665_v63 }
 0x408   : > { %v4324_v43 = vpop.eup %4323  ;;  %v3247_v25 = vmul.f32 0.70710677, %v3231_v62  ;;  %v3216_v52 = vmul.f32 0.70710677, %v3200_v32  ;;  %v5742_v23 = vpop.f32.mrf.mxu1  ;;  %v3029_v2 = vadd.f32 %v5689_v21, %v2916_v56  ;;  %v6083_v21 = vld [vmem:[#allocation15_spill] sm:$0xff] }
 0x409   : > { %v5744_v29 = vpop.f32.mrf.mxu0  ;;  %v3185_v3 = vmul.f32 %v4324_v43, %v3019_v45  ;;  %4335 = vrcp.f32 %v3140_v7  ;;  %v3061_v26 = vadd.f32 %v3060_v58, %v2948_v46  ;;  %v6082_v45 = vld [vmem:[#allocation14_spill] sm:$0xff] }
 0x40a   : > { %v4326_v33 = vpop.eup %4325  ;;  %3263 = vst [vmem:[%s5746_s9] sm:$0xff] %v3247_v25  ;;  %v3232_v44 = vadd.f32 %v3216_v52, %v6081_v10  ;;  %4337 = vpow2.f32 %v3788_v15  ;;  %v2951_v50 = vpop.f32.mrf.mxu1 }
 0x40b   : > { %v3064_v22 = vpop.f32.mrf.mxu0  ;;  %v3201_v49 = vadd.f32 %v3185_v3, %v5460_v9  ;;  %v3141_v12 = vadd.f32 1.0, %v4326_v33  ;;  %v3789_v11 = vmul.f32 -1.442695, %v3061_v26  ;;  %v2952_v42 = vadd.f32 %v2951_v50, %v5665_v63 }
 0x40c   : > { %v4328_v53 = vpop.eup %4327  ;;  %v3248_v8 = vmul.f32 0.70710677, %v3232_v44  ;;  %v5755_v38 = vpop.f32.mrf.mxu1  ;;  %v2920_v3 = vadd.f32 %v5692_v16, %v5702_v24 }
 0x40d   : > { %v5757_v0 = vpop.f32.mrf.mxu0  ;;  %v3217_v30 = vmul.f32 0.70710677, %v3201_v49  ;;  %v3186_v62 = vmul.f32 %v4328_v53, %v3023_v14  ;;  %4339 = vrcp.f32 %v3141_v12  ;;  %v3065_v9 = vadd.f32 %v3064_v22, %v2952_v42 }
 0x40e   : > { %v4330_v60 = vpop.eup %4329  ;;  %3264 = vst [vmem:[%s5746_s9 + $0x8] sm:$0xff] %v3248_v8  ;;  %4341 = vpow2.f32 %v3789_v11  ;;  %v2957_v4 = vpop.f32.mrf.mxu1  ;;  %v2926_v49 = vadd.f32 %v5697_v28, %v5702_v24  ;;  %v3033_v56 = vadd.f32 %v5694_v13, %v2920_v3 }
 0x40f   : > { %v3070_v32 = vpop.f32.mrf.mxu0  ;;  %v3233_v19 = vadd.f32 %v3217_v30, %v6082_v45  ;;  %v3202_v58 = vadd.f32 %v3186_v62, %v5473_v36  ;;  %v3142_v55 = vadd.f32 1.0, %v4330_v60  ;;  %v3790_v7 = vmul.f32 -1.442695, %v3065_v9 }
 0x410   : > { %v2958_v15 = vadd.f32 %v2957_v4, %v5665_v63  ;;  %v5764_v46 = vpop.f32.mrf.mxu1 }
 0x411   : > { %v5766_v43 = vpop.f32.mrf.mxu0  ;;  %v3249_v25 = vmul.f32 0.70710677, %v3233_v19  ;;  %v3218_v52 = vmul.f32 0.70710677, %v3202_v58  ;;  %4343 = vrcp.f32 %v3142_v55  ;;  %v6084_v58 = vld [vmem:[#allocation17_spill] sm:$0xff]  ;;  %v2930_v55 = vadd.f32 %v5705_v1, %v5702_v24 }
 0x412   : > { %v4332_v26 = vpop.eup %4331  ;;  %4345 = vpow2.f32 %v3790_v7  ;;  %v3071_v36 = vadd.f32 %v3070_v32, %v2958_v15  ;;  %v2961_v33 = vpop.f32.mrf.mxu1  ;;  %v3039_v32 = vadd.f32 %v5699_v61, %v2926_v49 }
 0x413   : > { %v4334_v10 = vpop.eup %4333  ;;  %3265 = vst [vmem:[%s5746_s9 + $0x10] sm:$0xff] %v3249_v25  ;;  %v3234_v44 = vadd.f32 %v3218_v52, %v6083_v21  ;;  %v3187_v50 = vmul.f32 %v4332_v26, %v3029_v2  ;;  %v2962_v22 = vadd.f32 %v2961_v33, %v5665_v63  ;;  %v3074_v11 = vpop.f32.mrf.mxu0 }
 0x414   : > { %v3143_v14 = vadd.f32 1.0, %v4334_v10  ;;  %v3791_v12 = vmul.f32 -1.442695, %v3071_v36  ;;  %v5775_v16 = vpop.f32.mrf.mxu1  ;;  %v6085_v36 = vld [vmem:[#allocation18_spill] sm:$0xff]  ;;  %v3043_v10 = vadd.f32 %v5707_v39, %v2930_v55 }
 0x415   : > { %v3250_v53 = vmul.f32 0.70710677, %v3234_v44  ;;  %v3203_v8 = vadd.f32 %v3187_v50, %v5497_v35  ;;  %v3075_v42 = vadd.f32 %v3074_v11, %v2962_v22  ;;  %v2936_v44 = vadd.f32 %v5712_v59, %v5702_v24 }
 0x416   : > { %v4336_v30 = vpop.eup %4335  ;;  %4347 = vrcp.f32 %v3143_v14  ;;  %v2967_v62 = vpop.f32.mrf.mxu1 }
 0x417   : > { %v4338_v60 = vpop.eup %4337  ;;  %3266 = vst [vmem:[%s5746_s9 + $0x18] sm:$0xff] %v3250_v53  ;;  %v3219_v9 = vmul.f32 0.70710677, %v3203_v8  ;;  %v3188_v4 = vmul.f32 %v4336_v30, %v3033_v56  ;;  %4349 = vpow2.f32 %v3791_v12  ;;  %v3792_v28 = vmul.f32 -1.442695, %v3075_v42 }
 0x418   : > { %v3144_v45 = vadd.f32 1.0, %v4338_v60  ;;  %v5781_v19 = vpop.f32.mrf.mxu1  ;;  %v2968_v1 = vadd.f32 %v2967_v62, %v5665_v63  ;;  %v3049_v59 = vadd.f32 %v5714_v20, %v2936_v44  ;;  %v2940_v62 = vadd.f32 %v5720_v5, %v5702_v24 }
 0x419   : > { %v3235_v35 = vadd.f32 %v3219_v9, %v6084_v58  ;;  %v3204_v13 = vadd.f32 %v3188_v4, %v5512_v51  ;;  %4351 = vpow2.f32 %v3792_v28 }
 0x41a   : > { %v4340_v2 = vpop.eup %4339  ;;  %4353 = vrcp.f32 %v3144_v45  ;;  %v2971_v7 = vpop.f32.mrf.mxu1  ;;  %v3053_v5 = vadd.f32 %v5722_v17, %v2940_v62  ;;  %v2950_v17 = vadd.f32 %v5742_v23, %v5702_v24 }
 0x41b   : > { %v4342_v15 = vpop.eup %4341  ;;  %v3251_v25 = vmul.f32 0.70710677, %v3235_v35  ;;  %v3220_v52 = vmul.f32 0.70710677, %v3204_v13  ;;  %v3189_v3 = vmul.f32 %v4340_v2, %v3039_v32  ;;  %v2972_v42 = vadd.f32 %v2971_v7, %v5665_v63 }
 0x41c   : > { %v3145_v61 = vadd.f32 1.0, %v4342_v15  ;;  %v5787_v26 = vpop.f32.mrf.mxu1  ;;  %v2946_v2 = vadd.f32 %v5732_v27, %v5702_v24 }
 0x41d   : > { %3267 = vst [vmem:[%s5746_s9 + $0x20] sm:$0xff] %v3251_v25  ;;  %v3236_v33 = vadd.f32 %v3220_v52, %v6085_v36  ;;  %v3205_v51 = vadd.f32 %v3189_v3, %v5529_v18  ;;  %v6086_v18 = vld [vmem:[#allocation19_spill] sm:$0xff] }
 0x41e   : > { %v4344_v21 = vpop.eup %4343  ;;  %4355 = vrcp.f32 %v3145_v61  ;;  %v3080_v50 = vpop.f32.mrf.mxu1  ;;  %v6088_v61 = vld [vmem:[#allocation21_spill] sm:$0xff] }
 0x41f   : > { %v4346_v22 = vpop.eup %4345  ;;  %v3252_v49 = vmul.f32 0.70710677, %v3236_v33  ;;  %v3221_v14 = vmul.f32 0.70710677, %v3205_v51  ;;  %v3190_v12 = vmul.f32 %v4344_v21, %v3043_v10  ;;  %v3081_v11 = vadd.f32 %v3080_v50, %v2968_v1  ;;  %v6089_v21 = vld [vmem:[#allocation23_spill] sm:$0xff] }
 0x420   : > { %v3146_v53 = vadd.f32 1.0, %v4346_v22  ;;  %v5796_v8 = vpop.f32.mrf.mxu1  ;;  %v3063_v22 = vadd.f32 %v5744_v29, %v2950_v17 }
 0x421   : > { %3268 = vst [vmem:[%s5746_s9 + $0x28] sm:$0xff] %v3252_v49  ;;  %v3237_v39 = vadd.f32 %v3221_v14, %v6086_v18  ;;  %v3206_v56 = vadd.f32 %v3190_v12, %v5539_v31  ;;  %v3793_v30 = vmul.f32 -1.442695, %v3081_v11  ;;  %v6087_v31 = vld [vmem:[#allocation20_spill] sm:$0xff]  ;;  %v2960_v11 = vadd.f32 %v5764_v46, %v5702_v24  ;;  %v6090_v18 = vld [vmem:[#allocation25_spill] sm:$0xff]  ;;  %v6091_v46 = vld [vmem:[#allocation27_spill] sm:$0xff] }
 0x422   : > { %4357 = vrcp.f32 %v3146_v53  ;;  %v3084_v60 = vpop.f32.mrf.mxu1 }
 0x423   : > { %v4348_v9 = vpop.eup %4347  ;;  %v3253_v4 = vmul.f32 0.70710677, %v3237_v39  ;;  %v3222_v28 = vmul.f32 0.70710677, %v3206_v56  ;;  %4359 = vpow2.f32 %v3793_v30  ;;  %v3085_v32 = vadd.f32 %v3084_v60, %v2972_v42 }
 0x424   : > { %v4350_v45 = vpop.eup %4349  ;;  %v3191_v58 = vmul.f32 %v4348_v9, %v3049_v59  ;;  %v3073_v62 = vadd.f32 %v5766_v43, %v2960_v11 }
 0x425   : > { %3269 = vst [vmem:[%s5746_s9 + $0x30] sm:$0xff] %v3253_v4  ;;  %v3238_v35 = vadd.f32 %v3222_v28, %v6087_v31  ;;  %v3147_v63 = vadd.f32 1.0, %v4350_v45  ;;  %v3794_v13 = vmul.f32 -1.442695, %v3085_v32 }
 0x426   : > { %v4352_v55 = vpop.eup %4351  ;;  %v3207_v20 = vadd.f32 %v3191_v58, %v5560_v41  ;;  %v3059_v41 = vadd.f32 %v5734_v54, %v2946_v2  ;;  %v6092_v58 = vld [vmem:[#allocation30_spill] sm:$0xff]  ;;  %v2970_v2 = vadd.f32 %v5781_v19, %v5702_v24 }
 0x427   : > { %v4354_v7 = vpop.eup %4353  ;;  %v3254_v15 = vmul.f32 0.70710677, %v3238_v35  ;;  %4361 = vrcp.f32 %v3147_v63  ;;  %v3148_v25 = vadd.f32 1.0, %v4352_v55  ;;  %v6093_v63 = vld [vmem:[#allocation33_spill] sm:$0xff]  ;;  %v2966_v55 = vadd.f32 %v5775_v16, %v5702_v24 }
 0x428   : > { %v3223_v52 = vmul.f32 0.70710677, %v3207_v20  ;;  %v3192_v3 = vmul.f32 %v4354_v7, %v3053_v5  ;;  %4363 = vpow2.f32 %v3794_v13 }
 0x429   : > { %3270 = vst [vmem:[%s5746_s9 + $0x38] sm:$0xff] %v3254_v15  ;;  %4365 = vrcp.f32 %v3148_v25  ;;  %v3079_v20 = vadd.f32 %v5787_v26, %v2966_v55  ;;  %v3083_v15 = vadd.f32 %v5796_v8, %v2970_v2 }
 0x42a   : > { %v3239_v36 = vadd.f32 %v3223_v52, %v6088_v61  ;;  %v3208_v33 = vadd.f32 %v3192_v3, %v5571_v57  ;;  %v2956_v57 = vadd.f32 %v5755_v38, %v5702_v24  ;;  %v6094_v3 = vld [vmem:[#allocation36_spill] sm:$0xff]  ;;  %v6095_v24 = vld [vmem:[#allocation39_spill] sm:$0xff] }
 0x42b   : > { %v4356_v27 = vpop.eup %4355 }
 0x42c   : > { %v3255_v51 = vmul.f32 0.70710677, %v3239_v36  ;;  %v3224_v10 = vmul.f32 0.70710677, %v3208_v33  ;;  %v3193_v1 = vmul.f32 %v4356_v27, %v3059_v41  ;;  %v3069_v29 = vadd.f32 %v5757_v0, %v2956_v57 }
 0x42e   : > { %3271 = vst [vmem:[%s5746_s9 + $0x40] sm:$0xff] %v3255_v51  ;;  %v3240_v44 = vadd.f32 %v3224_v10, %v6089_v21  ;;  %v3209_v50 = vadd.f32 %v3193_v1, %v5590_v47 }
 0x42f   : > { %v4358_v49 = vpop.eup %4357 }
 0x430   : > { %v4360_v54 = vpop.eup %4359  ;;  %v3256_v14 = vmul.f32 0.70710677, %v3240_v44  ;;  %v3225_v12 = vmul.f32 0.70710677, %v3209_v50  ;;  %v3194_v23 = vmul.f32 %v4358_v49, %v3063_v22 }
 0x431   : > { %v3149_v53 = vadd.f32 1.0, %v4360_v54 }
 0x432   : > { %3272 = vst [vmem:[%s5746_s9 + $0x48] sm:$0xff] %v3256_v14  ;;  %v3241_v39 = vadd.f32 %v3225_v12, %v6090_v18  ;;  %v3210_v47 = vadd.f32 %v3194_v23, %v5601_v48 }
 0x433   : > { %4367 = vrcp.f32 %v3149_v53 }
 0x434   : > { %v4362_v56 = vpop.eup %4361  ;;  %v3257_v38 = vmul.f32 0.70710677, %v3241_v39  ;;  %v3226_v42 = vmul.f32 0.70710677, %v3210_v47 }
 0x435   : > { %v4364_v30 = vpop.eup %4363  ;;  %v3195_v59 = vmul.f32 %v4362_v56, %v3069_v29 }
 0x436   : > { %v4366_v60 = vpop.eup %4365  ;;  %3273 = vst [vmem:[%s5746_s9 + $0x50] sm:$0xff] %v3257_v38  ;;  %v3242_v9 = vadd.f32 %v3226_v42, %v6091_v46  ;;  %v3150_v4 = vadd.f32 1.0, %v4364_v30 }
 0x437   : > { %v3211_v28 = vadd.f32 %v3195_v59, %v5617_v40  ;;  %v3196_v48 = vmul.f32 %v4366_v60, %v3073_v62 }
 0x438   : > { %v3258_v0 = vmul.f32 0.70710677, %v3242_v9  ;;  %4369 = vrcp.f32 %v3150_v4 }
 0x439   : > { %v3227_v32 = vmul.f32 0.70710677, %v3211_v28  ;;  %v3212_v45 = vadd.f32 %v3196_v48, %v5625_v6 }
 0x43a   : > { %3274 = vst [vmem:[%s5746_s9 + $0x58] sm:$0xff] %v3258_v0 }
 0x43b   : > { %v3243_v31 = vadd.f32 %v3227_v32, %v6092_v58  ;;  %v3228_v35 = vmul.f32 0.70710677, %v3212_v45 }
 0x43d   : > { %v3259_v43 = vmul.f32 0.70710677, %v3243_v31  ;;  %v3244_v13 = vadd.f32 %v3228_v35, %v6093_v63 }
 0x43f   : > { %3275 = vst [vmem:[%s5746_s9 + $0x60] sm:$0xff] %v3259_v43  ;;  %v3260_v40 = vmul.f32 0.70710677, %v3244_v13 }
 0x440   : > { %v4368_v5 = vpop.eup %4367 }
 0x441   : > { %3276 = vst [vmem:[%s5746_s9 + $0x68] sm:$0xff] %v3260_v40  ;;  %v3197_v6 = vmul.f32 %v4368_v5, %v3079_v20 }
 0x443   : > { %v3213_v7 = vadd.f32 %v3197_v6, %v5639_v34 }
 0x445   : > { %v4370_v16 = vpop.eup %4369  ;;  %v3229_v25 = vmul.f32 0.70710677, %v3213_v7 }
 0x446   : > { %v3198_v52 = vmul.f32 %v4370_v16, %v3083_v15 }
 0x447   : > { %v3245_v61 = vadd.f32 %v3229_v25, %v6094_v3 }
 0x448   : > { %v3214_v26 = vadd.f32 %v3198_v52, %v5646_v37 }
 0x449   : > { %v3261_v36 = vmul.f32 0.70710677, %v3245_v61 }
 0x44a   : > { %v3230_v33 = vmul.f32 0.70710677, %v3214_v26 }
 0x44b   : > { %3277 = vst [vmem:[%s5746_s9 + $0x70] sm:$0xff] %v3261_v36 }
 0x44c   : > { %v3246_v19 = vadd.f32 %v3230_v33, %v6095_v24 }
 0x44e   : > { %v3262_v34 = vmul.f32 0.70710677, %v3246_v19 }
 0x450   : > { %3278 = vst [vmem:[%s5746_s9 + $0x78] sm:$0xff] %v3262_v34 }
 0x451   : > { %4410 = shalt.err (!%p4407_p0)
}
 0x452   : > { %s4411_s18 = scalar_lea.hbm %s5855_s12, 2048  ;;  %s4415_s26 = scalar_lea.hbm %s5908_s6, 4096 }
 0x453   : > { %p4412_p1 = scmp.ne.s32.totalorder %s5855_s12, %s4411_s18  ;;  %p4416_p4 = scmp.lt.s32.totalorder %s5855_s12, %s5908_s6 }
 0x454   : > { %p4417_p7 = scmp.lt.s32.totalorder %s4415_s26, %s4411_s18 }
 0x455   : > { %p4413_p2 = pnand %p4412_p1, %p4544_p5 }
 0x456   : > { %p4418_p6 = por %p4417_p7, %p4416_p4 }
 0x457   : > { %p4414_p3 = pneg %p4413_p2 }
 0x459   : > { %p4419_p8 = pnand %p4418_p6, %p4414_p3 }
 0x45b   : > { %4422 = shalt.err (!%p4419_p8)
}
 0x45c   : > { %s4469_s10 = smov 128   ;;  %s4470_s17 = smov 8  }
 0x45d   : > { %3825 = dma.vmem_to_hbm [thread:$0]  (%p4544_p5), %s5857_s11, 2048, %s5855_s12, %s5862_s13, %s4469_s10, %s4469_s10, %s4470_s17  }
 0x45e PF: > { %p3837_p9 = scmp.ge.s32.totalorder %s4461_s24, 2  ;;  %s3309_s28 = sand.u32 1, %s4449_s21  }
 0x45f   : > { %p6096_p10 = scmp.ne.s32.totalorder %s5971_s8, 0  ;;  %s3310_s25 = scalar_lea.sflag [#allocation4], %s3309_s28 }
 0x461   : > { %p3832_p11 = pnand %p3837_p9, %p6096_p10 }
 0x463   : > { %p3833_p12 = pneg %p3832_p11 }
 0x465   : > { %4444 = dma.done.wait (%p3833_p12), %s3310_s25, 2048  }
 0x466   : > { %4446 = vsyncadd (%p3833_p12), %s3310_s25, 4294965248  ;;  %p17_p13 = scmp.ge.s32.totalorder %s4531_s27, 4   ;;  %s6097_s21 = smov %s4453_s22 }
 0x467   : > { %s6098_s22 = smov %s4457_s23  ;;  %s6099_s23 = smov %s4542_s30 }
 0x468   : > { %s6100_s24 = smov %s4531_s27  ;;  %19 = sbr.rel (!%p17_p13) target bundleno = 4 (0x4), region = 91 }
 0x46d   :  { %3315 = vsyncpa [#allocation3], 1 }
 0x46e   :  { %3317 = vsyncpa [#allocation3 + $0x1], 1 }
 0x46f   :  { %3318 = vsyncpa [#allocation4], 1 }
 0x470   :  { %3320 = vsyncpa [#allocation4 + $0x1], 1 }

</bundles_post_ra>
